<compile_context>
chip_gen: v7x
topology: tpu7x:2x2x1
jax: 0.10.0
libtpu: 0.0.40
codegen_flags: <defaults>
</compile_context>

<pallas_src>
import math

import jax
import jax.numpy as jnp
from jax import lax
from jax.experimental import pallas as pl
from jax.experimental.pallas import tpu as pltpu


# ------------------------------- Pallas kernel -------------------------------

def _fused_forward_kernel(obs_ref, act_ref,
                          w1_ref, b1_ref,
                          w2_ref, b2_ref,
                          wfc_ref, bfc_ref,
                          wh1x_ref, wh1a_ref, bh1_ref,
                          wh2_ref, bh2_ref,
                          q_ref):
    f32 = jnp.float32
    x = obs_ref[...]                                                   # (TB, C*H*W)

    # conv1 (k=4, valid) folded to dense matmul, + bias + ReLU       -> (TB, pad128(25*32))
    y = jnp.dot(x, w1_ref[...], preferred_element_type=f32) + b1_ref[...]
    y = jnp.maximum(y, 0.0)

    # conv2 (k=2, valid) folded to dense matmul, + bias + ReLU       -> (TB, pad128(16*32))
    y = jnp.dot(y, w2_ref[...], preferred_element_type=f32) + b2_ref[...]
    y = jnp.maximum(y, 0.0)

    # trunk Linear + ReLU                                            -> (TB, pad128(hidden))
    h = jnp.dot(y, wfc_ref[...], preferred_element_type=f32) + bfc_ref[...]
    h = jnp.maximum(h, 0.0)

    # both critic heads, first layer: concat([h, action]) @ [W1 | W2] done as two dots
    hh = (jnp.dot(h, wh1x_ref[...], preferred_element_type=f32)
          + jnp.dot(act_ref[...], wh1a_ref[...], preferred_element_type=f32)
          + bh1_ref[...])
    hh = jnp.maximum(hh, 0.0)                                          # (TB, pad128(2*hidden))

    # second layers packed block-diagonal -> (TB, 2) = (q1 | q2)
    q = jnp.dot(hh, wh2_ref[...], preferred_element_type=f32) + bh2_ref[...]
    q_ref[...] = q.astype(q_ref.dtype)


_MAX_TILE = 512  # batch rows per grid step (fits comfortably in VMEM with all weights)


def double_q_critic_forward(packed, obs, action):
    """obs: (B, C, H, W) float32 NCHW (same as the PyTorch module); action: (B, A).
    Returns (q1, q2), each (B, 1).  (The original `inputs / 1.0` is an identity and dropped.)"""
    assert obs.shape[0] == action.shape[0]
    B = obs.shape[0]
    kin = obs.shape[1] * obs.shape[2] * obs.shape[3]
    obs_flat = obs.reshape(B, kin)          # free reshape; NCHW order folded into W1 packing
    A = action.shape[1]

    # Batch tiling: pad B up to a multiple of the tile instead of divisor-hunting.
    if B <= _MAX_TILE:
        tb, Bp = B, B
    else:
        tb = _MAX_TILE
        Bp = ((B + tb - 1) // tb) * tb
        if Bp != B:
            obs_flat = jnp.pad(obs_flat, ((0, Bp - B), (0, 0)))
            action = jnp.pad(action, ((0, Bp - B), (0, 0)))
    nb = Bp // tb

    w1, b1 = packed["conv1_wd"], packed["conv1_bd"]
    w2, b2 = packed["conv2_wd"], packed["conv2_bd"]
    wfc, bfc = packed["fc_w"], packed["fc_b"]
    wh1x, wh1a, bh1 = packed["heads_l1_wx"], packed["heads_l1_wa"], packed["heads_l1_b"]
    wh2, bh2 = packed["heads_l2_w"], packed["heads_l2_b"]

    def full_spec(arr):
        # whole-array block, constant block index -> stays resident in VMEM across grid steps
        return pl.BlockSpec(arr.shape, lambda i: (0, 0))

    q = pl.pallas_call(
        _fused_forward_kernel,
        out_shape=jax.ShapeDtypeStruct((Bp, 2), jnp.float32),
        grid=(nb,),
        in_specs=[
            pl.BlockSpec((tb, kin), lambda i: (i, 0)),     # obs rows
            pl.BlockSpec((tb, A), lambda i: (i, 0)),       # action rows
            full_spec(w1), full_spec(b1),
            full_spec(w2), full_spec(b2),
            full_spec(wfc), full_spec(bfc),
            full_spec(wh1x), full_spec(wh1a), full_spec(bh1),
            full_spec(wh2), full_spec(bh2),
        ],
        out_specs=pl.BlockSpec((tb, 2), lambda i: (i, 0)),
        compiler_params=pltpu.CompilerParams(
            dimension_semantics=("parallel",)),
    )(obs_flat, action, w1, b1, w2, b2, wfc, bfc, wh1x, wh1a, bh1, wh2, bh2)

    q = q[:B]
    return q[:, 0:1], q[:, 1:2]


# --------------------------- parameters & packing ----------------------------

def orthogonal_init(key, shape, gain=1.0):
    rows = shape[0]
    cols = 1
    for d in shape[1:]:
        cols *= d
    n_max, n_min = max(rows, cols), min(rows, cols)
    a = jax.random.normal(key, (n_max, n_min), jnp.float32)
    q, r = jnp.linalg.qr(a)
    q = q * jnp.sign(jnp.diagonal(r))
    if rows < cols:
        q = q.T
    return (gain * q[:rows, :cols]).reshape(shape)


def make_params(key, num_inputs, hidden_size, action_dim, input_h, input_w):
    """Mirrors CNNBase.__init__ parameter shapes (orthogonal / normal(0.01) / zero bias)."""
    gain = math.sqrt(2.0)  # nn.init.calculate_gain('relu')
    h1, w1 = input_h - 4 + 1, input_w - 4 + 1        # conv1: k=4, stride 1
    h2, w2 = h1 - 2 + 1, w1 - 2 + 1                  # conv2: k=2, stride 1
    n_size = 32 * h2 * w2
    n_oa = hidden_size + action_dim
    ks = jax.random.split(key, 8)
    return {
        "conv1_w": orthogonal_init(ks[0], (32, num_inputs, 4, 4), gain),
        "conv1_b": jnp.zeros((32,), jnp.float32),
        "conv2_w": orthogonal_init(ks[1], (32, 32, 2, 2), gain),
        "conv2_b": jnp.zeros((32,), jnp.float32),
        "fc_w": orthogonal_init(ks[2], (hidden_size, n_size), gain),
        "fc_b": jnp.zeros((hidden_size,), jnp.float32),
        "h1_l1_w": orthogonal_init(ks[3], (hidden_size, n_oa), gain),
        "h1_l1_b": jnp.zeros((hidden_size,), jnp.float32),
        "h1_l2_w": 0.01 * jax.random.normal(ks[4], (1, hidden_size), jnp.float32),
        "h1_l2_b": jnp.zeros((1,), jnp.float32),
        "h2_l1_w": orthogonal_init(ks[5], (hidden_size, n_oa), gain),
        "h2_l1_b": jnp.zeros((hidden_size,), jnp.float32),
        "h2_l2_w": 0.01 * jax.random.normal(ks[6], (1, hidden_size), jnp.float32),
        "h2_l2_b": jnp.zeros((1,), jnp.float32),
    }


def _ru128(n):
    return ((n + 127) // 128) * 128


def _pad2(a, rows, cols):
    pr, pc = rows - a.shape[0], cols - a.shape[1]
    if pr == 0 and pc == 0:
        return a
    return jnp.pad(a, ((0, pr), (0, pc)))


def pack_params(params, num_inputs, input_h, input_w, hidden_size, action_dim):
    """One-time repack (outside the hot path): fold convs into dense matrices, fold all
    layout permutations / transposes into the weights, fuse the two heads, biases -> (1,N),
    zero-pad every internal feature width to a multiple of 128 (lane-dense activations)."""
    C, H, W = num_inputs, input_h, input_w
    h1, w1 = H - 4 + 1, W - 4 + 1
    h2, w2 = h1 - 2 + 1, w1 - 2 + 1
    dn = ("NCHW", "OIHW", "NCHW")

    def conv_as_matrix(weight, in_c, in_h, in_w, flat_is_hwc):
        """Dense M such that x_flat @ M == flatten_hwc(conv2d(x, weight, stride 1, valid))."""
        k_in = in_c * in_h * in_w
        eye = jnp.eye(k_in, dtype=jnp.float32)
        if flat_is_hwc:
            basis = eye.reshape(k_in, in_h, in_w, in_c).transpose(0, 3, 1, 2)
        else:                                          # flat index order is NCHW (c,h,w)
            basis = eye.reshape(k_in, in_c, in_h, in_w)
        out = lax.conv_general_dilated(basis, weight, (1, 1), "VALID",
                                       dimension_numbers=dn)       # (k_in, OC, oh, ow)
        oh, ow, oc = out.shape[2], out.shape[3], out.shape[1]
        return out.transpose(0, 2, 3, 1).reshape(k_in, oh * ow * oc)

    kin = C * H * W
    n1, n1p = 32 * h1 * w1, _ru128(32 * h1 * w1)       # conv1 output width (padded)
    n2, n2p = 32 * h2 * w2, _ru128(32 * h2 * w2)       # conv2 output width (padded)
    hid, hidp = hidden_size, _ru128(hidden_size)       # trunk hidden width (padded)
    g, gp = 2 * hidden_size, _ru128(2 * hidden_size)   # fused heads hidden width (padded)

    # conv1 consumes torch NCHW-flattened obs; conv2 consumes conv1's (h,w,c)-flat output
    conv1_wd = _pad2(conv_as_matrix(params["conv1_w"], C, H, W, flat_is_hwc=False), kin, n1p)
    conv1_bd = _pad2(jnp.tile(params["conv1_b"], h1 * w1).reshape(1, -1), 1, n1p)
    conv2_wd = _pad2(conv_as_matrix(params["conv2_w"], 32, h1, w1, flat_is_hwc=True), n1p, n2p)
    conv2_bd = _pad2(jnp.tile(params["conv2_b"], h2 * w2).reshape(1, -1), 1, n2p)

    # fc consumes torch's NCHW Flatten; permute its columns to the (h,w,c)-flat order
    fc_w = params["fc_w"].reshape(hid, 32, h2, w2)
    fc_w = fc_w.transpose(2, 3, 1, 0).reshape(n2, hid)
    fc_w = _pad2(fc_w, n2p, hidp)
    fc_b = _pad2(params["fc_b"].reshape(1, -1), 1, hidp)

    # fuse the two critic heads: first layers side by side, second layers block-diagonal
    wh1 = jnp.concatenate([params["h1_l1_w"].T, params["h2_l1_w"].T], axis=1)  # (hid+A, 2*hid)
    heads_l1_wx = _pad2(wh1[:hid], hidp, gp)
    heads_l1_wa = _pad2(wh1[hid:], action_dim, gp)
    heads_l1_b = _pad2(jnp.concatenate([params["h1_l1_b"], params["h2_l1_b"]]).reshape(1, -1),
                       1, gp)
    heads_l2_w = jnp.zeros((gp, 2), jnp.float32)
    heads_l2_w = heads_l2_w.at[:hid, 0].set(params["h1_l2_w"][0])
    heads_l2_w = heads_l2_w.at[hid:g, 1].set(params["h2_l2_w"][0])
    heads_l2_b = jnp.stack([params["h1_l2_b"][0], params["h2_l2_b"][0]]).reshape(1, 2)

    return {
        "conv1_wd": conv1_wd, "conv1_bd": conv1_bd,
        "conv2_wd": conv2_wd, "conv2_bd": conv2_bd,
        "fc_w": fc_w, "fc_b": fc_b,
        "heads_l1_wx": heads_l1_wx, "heads_l1_wa": heads_l1_wa, "heads_l1_b": heads_l1_b,
        "heads_l2_w": heads_l2_w, "heads_l2_b": heads_l2_b,
    }


# --------------------------- plain-JAX reference -----------------------------

def reference_forward(params, obs, action):
    """Direct transcription of the PyTorch graph (for correctness checking only)."""
    dn = ("NCHW", "OIHW", "NCHW")
    x = lax.conv_general_dilated(obs, params["conv1_w"], (1, 1), "VALID", dimension_numbers=dn)
    x = jax.nn.relu(x + params["conv1_b"][None, :, None, None])
    x = lax.conv_general_dilated(x, params["conv2_w"], (1, 1), "VALID", dimension_numbers=dn)
    x = jax.nn.relu(x + params["conv2_b"][None, :, None, None])
    feat = x.reshape(x.shape[0], -1)                                   # torch NCHW flatten
    h = jax.nn.relu(feat @ params["fc_w"].T + params["fc_b"])
    oa = jnp.concatenate([h, action], axis=-1)
    h1 = jax.nn.relu(oa @ params["h1_l1_w"].T + params["h1_l1_b"])
    q1 = h1 @ params["h1_l2_w"].T + params["h1_l2_b"]
    h2 = jax.nn.relu(oa @ params["h2_l1_w"].T + params["h2_l1_b"])
    q2 = h2 @ params["h2_l2_w"].T + params["h2_l2_b"]
    return q1, q2


if __name__ == "__main__":
    # DoubleQCritic(cnn_shape=(4, 8, 8), obs_dim=32, action_dim=16, ...)
    num_inputs, input_h, input_w = 4, 8, 8
    hidden_size = 32
    action_dim = 16
    batch = 2

    key = jax.random.PRNGKey(0)
    k_param, k_obs, k_act = jax.random.split(key, 3)
    params = make_params(k_param, num_inputs, hidden_size, action_dim, input_h, input_w)
    packed = pack_params(params, num_inputs, input_h, input_w, hidden_size, action_dim)

    obs = jax.random.normal(k_obs, (batch, num_inputs, input_h, input_w), jnp.float32)
    action = jax.random.normal(k_act, (batch, action_dim), jnp.float32)

    fwd = jax.jit(double_q_critic_forward)
    q1, q2 = fwd(packed, obs, action)
    jax.block_until_ready((q1, q2))
    assert q1.shape == (batch, 1) and q2.shape == (batch, 1)

    # correctness vs the plain-JAX transcription of the PyTorch module
    r1, r2 = reference_forward(params, obs, action)
    assert jnp.allclose(q1, r1, atol=1e-3, rtol=1e-3)
    assert jnp.allclose(q2, r2, atol=1e-3, rtol=1e-3)

    print("KERNEL_OK")
</pallas_src>

<mosaic_0001>
module attributes {stable_mosaic.version = 11 : i64} {
  func.func @_fused_forward_kernel(%arg0: i32, %arg1: memref<2x256xf32, #tpu.memory_space<vmem>>, %arg2: memref<2x16xf32, #tpu.memory_space<vmem>>, %arg3: memref<256x896xf32, #tpu.memory_space<vmem>>, %arg4: memref<1x896xf32, #tpu.memory_space<vmem>>, %arg5: memref<896x512xf32, #tpu.memory_space<vmem>>, %arg6: memref<1x512xf32, #tpu.memory_space<vmem>>, %arg7: memref<512x128xf32, #tpu.memory_space<vmem>>, %arg8: memref<1x128xf32, #tpu.memory_space<vmem>>, %arg9: memref<128x128xf32, #tpu.memory_space<vmem>>, %arg10: memref<16x128xf32, #tpu.memory_space<vmem>>, %arg11: memref<1x128xf32, #tpu.memory_space<vmem>>, %arg12: memref<128x2xf32, #tpu.memory_space<vmem>>, %arg13: memref<1x2xf32, #tpu.memory_space<vmem>>, %arg14: memref<2x2xf32, #tpu.memory_space<vmem>>) attributes {dimension_semantics = [#tpu.dimension_semantics<parallel>], iteration_bounds = array<i64: 1>, scalar_prefetch = 0 : i64, scratch_operands = 0 : i64, tpu.core_type = #tpu.core_type<tc>, window_params = [{transform_indices = @transform_0, window_bounds = array<i64: 2, 256>}, {transform_indices = @transform_1, window_bounds = array<i64: 2, 16>}, {pipeline_mode = #tpu.pipeline_mode<synchronous>, transform_indices = @transform_2, window_bounds = array<i64: 256, 896>}, {pipeline_mode = #tpu.pipeline_mode<synchronous>, transform_indices = @transform_3, window_bounds = array<i64: 1, 896>}, {pipeline_mode = #tpu.pipeline_mode<synchronous>, transform_indices = @transform_4, window_bounds = array<i64: 896, 512>}, {pipeline_mode = #tpu.pipeline_mode<synchronous>, transform_indices = @transform_5, window_bounds = array<i64: 1, 512>}, {pipeline_mode = #tpu.pipeline_mode<synchronous>, transform_indices = @transform_6, window_bounds = array<i64: 512, 128>}, {pipeline_mode = #tpu.pipeline_mode<synchronous>, transform_indices = @transform_7, window_bounds = array<i64: 1, 128>}, {pipeline_mode = #tpu.pipeline_mode<synchronous>, transform_indices = @transform_8, window_bounds = array<i64: 128, 128>}, {pipeline_mode = #tpu.pipeline_mode<synchronous>, transform_indices = @transform_9, window_bounds = array<i64: 16, 128>}, {pipeline_mode = #tpu.pipeline_mode<synchronous>, transform_indices = @transform_10, window_bounds = array<i64: 1, 128>}, {pipeline_mode = #tpu.pipeline_mode<synchronous>, transform_indices = @transform_11, window_bounds = array<i64: 128, 2>}, {pipeline_mode = #tpu.pipeline_mode<synchronous>, transform_indices = @transform_12, window_bounds = array<i64: 1, 2>}, {transform_indices = @transform_13, window_bounds = array<i64: 2, 2>}]} {
    %c0 = arith.constant 0 : index
    %c0_0 = arith.constant 0 : index
    %0 = vector.load %arg1[%c0, %c0_0] : memref<2x256xf32, #tpu.memory_space<vmem>>, vector<2x256xf32>
    %c0_1 = arith.constant 0 : index
    %c0_2 = arith.constant 0 : index
    %1 = vector.load %arg3[%c0_1, %c0_2] : memref<256x896xf32, #tpu.memory_space<vmem>>, vector<256x896xf32>
    %cst = arith.constant dense<0.000000e+00> : vector<2x896xf32>
    %2 = tpu.matmul %0, %1, %cst {dimension_numbers = #tpu.dot_dimension_numbers<[1], [0], [0], [1], [0, 0, 1, 1], [], []>} : vector<2x256xf32>, vector<256x896xf32>, vector<2x896xf32> -> vector<2x896xf32>
    %c0_3 = arith.constant 0 : index
    %c0_4 = arith.constant 0 : index
    %3 = vector.load %arg4[%c0_3, %c0_4] : memref<1x896xf32, #tpu.memory_space<vmem>>, vector<1x896xf32>
    %4 = vector.broadcast %3 : vector<1x896xf32> to vector<2x896xf32>
    %5 = arith.addf %2, %4 : vector<2x896xf32>
    %cst_5 = arith.constant 0.000000e+00 : f32
    %6 = vector.broadcast %cst_5 : f32 to vector<2x896xf32>
    %7 = arith.maximumf %5, %6 : vector<2x896xf32>
    %c0_6 = arith.constant 0 : index
    %c0_7 = arith.constant 0 : index
    %8 = vector.load %arg5[%c0_6, %c0_7] : memref<896x512xf32, #tpu.memory_space<vmem>>, vector<896x512xf32>
    %cst_8 = arith.constant dense<0.000000e+00> : vector<2x512xf32>
    %9 = tpu.matmul %7, %8, %cst_8 {dimension_numbers = #tpu.dot_dimension_numbers<[1], [0], [0], [1], [0, 0, 1, 1], [], []>} : vector<2x896xf32>, vector<896x512xf32>, vector<2x512xf32> -> vector<2x512xf32>
    %c0_9 = arith.constant 0 : index
    %c0_10 = arith.constant 0 : index
    %10 = vector.load %arg6[%c0_9, %c0_10] : memref<1x512xf32, #tpu.memory_space<vmem>>, vector<1x512xf32>
    %11 = vector.broadcast %10 : vector<1x512xf32> to vector<2x512xf32>
    %12 = arith.addf %9, %11 : vector<2x512xf32>
    %cst_11 = arith.constant 0.000000e+00 : f32
    %13 = vector.broadcast %cst_11 : f32 to vector<2x512xf32>
    %14 = arith.maximumf %12, %13 : vector<2x512xf32>
    %c0_12 = arith.constant 0 : index
    %c0_13 = arith.constant 0 : index
    %15 = vector.load %arg7[%c0_12, %c0_13] : memref<512x128xf32, #tpu.memory_space<vmem>>, vector<512x128xf32>
    %cst_14 = arith.constant dense<0.000000e+00> : vector<2x128xf32>
    %16 = tpu.matmul %14, %15, %cst_14 {dimension_numbers = #tpu.dot_dimension_numbers<[1], [0], [0], [1], [0, 0, 1, 1], [], []>} : vector<2x512xf32>, vector<512x128xf32>, vector<2x128xf32> -> vector<2x128xf32>
    %c0_15 = arith.constant 0 : index
    %c0_16 = arith.constant 0 : index
    %17 = vector.load %arg8[%c0_15, %c0_16] : memref<1x128xf32, #tpu.memory_space<vmem>>, vector<1x128xf32>
    %18 = vector.broadcast %17 : vector<1x128xf32> to vector<2x128xf32>
    %19 = arith.addf %16, %18 : vector<2x128xf32>
    %cst_17 = arith.constant 0.000000e+00 : f32
    %20 = vector.broadcast %cst_17 : f32 to vector<2x128xf32>
    %21 = arith.maximumf %19, %20 : vector<2x128xf32>
    %c0_18 = arith.constant 0 : index
    %c0_19 = arith.constant 0 : index
    %22 = vector.load %arg9[%c0_18, %c0_19] : memref<128x128xf32, #tpu.memory_space<vmem>>, vector<128x128xf32>
    %cst_20 = arith.constant dense<0.000000e+00> : vector<2x128xf32>
    %23 = tpu.matmul %21, %22, %cst_20 {dimension_numbers = #tpu.dot_dimension_numbers<[1], [0], [0], [1], [0, 0, 1, 1], [], []>} : vector<2x128xf32>, vector<128x128xf32>, vector<2x128xf32> -> vector<2x128xf32>
    %c0_21 = arith.constant 0 : index
    %c0_22 = arith.constant 0 : index
    %24 = vector.load %arg2[%c0_21, %c0_22] : memref<2x16xf32, #tpu.memory_space<vmem>>, vector<2x16xf32>
    %c0_23 = arith.constant 0 : index
    %c0_24 = arith.constant 0 : index
    %25 = vector.load %arg10[%c0_23, %c0_24] : memref<16x128xf32, #tpu.memory_space<vmem>>, vector<16x128xf32>
    %cst_25 = arith.constant dense<0.000000e+00> : vector<2x128xf32>
    %26 = tpu.matmul %24, %25, %cst_25 {dimension_numbers = #tpu.dot_dimension_numbers<[1], [0], [0], [1], [0, 0, 1, 1], [], []>} : vector<2x16xf32>, vector<16x128xf32>, vector<2x128xf32> -> vector<2x128xf32>
    %27 = arith.addf %23, %26 : vector<2x128xf32>
    %c0_26 = arith.constant 0 : index
    %c0_27 = arith.constant 0 : index
    %28 = vector.load %arg11[%c0_26, %c0_27] : memref<1x128xf32, #tpu.memory_space<vmem>>, vector<1x128xf32>
    %29 = vector.broadcast %28 : vector<1x128xf32> to vector<2x128xf32>
    %30 = arith.addf %27, %29 : vector<2x128xf32>
    %cst_28 = arith.constant 0.000000e+00 : f32
    %31 = vector.broadcast %cst_28 : f32 to vector<2x128xf32>
    %32 = arith.maximumf %30, %31 : vector<2x128xf32>
    %c0_29 = arith.constant 0 : index
    %c0_30 = arith.constant 0 : index
    %33 = vector.load %arg12[%c0_29, %c0_30] : memref<128x2xf32, #tpu.memory_space<vmem>>, vector<128x2xf32>
    %cst_31 = arith.constant dense<0.000000e+00> : vector<2x2xf32>
    %34 = tpu.matmul %32, %33, %cst_31 {dimension_numbers = #tpu.dot_dimension_numbers<[1], [0], [0], [1], [0, 0, 1, 1], [], []>} : vector<2x128xf32>, vector<128x2xf32>, vector<2x2xf32> -> vector<2x2xf32>
    %c0_32 = arith.constant 0 : index
    %c0_33 = arith.constant 0 : index
    %35 = vector.load %arg13[%c0_32, %c0_33] : memref<1x2xf32, #tpu.memory_space<vmem>>, vector<1x2xf32>
    %36 = vector.broadcast %35 : vector<1x2xf32> to vector<2x2xf32>
    %37 = arith.addf %34, %36 : vector<2x2xf32>
    %c0_34 = arith.constant 0 : index
    %c0_35 = arith.constant 0 : index
    %38 = vector.load %arg14[%c0_34, %c0_35] : memref<2x2xf32, #tpu.memory_space<vmem>>, vector<2x2xf32>
    tpu.vector_store %arg14[%c0_34, %c0_35], %37 {strides = array<i32>} : memref<2x2xf32, #tpu.memory_space<vmem>>, vector<2x2xf32>,
    return
  }
  func.func @transform_0(%arg0: i32) -> (i32, i32) {
    %c0_i32 = arith.constant 0 : i32
    %c0_i32_0 = arith.constant 0 : i32
    return %arg0, %c0_i32 : i32, i32
  }
  func.func @transform_1(%arg0: i32) -> (i32, i32) {
    %c0_i32 = arith.constant 0 : i32
    %c0_i32_0 = arith.constant 0 : i32
    return %arg0, %c0_i32 : i32, i32
  }
  func.func @transform_2(%arg0: i32) -> (i32, i32) {
    %c0_i32 = arith.constant 0 : i32
    %c0_i32_0 = arith.constant 0 : i32
    %c0_i32_1 = arith.constant 0 : i32
    return %c0_i32, %c0_i32_0 : i32, i32
  }
  func.func @transform_3(%arg0: i32) -> (i32, i32) {
    %c0_i32 = arith.constant 0 : i32
    %c0_i32_0 = arith.constant 0 : i32
    %c0_i32_1 = arith.constant 0 : i32
    return %c0_i32, %c0_i32_0 : i32, i32
  }
  func.func @transform_4(%arg0: i32) -> (i32, i32) {
    %c0_i32 = arith.constant 0 : i32
    %c0_i32_0 = arith.constant 0 : i32
    %c0_i32_1 = arith.constant 0 : i32
    return %c0_i32, %c0_i32_0 : i32, i32
  }
  func.func @transform_5(%arg0: i32) -> (i32, i32) {
    %c0_i32 = arith.constant 0 : i32
    %c0_i32_0 = arith.constant 0 : i32
    %c0_i32_1 = arith.constant 0 : i32
    return %c0_i32, %c0_i32_0 : i32, i32
  }
  func.func @transform_6(%arg0: i32) -> (i32, i32) {
    %c0_i32 = arith.constant 0 : i32
    %c0_i32_0 = arith.constant 0 : i32
    %c0_i32_1 = arith.constant 0 : i32
    return %c0_i32, %c0_i32_0 : i32, i32
  }
  func.func @transform_7(%arg0: i32) -> (i32, i32) {
    %c0_i32 = arith.constant 0 : i32
    %c0_i32_0 = arith.constant 0 : i32
    %c0_i32_1 = arith.constant 0 : i32
    return %c0_i32, %c0_i32_0 : i32, i32
  }
  func.func @transform_8(%arg0: i32) -> (i32, i32) {
    %c0_i32 = arith.constant 0 : i32
    %c0_i32_0 = arith.constant 0 : i32
    %c0_i32_1 = arith.constant 0 : i32
    return %c0_i32, %c0_i32_0 : i32, i32
  }
  func.func @transform_9(%arg0: i32) -> (i32, i32) {
    %c0_i32 = arith.constant 0 : i32
    %c0_i32_0 = arith.constant 0 : i32
    %c0_i32_1 = arith.constant 0 : i32
    return %c0_i32, %c0_i32_0 : i32, i32
  }
  func.func @transform_10(%arg0: i32) -> (i32, i32) {
    %c0_i32 = arith.constant 0 : i32
    %c0_i32_0 = arith.constant 0 : i32
    %c0_i32_1 = arith.constant 0 : i32
    return %c0_i32, %c0_i32_0 : i32, i32
  }
  func.func @transform_11(%arg0: i32) -> (i32, i32) {
    %c0_i32 = arith.constant 0 : i32
    %c0_i32_0 = arith.constant 0 : i32
    %c0_i32_1 = arith.constant 0 : i32
    return %c0_i32, %c0_i32_0 : i32, i32
  }
  func.func @transform_12(%arg0: i32) -> (i32, i32) {
    %c0_i32 = arith.constant 0 : i32
    %c0_i32_0 = arith.constant 0 : i32
    %c0_i32_1 = arith.constant 0 : i32
    return %c0_i32, %c0_i32_0 : i32, i32
  }
  func.func @transform_13(%arg0: i32) -> (i32, i32) {
    %c0_i32 = arith.constant 0 : i32
    %c0_i32_0 = arith.constant 0 : i32
    return %arg0, %c0_i32 : i32, i32
  }
}

</mosaic_0001>

<bundles_post_ra>
// kernel: double_q_critic_forward.1
= control target key start
LH: loop header
LB: loop body
LE: loop exit
PB: predicated region body
PF: predicated region fallthrough
CT: control target
= control target key end

     0   :  { %18 = vsyncpa [#allocation3], 0  ;;  %s3943_s0 = inlined_call_operand.vmem [shape: f32[2,256], index: 0, kind: input, shape index: {}]   ;;  %s3944_s1 = inlined_call_operand.hbm [shape: f32[2,16], index: 1, kind: input, shape index: {}]   ;;  %s3945_s2 = inlined_call_operand.hbm [shape: f32[256,896], index: 2, kind: input, shape index: {}]   ;;  %s3946_s3 = inlined_call_operand.hbm [shape: f32[1,896], index: 3, kind: input, shape index: {}]   ;;  %s3947_s4 = inlined_call_operand.hbm [shape: f32[896,512], index: 4, kind: input, shape index: {}]   ;;  %s3948_s5 = inlined_call_operand.hbm [shape: f32[1,512], index: 5, kind: input, shape index: {}]   ;;  %s3949_s6 = inlined_call_operand.hbm [shape: f32[512,128], index: 6, kind: input, shape index: {}]   ;;  %s3950_s7 = inlined_call_operand.hbm [shape: f32[1,128], index: 7, kind: input, shape index: {}]   ;;  %s3951_s8 = inlined_call_operand.hbm [shape: f32[128,128], index: 8, kind: input, shape index: {}]   ;;  %s3952_s9 = inlined_call_operand.hbm [shape: f32[16,128], index: 9, kind: input, shape index: {}]   ;;  %s3953_s10 = inlined_call_operand.hbm [shape: f32[1,128], index: 10, kind: input, shape index: {}]   ;;  %s3954_s11 = inlined_call_operand.vmem [shape: f32[128,2], index: 11, kind: input, shape index: {}]   ;;  %s3955_s12 = inlined_call_operand.hbm [shape: f32[1,2], index: 12, kind: input, shape index: {}]   ;;  %s3956_s13 = inlined_call_operand.vmem [shape: f32[2,2], index: 13, kind: output, shape index: {}]  }
   0x1   :  { %19 = vsyncpa [#allocation5], 0 }
   0x2   :  { %20 = vsyncpa [#allocation8], 0 }
   0x3   :  { %21 = vsyncpa [#allocation11], 0 }
   0x4   :  { %22 = vsyncpa [#allocation14], 0 }
   0x5   :  { %23 = vsyncpa [#allocation17], 0  ;;  %s3577_s25 = smov [#allocation4]   ;;  %s3323_s29 = scalar_lea.hbm %s3945_s2, 28672 }
   0x6   :  { %s41_s26 = sshll.u32 %s3577_s25, 4  ;;  %p3324_p0 = scmp.ne.s32.totalorder %s3945_s2, %s3323_s29  ;;  %s42_s26 = int_to_ptr.vmem [resolvable:$true] %s41_s26 }
   0x7   :  { %p3327_p1 = scmp.lt.u32.totalorder %s3323_s29, %s3945_s2 }
   0x9   :  { %p3329_p2 = pnand %p3327_p1, %p3324_p0 }
   0xb   :  { %3332 = shalt.err (!%p3329_p2)
}
   0xc   :  { %s3333_s17 = scalar_lea.vmem %s42_s26, 28672  ;;  %p3338_p4 = scmp.lt.s32.totalorder %s42_s26, %s42_s26 }
   0xd   :  { %p3334_p3 = scmp.ne.s32.totalorder %s42_s26, %s3333_s17  ;;  %p3339_p5 = scmp.lt.s32.totalorder %s3333_s17, %s3333_s17 }
   0xf   :  { %p3340_p6 = por %p3339_p5, %p3338_p4 }
  0x11   :  { %p3341_p7 = pnand %p3340_p6, %p3334_p3 }
  0x13   :  { %3344 = shalt.err (!%p3341_p7)
}
  0x14   :  { %s3578_s18 = smov 896   ;;  %s3579_s19 = smov 56  }
  0x15   :  { %47 = dma.hbm_to_vmem [thread:$0]  %s3945_s2, 28672, %s42_s26, [#allocation5], %s3578_s18, %s3578_s18, %s3579_s19  }
  0x16   :  { %s3580_s22 = smov [#allocation7]   ;;  %s3345_s27 = scalar_lea.hbm %s3947_s4, 57344 }
  0x17   :  { %s63_s23 = sshll.u32 %s3580_s22, 4  ;;  %p3346_p8 = scmp.ne.s32.totalorder %s3947_s4, %s3345_s27  ;;  %s64_s23 = int_to_ptr.vmem [resolvable:$true] %s63_s23 }
  0x18   :  { %p3349_p9 = scmp.lt.u32.totalorder %s3345_s27, %s3947_s4 }
  0x1a   :  { %p3351_p10 = pnand %p3349_p9, %p3346_p8 }
  0x1c   :  { %3354 = shalt.err (!%p3351_p10)
}
  0x1d   :  { %s3355_s15 = scalar_lea.vmem %s64_s23, 57344  ;;  %p3360_p12 = scmp.lt.s32.totalorder %s64_s23, %s64_s23 }
  0x1e   :  { %p3356_p11 = scmp.ne.s32.totalorder %s64_s23, %s3355_s15  ;;  %p3361_p13 = scmp.lt.s32.totalorder %s3355_s15, %s3355_s15 }
  0x20   :  { %p3362_p0 = por %p3361_p13, %p3360_p12 }
  0x22   :  { %p3363_p1 = pnand %p3362_p0, %p3356_p11 }
  0x24   :  { %3366 = shalt.err (!%p3363_p1)
}
  0x25   :  { %s3581_s2 = smov 512   ;;  %s3582_s26 = smov 32  }
  0x26   :  { %69 = dma.hbm_to_vmem [thread:$0]  %s3947_s4, 57344, %s64_s23, [#allocation8], %s3581_s2, %s3581_s2, %s3582_s26  }
  0x27   :  { %s3583_s18 = smov [#allocation10]   ;;  %s3367_s22 = scalar_lea.hbm %s3949_s6, 8192 }
  0x28   :  { %s85_s19 = sshll.u32 %s3583_s18, 4  ;;  %p3368_p2 = scmp.ne.s32.totalorder %s3949_s6, %s3367_s22  ;;  %s86_s19 = int_to_ptr.vmem [resolvable:$true] %s85_s19 }
  0x29   :  { %p3371_p3 = scmp.lt.u32.totalorder %s3367_s22, %s3949_s6 }
  0x2b   :  { %p3373_p4 = pnand %p3371_p3, %p3368_p2 }
  0x2d   :  { %3376 = shalt.err (!%p3373_p4)
}
  0x2e   :  { %s3377_s29 = scalar_lea.vmem %s86_s19, 8192  ;;  %p3382_p6 = scmp.lt.s32.totalorder %s86_s19, %s86_s19 }
  0x2f   :  { %p3378_p5 = scmp.ne.s32.totalorder %s86_s19, %s3377_s29  ;;  %p3383_p7 = scmp.lt.s32.totalorder %s3377_s29, %s3377_s29 }
  0x31   :  { %p3384_p8 = por %p3383_p7, %p3382_p6 }
  0x33   :  { %p3385_p9 = pnand %p3384_p8, %p3378_p5 }
  0x35   :  { %3388 = shalt.err (!%p3385_p9)
}
  0x36   :  { %s3584_s4 = smov 128   ;;  %s3585_s23 = smov 8  }
  0x37   :  { %91 = dma.hbm_to_vmem [thread:$0]  %s3949_s6, 8192, %s86_s19, [#allocation11], %s3584_s4, %s3584_s4, %s3585_s23  }
  0x38   :  { %s3586_s15 = smov [#allocation13]   ;;  %s3587_s26 = smov [#allocation16]  }
  0x39   :  { %s107_s2 = sshll.u32 %s3586_s15, 4  ;;  %s132_s16 = sshll.u32 %s3587_s26, 4  ;;  %s108_s2 = int_to_ptr.vmem [resolvable:$true] %s107_s2  ;;  %s133_s16 = int_to_ptr.vmem [resolvable:$true] %s132_s16 }
  0x3a   :  { %s3389_s20 = scalar_lea.hbm %s3951_s8, 2048 }
  0x3b   :  { %p3390_p10 = scmp.ne.s32.totalorder %s3951_s8, %s3389_s20  ;;  %p3393_p11 = scmp.lt.u32.totalorder %s3389_s20, %s3951_s8 }
  0x3d   :  { %p3395_p12 = pnand %p3393_p11, %p3390_p10 }
  0x3f   :  { %3398 = shalt.err (!%p3395_p12)
}
  0x40   :  { %s3399_s6 = scalar_lea.vmem %s108_s2, 2048  ;;  %p3404_p0 = scmp.lt.s32.totalorder %s108_s2, %s108_s2 }
  0x41   :  { %p3400_p13 = scmp.ne.s32.totalorder %s108_s2, %s3399_s6  ;;  %p3405_p1 = scmp.lt.s32.totalorder %s3399_s6, %s3399_s6 }
  0x43   :  { %p3406_p2 = por %p3405_p1, %p3404_p0 }
  0x45   :  { %p3407_p3 = pnand %p3406_p2, %p3400_p13 }
  0x47   :  { %3410 = shalt.err (!%p3407_p3)
}
  0x48   :  { %113 = dma.hbm_to_vmem [thread:$0]  %s3951_s8, 2048, %s108_s2, [#allocation14], %s3584_s4, %s3584_s4, %s3585_s23  }
  0x49   :  { %s3411_s30 = scalar_lea.hbm %s3953_s10, 16 }
  0x4a   :  { %p3412_p4 = scmp.ne.s32.totalorder %s3953_s10, %s3411_s30  ;;  %p3415_p5 = scmp.lt.u32.totalorder %s3411_s30, %s3953_s10 }
  0x4c   :  { %p3417_p6 = pnand %p3415_p5, %p3412_p4 }
  0x4e   :  { %3420 = shalt.err (!%p3417_p6)
}
  0x4f   :  { %s3421_s18 = scalar_lea.vmem %s133_s16, 16  ;;  %s3425_s20 = scalar_lea.vmem %s133_s16, 32 }
  0x50   :  { %p3422_p7 = scmp.ne.s32.totalorder %s133_s16, %s3421_s18  ;;  %p3426_p8 = scmp.lt.s32.totalorder %s133_s16, %s133_s16 }
  0x51   :  { %p3427_p9 = scmp.lt.s32.totalorder %s3425_s20, %s3421_s18 }
  0x53   :  { %p3428_p10 = por %p3427_p9, %p3426_p8 }
  0x55   :  { %p3429_p11 = pnand %p3428_p10, %p3422_p7 }
  0x57   :  { %3432 = shalt.err (!%p3429_p11)
}
  0x58   :  { %135 = dma.hbm_to_vmem [thread:$0]  %s3953_s10, 16, %s133_s16, [#allocation17]  }
  0x59   :  { %s3588_s21 = smov [#allocation2]   ;;  %s3589_s24 = smov [#allocation6]  }
  0x5a   :  { %s32_s22 = sshll.u32 %s3588_s21, 4  ;;  %s54_s25 = sshll.u32 %s3589_s24, 4  ;;  %s33_s22 = int_to_ptr.vmem [resolvable:$true] %s32_s22  ;;  %s55_s25 = int_to_ptr.vmem [resolvable:$true] %s54_s25 }
  0x5b   :  { %s3433_s27 = scalar_lea.hbm %s3944_s1, 32 }
  0x5c   :  { %p3434_p12 = scmp.ne.s32.totalorder %s3944_s1, %s3433_s27  ;;  %p3437_p13 = scmp.lt.u32.totalorder %s3433_s27, %s3944_s1 }
  0x5e   :  { %p3439_p0 = pnand %p3437_p13, %p3434_p12 }
  0x60   :  { %3442 = shalt.err (!%p3439_p0)
}
  0x61   :  { %s3443_s10 = scalar_lea.vmem %s33_s22, 32  ;;  %p3448_p2 = scmp.lt.s32.totalorder %s33_s22, %s33_s22 }
  0x62   :  { %p3444_p1 = scmp.ne.s32.totalorder %s33_s22, %s3443_s10  ;;  %p3449_p3 = scmp.lt.s32.totalorder %s3443_s10, %s3443_s10 }
  0x64   :  { %p3450_p4 = por %p3449_p3, %p3448_p2 }
  0x66   :  { %p3451_p5 = pnand %p3450_p4, %p3444_p1 }
  0x68   :  { %3454 = shalt.err (!%p3451_p5)
}
  0x69   :  { %35 = dma.hbm_to_vmem [thread:$0]  %s3944_s1, 32, %s33_s22, [#allocation3]  }
  0x6a   :  { %s3455_s18 = scalar_lea.hbm %s3946_s3, 112 }
  0x6b   :  { %p3456_p6 = scmp.ne.s32.totalorder %s3946_s3, %s3455_s18  ;;  %p3459_p7 = scmp.lt.u32.totalorder %s3455_s18, %s3946_s3 }
  0x6d   :  { %p3461_p8 = pnand %p3459_p7, %p3456_p6 }
  0x6f   :  { %3464 = shalt.err (!%p3461_p8)
}
  0x70   :  { %s3465_s24 = scalar_lea.vmem %s55_s25, 112  ;;  %s3469_s6 = scalar_lea.vmem %s55_s25, 128 }
  0x71   :  { %p3466_p9 = scmp.ne.s32.totalorder %s55_s25, %s3465_s24  ;;  %p3470_p10 = scmp.lt.s32.totalorder %s55_s25, %s55_s25 }
  0x72   :  { %p3471_p11 = scmp.lt.s32.totalorder %s3469_s6, %s3465_s24 }
  0x74   :  { %p3472_p12 = por %p3471_p11, %p3470_p10 }
  0x76   :  { %p3473_p13 = pnand %p3472_p12, %p3466_p9 }
  0x78   :  { %3476 = shalt.err (!%p3473_p13)
}
  0x79   :  { %57 = dma.hbm_to_vmem [thread:$0]  %s3946_s3, 112, %s55_s25, [#allocation5]  }
  0x7a   :  { %s3590_s19 = smov [#allocation9]   ;;  %s3591_s28 = smov [#allocation12]  }
  0x7b   :  { %s76_s27 = sshll.u32 %s3590_s19, 4  ;;  %s98_s29 = sshll.u32 %s3591_s28, 4  ;;  %s77_s27 = int_to_ptr.vmem [resolvable:$true] %s76_s27  ;;  %s99_s29 = int_to_ptr.vmem [resolvable:$true] %s98_s29 }
  0x7c   :  { %s3477_s10 = scalar_lea.hbm %s3948_s5, 64 }
  0x7d   :  { %p3478_p0 = scmp.ne.s32.totalorder %s3948_s5, %s3477_s10  ;;  %p3481_p1 = scmp.lt.u32.totalorder %s3477_s10, %s3948_s5 }
  0x7f   :  { %p3483_p2 = pnand %p3481_p1, %p3478_p0 }
  0x81   :  { %3486 = shalt.err (!%p3483_p2)
}
  0x82   :  { %s3487_s3 = scalar_lea.vmem %s77_s27, 64  ;;  %p3492_p4 = scmp.lt.s32.totalorder %s77_s27, %s77_s27 }
  0x83   :  { %p3488_p3 = scmp.ne.s32.totalorder %s77_s27, %s3487_s3  ;;  %p3493_p5 = scmp.lt.s32.totalorder %s3487_s3, %s3487_s3 }
  0x85   :  { %p3494_p6 = por %p3493_p5, %p3492_p4 }
  0x87   :  { %p3495_p7 = pnand %p3494_p6, %p3488_p3 }
  0x89   :  { %3498 = shalt.err (!%p3495_p7)
}
  0x8a   :  { %79 = dma.hbm_to_vmem [thread:$0]  %s3948_s5, 64, %s77_s27, [#allocation8]  }
  0x8b   :  { %s3499_s2 = scalar_lea.hbm %s3950_s7, 16 }
  0x8c   :  { %p3500_p8 = scmp.ne.s32.totalorder %s3950_s7, %s3499_s2  ;;  %p3503_p9 = scmp.lt.u32.totalorder %s3499_s2, %s3950_s7 }
  0x8e   :  { %p3505_p10 = pnand %p3503_p9, %p3500_p8 }
  0x90   :  { %3508 = shalt.err (!%p3505_p10)
}
  0x91   :  { %s3509_s22 = scalar_lea.vmem %s99_s29, 16  ;;  %s3513_s19 = scalar_lea.vmem %s99_s29, 32 }
  0x92   :  { %p3510_p11 = scmp.ne.s32.totalorder %s99_s29, %s3509_s22  ;;  %p3514_p12 = scmp.lt.s32.totalorder %s99_s29, %s99_s29 }
  0x93   :  { %p3515_p13 = scmp.lt.s32.totalorder %s3513_s19, %s3509_s22 }
  0x95   :  { %p3516_p0 = por %p3515_p13, %p3514_p12 }
  0x97   :  { %p3517_p1 = pnand %p3516_p0, %p3510_p11 }
  0x99   :  { %3520 = shalt.err (!%p3517_p1)
}
  0x9a   :  { %101 = dma.hbm_to_vmem [thread:$0]  %s3950_s7, 16, %s99_s29, [#allocation11]  }
  0x9b   :  { %s3592_s28 = smov [#allocation15]   ;;  %s3593_s14 = smov [#allocation18]  }
  0x9c   :  { %s119_s30 = sshll.u32 %s3592_s28, 4  ;;  %s144_s10 = sshll.u32 %s3593_s14, 4  ;;  %s120_s30 = int_to_ptr.vmem [resolvable:$true] %s119_s30  ;;  %s145_s10 = int_to_ptr.vmem [resolvable:$true] %s144_s10 }
  0x9d   :  { %s3521_s26 = scalar_lea.hbm %s3952_s9, 256 }
  0x9e   :  { %p3522_p2 = scmp.ne.s32.totalorder %s3952_s9, %s3521_s26  ;;  %p3525_p3 = scmp.lt.u32.totalorder %s3521_s26, %s3952_s9 }
  0xa0   :  { %p3527_p4 = pnand %p3525_p3, %p3522_p2 }
  0xa2   :  { %3530 = shalt.err (!%p3527_p4)
}
  0xa3   :  { %s3531_s7 = scalar_lea.vmem %s120_s30, 256  ;;  %p3536_p6 = scmp.lt.s32.totalorder %s120_s30, %s120_s30 }
  0xa4   :  { %p3532_p5 = scmp.ne.s32.totalorder %s120_s30, %s3531_s7  ;;  %p3537_p7 = scmp.lt.s32.totalorder %s3531_s7, %s3531_s7 }
  0xa6   :  { %p3538_p8 = por %p3537_p7, %p3536_p6 }
  0xa8   :  { %p3539_p9 = pnand %p3538_p8, %p3532_p5 }
  0xaa   :  { %3542 = shalt.err (!%p3539_p9)
}
  0xab   :  { %125 = dma.hbm_to_vmem [thread:$0]  %s3952_s9, 256, %s120_s30, [#allocation14], %s3584_s4, %s3584_s4, %s3585_s23  }
  0xac   :  { %s3543_s21 = scalar_lea.hbm %s3955_s12, 16 }
  0xad   :  { %p3544_p10 = scmp.ne.s32.totalorder %s3955_s12, %s3543_s21  ;;  %p3547_p11 = scmp.lt.u32.totalorder %s3543_s21, %s3955_s12 }
  0xaf   :  { %p3549_p12 = pnand %p3547_p11, %p3544_p10 }
  0xb1   :  { %3552 = shalt.err (!%p3549_p12)
}
  0xb2   :  { %s3553_s19 = scalar_lea.vmem %s145_s10, 16  ;;  %s3557_s5 = scalar_lea.vmem %s145_s10, 32 }
  0xb3   :  { %p3554_p13 = scmp.ne.s32.totalorder %s145_s10, %s3553_s19  ;;  %p3558_p0 = scmp.lt.s32.totalorder %s145_s10, %s145_s10 }
  0xb4   :  { %p3559_p1 = scmp.lt.s32.totalorder %s3557_s5, %s3553_s19 }
  0xb6   :  { %p3560_p2 = por %p3559_p1, %p3558_p0 }
  0xb8   :  { %p3561_p3 = pnand %p3560_p2, %p3554_p13 }
  0xba   :  { %3564 = shalt.err (!%p3561_p3)
}
  0xbb   :  { %147 = dma.hbm_to_vmem [thread:$0]  %s3955_s12, 16, %s145_s10, [#allocation17]  }
  0xbc   :  { %3565 = dma.done.wait [#allocation3], 32  }
  0xbd   :  { %3566 = vsyncadd [#allocation3], 4294967264 }
  0xbe   :  { %3567 = dma.done.wait [#allocation5], 28784  }
  0xbf   :  { %3568 = vsyncadd [#allocation5], 4294938512 }
  0xc0   :  { %3569 = dma.done.wait [#allocation8], 57408  }
  0xc1   :  { %3570 = vsyncadd [#allocation8], 4294909888 }
  0xc2   :  { %3571 = dma.done.wait [#allocation11], 8208  }
  0xc3   :  { %3572 = vsyncadd [#allocation11], 4294959088 }
  0xc4   :  { %3573 = dma.done.wait [#allocation14], 2304  }
  0xc5   :  { %3574 = vsyncadd [#allocation14], 4294964992 }
  0xc6   :  { %3575 = dma.done.wait [#allocation17], 32  }
  0xc7   :  { %3576 = vsyncadd [#allocation17], 4294967264  ;;  %v183_v0 = vld [vmem:[#allocation4 + $0x8] sm:$0xff]  ;;  %v190_v1 = vld [vmem:[#allocation4 + $0x40] sm:$0xff]  ;;  %vm3596_vm0 = vmmov 0   ;;  %vm2017_vm1 = vcmask 130048  }
  0xc8   :  { %v182_v2 = vld [vmem:[#allocation4] sm:$0xff]  ;;  %v2499_v3 = vpack.c.bf16 %v190_v1, %v183_v0  ;;  %v189_v4 = vld [vmem:[#allocation4 + $0x38] sm:$0xff]  ;;  %v204_v6 = vld [vmem:[#allocation4 + $0xb0] sm:$0xff]  ;;  %vm2263_vm2 = vcmask 9216  }
  0xc9   :  { %v197_v5 = vld [vmem:[#allocation4 + $0x78] sm:$0xff]  ;;  %v2501_v7 = vpack.c.bf16 %v189_v4, %v182_v2  ;;  %v196_v9 = vld [vmem:[#allocation4 + $0x70] sm:$0xff]  ;;  %v203_v10 = vld [vmem:[#allocation4 + $0xa8] sm:$0xff] }
  0xca   :  { %v2503_v8 = vpack.c.bf16 %v204_v6, %v197_v5  ;;  %v211_v11 = vld [vmem:[#allocation4 + $0xe8] sm:$0xff]  ;;  %2500 = vmatprep.subr.bf16.mxu0 %v2499_v3  ;;  %v218_v12 = vld [vmem:[#allocation4 + $0x120] sm:$0xff]  ;;  %v2505_v13 = vpack.c.bf16 %v203_v10, %v196_v9  ;;  %v217_v16 = vld [vmem:[#allocation4 + $0x118] sm:$0xff] }
  0xcb   :  { %2502 = vmatpush1.bf16.msra.mxu0 %v2501_v7  ;;  %v2507_v14 = vpack.c.bf16 %v218_v12, %v211_v11  ;;  %v210_v15 = vld [vmem:[#allocation4 + $0xe0] sm:$0xff]  ;;  %v225_v17 = vld [vmem:[#allocation4 + $0x158] sm:$0xff]  ;;  %v232_v18 = vld [vmem:[#allocation4 + $0x190] sm:$0xff] }
  0xcc   :  { %2504 = vmatprep.subr.bf16.mxu0 %v2503_v8  ;;  %v2509_v19 = vpack.c.bf16 %v217_v16, %v210_v15  ;;  %v2511_v20 = vpack.c.bf16 %v232_v18, %v225_v17  ;;  %v224_v21 = vld [vmem:[#allocation4 + $0x150] sm:$0xff]  ;;  %v231_v22 = vld [vmem:[#allocation4 + $0x188] sm:$0xff]  ;;  %v246_v24 = vld [vmem:[#allocation4 + $0x200] sm:$0xff] }
  0xcd   :  { %v239_v23 = vld [vmem:[#allocation4 + $0x1c8] sm:$0xff]  ;;  %v2513_v25 = vpack.c.bf16 %v231_v22, %v224_v21  ;;  %v238_v27 = vld [vmem:[#allocation4 + $0x1c0] sm:$0xff]  ;;  %v245_v28 = vld [vmem:[#allocation4 + $0x1f8] sm:$0xff] }
  0xce   :  { %v2515_v26 = vpack.c.bf16 %v246_v24, %v239_v23  ;;  %v253_v29 = vld [vmem:[#allocation4 + $0x238] sm:$0xff]  ;;  %v260_v30 = vld [vmem:[#allocation4 + $0x270] sm:$0xff]  ;;  %v2517_v31 = vpack.c.bf16 %v245_v28, %v238_v27  ;;  %v259_v34 = vld [vmem:[#allocation4 + $0x268] sm:$0xff] }
  0xcf   :  { %2506 = vmatpush1.bf16.msra.mxu0 %v2505_v13  ;;  %v2519_v32 = vpack.c.bf16 %v260_v30, %v253_v29  ;;  %v252_v33 = vld [vmem:[#allocation4 + $0x230] sm:$0xff]  ;;  %v267_v35 = vld [vmem:[#allocation4 + $0x2a8] sm:$0xff]  ;;  %v274_v36 = vld [vmem:[#allocation4 + $0x2e0] sm:$0xff] }
  0xd0   :  { %2508 = vmatprep.subr.bf16.mxu0 %v2507_v14  ;;  %v2521_v37 = vpack.c.bf16 %v259_v34, %v252_v33  ;;  %v266_v38 = vld [vmem:[#allocation4 + $0x2a0] sm:$0xff]  ;;  %v273_v39 = vld [vmem:[#allocation4 + $0x2d8] sm:$0xff]  ;;  %v2523_v41 = vpack.c.bf16 %v274_v36, %v267_v35  ;;  %v288_v42 = vld [vmem:[#allocation4 + $0x350] sm:$0xff] }
  0xd1   :  { %v281_v40 = vld [vmem:[#allocation4 + $0x318] sm:$0xff]  ;;  %v192_v46 = vld [vmem:[#allocation4 + $0x50] sm:$0xff]  ;;  %v191_v48 = vld [vmem:[#allocation4 + $0x48] sm:$0xff]  ;;  %v2525_v54 = vpack.c.bf16 %v273_v39, %v266_v38 }
  0xd2   :  { %v3811_v43 = vld.sshfl [vmem:[%s3943_s0] sm:$0x33 pattern:$0x76325410]  ;;  %v184_v47 = vld [vmem:[#allocation4 + $0x10] sm:$0xff]  ;;  %v199_v51 = vld [vmem:[#allocation4 + $0x88] sm:$0xff]  ;;  %v2527_v59 = vpack.c.bf16 %v288_v42, %v281_v40 }
  0xd3   :  { %2510 = vmatpush1.bf16.msra.mxu0 %v2509_v19  ;;  %v185_v44 = vld [vmem:[#allocation4 + $0x18] sm:$0xff]  ;;  %v3815_v45 = vcombine.high %v3811_v43, %v3811_v43  ;;  %v2565_v50 = vpack.c.bf16 %v191_v48, %v184_v47  ;;  %v206_v52 = vld [vmem:[#allocation4 + $0xc0] sm:$0xff]  ;;  %v220_v58 = vld [vmem:[#allocation4 + $0x130] sm:$0xff] }
  0xd4   :  { %2512 = vmatprep.subr.bf16.mxu0 %v2511_v20  ;;  %v2563_v49 = vpack.c.bf16 %v192_v46, %v185_v44  ;;  %v198_v53 = vld [vmem:[#allocation4 + $0x80] sm:$0xff]  ;;  %v2567_v55 = vpack.c.bf16 %v206_v52, %v199_v51  ;;  %v205_v56 = vld [vmem:[#allocation4 + $0xb8] sm:$0xff]  ;;  %v280_v60 = vld [vmem:[#allocation4 + $0x310] sm:$0xff] }
  0xd5   :  { %518 = vmatprep.mubr.f32.mxu0 %v3815_v45  ;;  %v213_v57 = vld [vmem:[#allocation4 + $0xf8] sm:$0xff]  ;;  %v287_v61 = vld [vmem:[#allocation4 + $0x348] sm:$0xff]  ;;  %v302_v63 = vld [vmem:[#allocation4 + $0x3c0] sm:$0xff]  ;;  %v2569_v0 = vpack.c.bf16 %v205_v56, %v198_v53  ;;  %589 = vmatprep.mubr.f32.mxu1 %v3815_v45 }
  0xd6   :  { %2564 = vmatprep.subr.bf16.mxu1 %v2563_v49  ;;  %v295_v62 = vld [vmem:[#allocation4 + $0x388] sm:$0xff]  ;;  %v2571_v1 = vpack.c.bf16 %v220_v58, %v213_v57  ;;  %v212_v2 = vld [vmem:[#allocation4 + $0xf0] sm:$0xff]  ;;  %v2529_v4 = vpack.c.bf16 %v287_v61, %v280_v60  ;;  %v234_v6 = vld [vmem:[#allocation4 + $0x1a0] sm:$0xff] }
  0xd7   :  { %2514 = vmatpush1.bf16.msra.mxu0 %v2513_v25  ;;  %2566 = vmatpush1.bf16.msra.mxu1 %v2565_v50  ;;  %v219_v3 = vld [vmem:[#allocation4 + $0x128] sm:$0xff]  ;;  %v2531_v7 = vpack.c.bf16 %v302_v63, %v295_v62  ;;  %v294_v8 = vld [vmem:[#allocation4 + $0x380] sm:$0xff]  ;;  %v301_v9 = vld [vmem:[#allocation4 + $0x3b8] sm:$0xff] }
  0xd8   :  { %2516 = vmatprep.subr.bf16.mxu0 %v2515_v26  ;;  %2568 = vmatprep.subr.bf16.mxu1 %v2567_v55  ;;  %v227_v5 = vld [vmem:[#allocation4 + $0x168] sm:$0xff]  ;;  %v309_v10 = vld [vmem:[#allocation4 + $0x3f8] sm:$0xff]  ;;  %v316_v11 = vld [vmem:[#allocation4 + $0x430] sm:$0xff]  ;;  %v2573_v12 = vpack.c.bf16 %v219_v3, %v212_v2  ;;  %v2533_v16 = vpack.c.bf16 %v301_v9, %v294_v8 }
  0xd9   :  { %v2575_v13 = vpack.c.bf16 %v234_v6, %v227_v5  ;;  %v226_v14 = vld [vmem:[#allocation4 + $0x160] sm:$0xff]  ;;  %v233_v15 = vld [vmem:[#allocation4 + $0x198] sm:$0xff]  ;;  %v248_v18 = vld [vmem:[#allocation4 + $0x210] sm:$0xff]  ;;  %v2535_v19 = vpack.c.bf16 %v316_v11, %v309_v10 }
  0xda   :  { %v241_v17 = vld [vmem:[#allocation4 + $0x1d8] sm:$0xff]  ;;  %v308_v20 = vld [vmem:[#allocation4 + $0x3f0] sm:$0xff]  ;;  %v315_v21 = vld [vmem:[#allocation4 + $0x428] sm:$0xff]  ;;  %v2577_v24 = vpack.c.bf16 %v233_v15, %v226_v14 }
  0xdb   :  { %2518 = vmatpush1.bf16.msra.mxu0 %v2517_v31  ;;  %2570 = vmatpush1.bf16.msra.mxu1 %v2569_v0  ;;  %v323_v22 = vld [vmem:[#allocation4 + $0x468] sm:$0xff]  ;;  %v330_v23 = vld [vmem:[#allocation4 + $0x4a0] sm:$0xff]  ;;  %v2579_v25 = vpack.c.bf16 %v248_v18, %v241_v17  ;;  %v240_v26 = vld [vmem:[#allocation4 + $0x1d0] sm:$0xff]  ;;  %v2537_v28 = vpack.c.bf16 %v315_v21, %v308_v20 }
  0xdc   :  { %2520 = vmatprep.subr.bf16.mxu0 %v2519_v32  ;;  %2572 = vmatprep.subr.bf16.mxu1 %v2571_v1  ;;  %v247_v27 = vld [vmem:[#allocation4 + $0x208] sm:$0xff]  ;;  %v262_v30 = vld [vmem:[#allocation4 + $0x280] sm:$0xff]  ;;  %v2539_v31 = vpack.c.bf16 %v330_v23, %v323_v22  ;;  %v329_v33 = vld [vmem:[#allocation4 + $0x498] sm:$0xff] }
  0xdd   :  { %v255_v29 = vld [vmem:[#allocation4 + $0x248] sm:$0xff]  ;;  %v322_v32 = vld [vmem:[#allocation4 + $0x460] sm:$0xff]  ;;  %v337_v34 = vld [vmem:[#allocation4 + $0x4d8] sm:$0xff]  ;;  %v2581_v36 = vpack.c.bf16 %v247_v27, %v240_v26 }
  0xde   :  { %v344_v35 = vld [vmem:[#allocation4 + $0x510] sm:$0xff]  ;;  %v254_v38 = vld [vmem:[#allocation4 + $0x240] sm:$0xff]  ;;  %v261_v39 = vld [vmem:[#allocation4 + $0x278] sm:$0xff]  ;;  %v2541_v40 = vpack.c.bf16 %v329_v33, %v322_v32 }
  0xdf   :  { %2522 = vmatpush1.bf16.msra.mxu0 %v2521_v37  ;;  %2574 = vmatpush1.bf16.msra.mxu1 %v2573_v12  ;;  %v2583_v37 = vpack.c.bf16 %v262_v30, %v255_v29  ;;  %v276_v42 = vld [vmem:[#allocation4 + $0x2f0] sm:$0xff]  ;;  %v2543_v44 = vpack.c.bf16 %v344_v35, %v337_v34  ;;  %v343_v47 = vld [vmem:[#allocation4 + $0x508] sm:$0xff]  ;;  %v358_v49 = vld [vmem:[#allocation4 + $0x580] sm:$0xff]  ;;  %v2585_v50 = vpack.c.bf16 %v261_v39, %v254_v38 }
  0xe0   :  { %2524 = vmatprep.subr.bf16.mxu0 %v2523_v41  ;;  %2576 = vmatprep.subr.bf16.mxu1 %v2575_v13  ;;  %v269_v41 = vld [vmem:[#allocation4 + $0x2b8] sm:$0xff]  ;;  %v336_v46 = vld [vmem:[#allocation4 + $0x4d0] sm:$0xff]  ;;  %v351_v48 = vld [vmem:[#allocation4 + $0x548] sm:$0xff] }
  0xe1   :  { %v2587_v51 = vpack.c.bf16 %v276_v42, %v269_v41  ;;  %v268_v52 = vld [vmem:[#allocation4 + $0x2b0] sm:$0xff]  ;;  %v275_v53 = vld [vmem:[#allocation4 + $0x2e8] sm:$0xff]  ;;  %v290_v56 = vld [vmem:[#allocation4 + $0x360] sm:$0xff]  ;;  %v2547_v57 = vpack.c.bf16 %v358_v49, %v351_v48 }
  0xe2   :  { %v283_v55 = vld [vmem:[#allocation4 + $0x328] sm:$0xff]  ;;  %v350_v58 = vld [vmem:[#allocation4 + $0x540] sm:$0xff]  ;;  %v365_v60 = vld [vmem:[#allocation4 + $0x5b8] sm:$0xff]  ;;  %v2589_v62 = vpack.c.bf16 %v275_v53, %v268_v52 }
  0xe3   :  { %2526 = vmatpush1.bf16.msra.mxu0 %v2525_v54  ;;  %2578 = vmatpush1.bf16.msra.mxu1 %v2577_v24  ;;  %v2545_v54 = vpack.c.bf16 %v343_v47, %v336_v46  ;;  %v372_v61 = vld [vmem:[#allocation4 + $0x5f0] sm:$0xff]  ;;  %v2591_v63 = vpack.c.bf16 %v290_v56, %v283_v55  ;;  %v282_v0 = vld [vmem:[#allocation4 + $0x320] sm:$0xff]  ;;  %v289_v1 = vld [vmem:[#allocation4 + $0x358] sm:$0xff] }
  0xe4   :  { %2528 = vmatprep.subr.bf16.mxu0 %v2527_v59  ;;  %2580 = vmatprep.subr.bf16.mxu1 %v2579_v25  ;;  %v357_v59 = vld [vmem:[#allocation4 + $0x578] sm:$0xff]  ;;  %v2551_v5 = vpack.c.bf16 %v372_v61, %v365_v60  ;;  %v364_v6 = vld [vmem:[#allocation4 + $0x5b0] sm:$0xff]  ;;  %v379_v8 = vld [vmem:[#allocation4 + $0x628] sm:$0xff]  ;;  %v2593_v10 = vpack.c.bf16 %v289_v1, %v282_v0 }
  0xe5   :  { %v2549_v2 = vpack.c.bf16 %v357_v59, %v350_v58  ;;  %v297_v3 = vld [vmem:[#allocation4 + $0x398] sm:$0xff]  ;;  %v386_v9 = vld [vmem:[#allocation4 + $0x660] sm:$0xff]  ;;  %v296_v12 = vld [vmem:[#allocation4 + $0x390] sm:$0xff] }
  0xe6   :  { %v303_v13 = vld [vmem:[#allocation4 + $0x3c8] sm:$0xff]  ;;  %v2555_v17 = vpack.c.bf16 %v386_v9, %v379_v8  ;;  %v378_v18 = vld [vmem:[#allocation4 + $0x620] sm:$0xff]  ;;  %v393_v20 = vld [vmem:[#allocation4 + $0x698] sm:$0xff] }
  0xe7   :  { %2530 = vmatpush1.bf16.msra.mxu0 %v2529_v4  ;;  %2582 = vmatpush1.bf16.msra.mxu1 %v2581_v36  ;;  %v304_v4 = vld [vmem:[#allocation4 + $0x3d0] sm:$0xff]  ;;  %v311_v15 = vld [vmem:[#allocation4 + $0x408] sm:$0xff]  ;;  %v2597_v22 = vpack.c.bf16 %v303_v13, %v296_v12  ;;  %v310_v24 = vld [vmem:[#allocation4 + $0x400] sm:$0xff] }
  0xe8   :  { %2532 = vmatprep.subr.bf16.mxu0 %v2531_v7  ;;  %2584 = vmatprep.subr.bf16.mxu1 %v2583_v37  ;;  %v371_v7 = vld [vmem:[#allocation4 + $0x5e8] sm:$0xff]  ;;  %v2595_v11 = vpack.c.bf16 %v304_v4, %v297_v3  ;;  %v400_v21 = vld [vmem:[#allocation4 + $0x6d0] sm:$0xff]  ;;  %v317_v25 = vld [vmem:[#allocation4 + $0x438] sm:$0xff] }
  0xe9   :  { %v2553_v14 = vpack.c.bf16 %v371_v7, %v364_v6  ;;  %v325_v27 = vld [vmem:[#allocation4 + $0x478] sm:$0xff]  ;;  %v2559_v29 = vpack.c.bf16 %v400_v21, %v393_v20  ;;  %v392_v30 = vld [vmem:[#allocation4 + $0x690] sm:$0xff]  ;;  %v2601_v32 = vpack.c.bf16 %v317_v25, %v310_v24  ;;  %v187_v33 = vld [vmem:[#allocation4 + $0x28] sm:$0xff] }
  0xea   :  { %v194_v34 = vld [vmem:[#allocation4 + $0x60] sm:$0xff]  ;;  %v324_v36 = vld [vmem:[#allocation4 + $0x470] sm:$0xff]  ;;  %v331_v37 = vld [vmem:[#allocation4 + $0x4a8] sm:$0xff] }
  0xeb   :  { %2534 = vmatpush1.bf16.msra.mxu0 %v2533_v16  ;;  %2586 = vmatpush1.bf16.msra.mxu1 %v2585_v50  ;;  %v318_v16 = vld [vmem:[#allocation4 + $0x440] sm:$0xff]  ;;  %v339_v39 = vld [vmem:[#allocation4 + $0x4e8] sm:$0xff]  ;;  %v2627_v41 = vpack.c.bf16 %v194_v34, %v187_v33  ;;  %v2605_v46 = vpack.c.bf16 %v331_v37, %v324_v36  ;;  %v201_v47 = vld [vmem:[#allocation4 + $0x98] sm:$0xff] }
  0xec   :  { %2536 = vmatprep.subr.bf16.mxu0 %v2535_v19  ;;  %2588 = vmatprep.subr.bf16.mxu1 %v2587_v51  ;;  %v385_v19 = vld [vmem:[#allocation4 + $0x658] sm:$0xff]  ;;  %v2599_v23 = vpack.c.bf16 %v318_v16, %v311_v15  ;;  %v186_v42 = vld [vmem:[#allocation4 + $0x20] sm:$0xff]  ;;  %v208_v48 = vld [vmem:[#allocation4 + $0xd0] sm:$0xff] }
  0xed   :  { %v2557_v26 = vpack.c.bf16 %v385_v19, %v378_v18  ;;  %v338_v50 = vld [vmem:[#allocation4 + $0x4e0] sm:$0xff]  ;;  %v345_v51 = vld [vmem:[#allocation4 + $0x518] sm:$0xff]  ;;  %v360_v53 = vld [vmem:[#allocation4 + $0x590] sm:$0xff]  ;;  %v2631_v55 = vpack.c.bf16 %v208_v48, %v201_v47 }
  0xee   :  { %v353_v52 = vld [vmem:[#allocation4 + $0x558] sm:$0xff]  ;;  %v200_v56 = vld [vmem:[#allocation4 + $0x90] sm:$0xff]  ;;  %v2609_v58 = vpack.c.bf16 %v345_v51, %v338_v50  ;;  %v215_v59 = vld [vmem:[#allocation4 + $0x108] sm:$0xff] }
  0xef   :  { %2538 = vmatpush1.bf16.msra.mxu0 %v2537_v28  ;;  %2590 = vmatpush1.bf16.msra.mxu1 %v2589_v62  ;;  %v332_v28 = vld [vmem:[#allocation4 + $0x4b0] sm:$0xff]  ;;  %v222_v60 = vld [vmem:[#allocation4 + $0x140] sm:$0xff]  ;;  %v2611_v61 = vpack.c.bf16 %v360_v53, %v353_v52  ;;  %v367_v0 = vld [vmem:[#allocation4 + $0x5c8] sm:$0xff] }
  0xf0   :  { %2540 = vmatprep.subr.bf16.mxu0 %v2539_v31  ;;  %2592 = vmatprep.subr.bf16.mxu1 %v2591_v63  ;;  %v399_v31 = vld [vmem:[#allocation4 + $0x6c8] sm:$0xff]  ;;  %v2603_v35 = vpack.c.bf16 %v332_v28, %v325_v27  ;;  %v352_v62 = vld [vmem:[#allocation4 + $0x550] sm:$0xff]  ;;  %v374_v1 = vld [vmem:[#allocation4 + $0x600] sm:$0xff]  ;;  %v2635_v3 = vpack.c.bf16 %v222_v60, %v215_v59 }
  0xf1   :  { %v2561_v38 = vpack.c.bf16 %v399_v31, %v392_v30  ;;  %v359_v63 = vld [vmem:[#allocation4 + $0x588] sm:$0xff]  ;;  %v214_v4 = vld [vmem:[#allocation4 + $0x100] sm:$0xff]  ;;  %v229_v7 = vld [vmem:[#allocation4 + $0x178] sm:$0xff]  ;;  %v2615_v9 = vpack.c.bf16 %v374_v1, %v367_v0 }
  0xf2   :  { %v2613_v6 = vpack.c.bf16 %v359_v63, %v352_v62  ;;  %v236_v8 = vld [vmem:[#allocation4 + $0x1b0] sm:$0xff]  ;;  %v381_v12 = vld [vmem:[#allocation4 + $0x638] sm:$0xff]  ;;  %v243_v19 = vld [vmem:[#allocation4 + $0x1e8] sm:$0xff] }
  0xf3   :  { %2542 = vmatpush1.bf16.msra.mxu0 %v2541_v40  ;;  %2594 = vmatpush1.bf16.msra.mxu1 %v2593_v10  ;;  %v346_v40 = vld [vmem:[#allocation4 + $0x520] sm:$0xff]  ;;  %v388_v13 = vld [vmem:[#allocation4 + $0x670] sm:$0xff]  ;;  %v2639_v15 = vpack.c.bf16 %v236_v8, %v229_v7  ;;  %v395_v24 = vld [vmem:[#allocation4 + $0x6a8] sm:$0xff] }
  0xf4   :  { %2544 = vmatprep.subr.bf16.mxu0 %v2543_v44  ;;  %2596 = vmatprep.subr.bf16.mxu1 %v2595_v11  ;;  %v193_v44 = vld [vmem:[#allocation4 + $0x58] sm:$0xff]  ;;  %v2607_v49 = vpack.c.bf16 %v346_v40, %v339_v39  ;;  %v366_v10 = vld [vmem:[#allocation4 + $0x5c0] sm:$0xff]  ;;  %v228_v16 = vld [vmem:[#allocation4 + $0x170] sm:$0xff]  ;;  %v2619_v21 = vpack.c.bf16 %v388_v13, %v381_v12 }
  0xf5   :  { %v373_v11 = vld [vmem:[#allocation4 + $0x5f8] sm:$0xff]  ;;  %v250_v20 = vld [vmem:[#allocation4 + $0x220] sm:$0xff]  ;;  %v300_v37 = vld [vmem:[#allocation4 + $0x3b0] sm:$0xff] }
  0xf6   :  { %v2617_v18 = vpack.c.bf16 %v373_v11, %v366_v10  ;;  %v402_v25 = vld [vmem:[#allocation4 + $0x6e0] sm:$0xff]  ;;  %v2643_v27 = vpack.c.bf16 %v250_v20, %v243_v19  ;;  %v257_v31 = vld [vmem:[#allocation4 + $0x258] sm:$0xff]  ;;  %v256_v40 = vld [vmem:[#allocation4 + $0x250] sm:$0xff] }
  0xf7   :  { %2546 = vmatpush1.bf16.msra.mxu0 %v2545_v54  ;;  %2598 = vmatpush1.bf16.msra.mxu1 %v2597_v22  ;;  %v2629_v54 = vpack.c.bf16 %v193_v44, %v186_v42  ;;  %v380_v22 = vld [vmem:[#allocation4 + $0x630] sm:$0xff]  ;;  %v242_v28 = vld [vmem:[#allocation4 + $0x1e0] sm:$0xff]  ;;  %v2623_v33 = vpack.c.bf16 %v402_v25, %v395_v24  ;;  %v271_v44 = vld [vmem:[#allocation4 + $0x2c8] sm:$0xff] }
  0xf8   :  { %2548 = vmatprep.subr.bf16.mxu0 %v2547_v57  ;;  %2600 = vmatprep.subr.bf16.mxu1 %v2599_v23  ;;  %v207_v57 = vld [vmem:[#allocation4 + $0xc8] sm:$0xff]  ;;  %v394_v34 = vld [vmem:[#allocation4 + $0x6a0] sm:$0xff]  ;;  %v188_v48 = vld [vmem:[#allocation4 + $0x30] sm:$0xff] }
  0xf9   :  { %v387_v23 = vld [vmem:[#allocation4 + $0x668] sm:$0xff]  ;;  %v314_v51 = vld [vmem:[#allocation4 + $0x420] sm:$0xff]  ;;  %v321_v52 = vld [vmem:[#allocation4 + $0x458] sm:$0xff] }
  0xfa   :  { %v2621_v30 = vpack.c.bf16 %v387_v23, %v380_v22  ;;  %v2695_v59 = vpack.c.bf16 %v321_v52, %v314_v51  ;;  %v202_v60 = vld [vmem:[#allocation4 + $0xa0] sm:$0xff]  ;;  %v328_v63 = vld [vmem:[#allocation4 + $0x490] sm:$0xff]  ;;  %v335_v0 = vld [vmem:[#allocation4 + $0x4c8] sm:$0xff] }
  0xfb   :  { %2550 = vmatpush1.bf16.msra.mxu0 %v2549_v2  ;;  %2602 = vmatpush1.bf16.msra.mxu1 %v2601_v32  ;;  %v2633_v2 = vpack.c.bf16 %v207_v57, %v200_v56  ;;  %v264_v32 = vld [vmem:[#allocation4 + $0x290] sm:$0xff]  ;;  %v285_v56 = vld [vmem:[#allocation4 + $0x338] sm:$0xff]  ;;  %v2699_v7 = vpack.c.bf16 %v335_v0, %v328_v63  ;;  %v342_v11 = vld [vmem:[#allocation4 + $0x500] sm:$0xff] }
  0xfc   :  { %2552 = vmatprep.subr.bf16.mxu0 %v2551_v5  ;;  %2604 = vmatprep.subr.bf16.mxu1 %v2603_v35  ;;  %v221_v5 = vld [vmem:[#allocation4 + $0x138] sm:$0xff]  ;;  %v2647_v39 = vpack.c.bf16 %v264_v32, %v257_v31  ;;  %v292_v57 = vld [vmem:[#allocation4 + $0x370] sm:$0xff]  ;;  %v230_v20 = vld [vmem:[#allocation4 + $0x180] sm:$0xff] }
  0xfd   :  { %v401_v35 = vld [vmem:[#allocation4 + $0x6d8] sm:$0xff]  ;;  %v2655_v1 = vpack.c.bf16 %v292_v57, %v285_v56  ;;  %v216_v8 = vld [vmem:[#allocation4 + $0x110] sm:$0xff]  ;;  %v363_v23 = vld [vmem:[#allocation4 + $0x5a8] sm:$0xff] }
  0xfe   :  { %v2625_v42 = vpack.c.bf16 %v401_v35, %v394_v34  ;;  %v349_v12 = vld [vmem:[#allocation4 + $0x538] sm:$0xff]  ;;  %v356_v22 = vld [vmem:[#allocation4 + $0x570] sm:$0xff]  ;;  %v251_v32 = vld [vmem:[#allocation4 + $0x228] sm:$0xff] }
  0xff   :  { %2554 = vmatpush1.bf16.msra.mxu0 %v2553_v14  ;;  %2606 = vmatpush1.bf16.msra.mxu1 %v2605_v46  ;;  %v2637_v14 = vpack.c.bf16 %v221_v5, %v214_v4  ;;  %v278_v46 = vld [vmem:[#allocation4 + $0x300] sm:$0xff]  ;;  %v299_v4 = vld [vmem:[#allocation4 + $0x3a8] sm:$0xff]  ;;  %v2703_v19 = vpack.c.bf16 %v349_v12, %v342_v11  ;;  %v312_v25 = vld [vmem:[#allocation4 + $0x410] sm:$0xff] }
 0x100   :  { %2556 = vmatprep.subr.bf16.mxu0 %v2555_v17  ;;  %2608 = vmatprep.subr.bf16.mxu1 %v2607_v49  ;;  %v235_v17 = vld [vmem:[#allocation4 + $0x1a8] sm:$0xff]  ;;  %v2651_v53 = vpack.c.bf16 %v278_v46, %v271_v44  ;;  %v306_v5 = vld [vmem:[#allocation4 + $0x3e0] sm:$0xff]  ;;  %v244_v31 = vld [vmem:[#allocation4 + $0x1f0] sm:$0xff] }
 0x101   :  { %v195_v49 = vld [vmem:[#allocation4 + $0x68] sm:$0xff]  ;;  %v2659_v13 = vpack.c.bf16 %v306_v5, %v299_v4  ;;  %v370_v34 = vld [vmem:[#allocation4 + $0x5e0] sm:$0xff]  ;;  %v377_v35 = vld [vmem:[#allocation4 + $0x618] sm:$0xff] }
 0x102   :  { %v258_v44 = vld [vmem:[#allocation4 + $0x260] sm:$0xff]  ;;  %v265_v46 = vld [vmem:[#allocation4 + $0x298] sm:$0xff]  ;;  %v340_v51 = vld [vmem:[#allocation4 + $0x4f0] sm:$0xff] }
 0x103   :  { %2558 = vmatpush1.bf16.msra.mxu0 %v2557_v26  ;;  %2610 = vmatpush1.bf16.msra.mxu1 %v2609_v58  ;;  %v2641_v26 = vpack.c.bf16 %v235_v17, %v228_v16  ;;  %v2693_v58 = vpack.c.bf16 %v195_v49, %v188_v48  ;;  %v313_v16 = vld [vmem:[#allocation4 + $0x418] sm:$0xff]  ;;  %v320_v17 = vld [vmem:[#allocation4 + $0x450] sm:$0xff]  ;;  %v391_v49 = vld [vmem:[#allocation4 + $0x688] sm:$0xff] }
 0x104   :  { %2560 = vmatprep.subr.bf16.mxu0 %v2559_v29  ;;  %2612 = vmatprep.subr.bf16.mxu1 %v2611_v61  ;;  %v249_v29 = vld [vmem:[#allocation4 + $0x218] sm:$0xff]  ;;  %v2663_v24 = vpack.c.bf16 %v320_v17, %v313_v16  ;;  %v384_v48 = vld [vmem:[#allocation4 + $0x650] sm:$0xff]  ;;  %v347_v52 = vld [vmem:[#allocation4 + $0x528] sm:$0xff] }
 0x105   :  { %v2645_v36 = vpack.c.bf16 %v249_v29, %v242_v28  ;;  %v209_v61 = vld [vmem:[#allocation4 + $0xd8] sm:$0xff]  ;;  %v334_v28 = vld [vmem:[#allocation4 + $0x4c0] sm:$0xff]  ;;  %v2715_v56 = vpack.c.bf16 %v391_v49, %v384_v48  ;;  %v272_v57 = vld [vmem:[#allocation4 + $0x2d0] sm:$0xff] }
 0x106   :  { %v354_v63 = vld [vmem:[#allocation4 + $0x560] sm:$0xff]  ;;  %v361_v0 = vld [vmem:[#allocation4 + $0x598] sm:$0xff]  ;;  %v368_v11 = vld [vmem:[#allocation4 + $0x5d0] sm:$0xff] }
 0x107   :  { %2562 = vmatpush1.bf16.msra.mxu0 %v2561_v38  ;;  %2614 = vmatpush1.bf16.msra.mxu1 %v2613_v6  ;;  %v307_v38 = vld [vmem:[#allocation4 + $0x3e8] sm:$0xff]  ;;  %v2697_v6 = vpack.c.bf16 %v209_v61, %v202_v60  ;;  %v398_v60 = vld [vmem:[#allocation4 + $0x6c0] sm:$0xff]  ;;  %v405_v61 = vld [vmem:[#allocation4 + $0x6f8] sm:$0xff] }
 0x108   :  { %2628 = vmatprep.subr.bf16.mxu0 %v2627_v41  ;;  %2616 = vmatprep.subr.bf16.mxu1 %v2615_v9  ;;  %v263_v41 = vld [vmem:[#allocation4 + $0x288] sm:$0xff]  ;;  %v2691_v47 = vpack.c.bf16 %v307_v38, %v300_v37  ;;  %v326_v37 = vld [vmem:[#allocation4 + $0x480] sm:$0xff]  ;;  %v333_v38 = vld [vmem:[#allocation4 + $0x4b8] sm:$0xff]  ;;  %v2719_v4 = vpack.c.bf16 %v405_v61, %v398_v60 }
 0x109   :  { %v2649_v50 = vpack.c.bf16 %v263_v41, %v256_v40  ;;  %v223_v9 = vld [vmem:[#allocation4 + $0x148] sm:$0xff]  ;;  %v348_v40 = vld [vmem:[#allocation4 + $0x530] sm:$0xff]  ;;  %v2709_v41 = vpack.c.bf16 %v251_v32, %v244_v31  ;;  %v286_v5 = vld [vmem:[#allocation4 + $0x340] sm:$0xff] }
 0x10a   :  { %519 = vmatmul.mubr.f32.vlgmr.msra.gmra.mrb[0].mxu0 %v3811_v43  ;;  %v375_v12 = vld [vmem:[#allocation4 + $0x608] sm:$0xff]  ;;  %v761_v31 = vld [vmem:[#allocation7 + $0x88] sm:$0xff]  ;;  %v746_v48 = vld [vmem:[#allocation7 + $0x10] sm:$0xff] }
 0x10b   :  { %2630 = vmatpush1.bf16.msra.mxu0 %v2629_v54  ;;  %660 = vmatprep.mubr.f32.mxu0 %v3815_v45  ;;  %v270_v54 = vld [vmem:[#allocation4 + $0x2c0] sm:$0xff]  ;;  %v744_v17 = vld [vmem:[#allocation7] sm:$0xff]  ;;  %v765_v32 = vld [vmem:[#allocation7 + $0xa8] sm:$0xff] }
 0x10c   :  { %2632 = vmatprep.subr.bf16.mxu0 %v2631_v55  ;;  %2618 = vmatpush1.bf16.msra.mxu1 %v2617_v18  ;;  %v277_v55 = vld [vmem:[#allocation4 + $0x2f8] sm:$0xff]  ;;  %v2701_v18 = vpack.c.bf16 %v223_v9, %v216_v8  ;;  %v745_v8 = vld [vmem:[#allocation7 + $0x8] sm:$0xff] }
 0x10d   :  { %2620 = vmatprep.subr.bf16.mxu1 %v2619_v21  ;;  %v2653_v62 = vpack.c.bf16 %v277_v55, %v270_v54  ;;  %v362_v54 = vld [vmem:[#allocation4 + $0x5a0] sm:$0xff]  ;;  %v2713_v55 = vpack.c.bf16 %v265_v46, %v258_v44  ;;  %v749_v9 = vld [vmem:[#allocation7 + $0x28] sm:$0xff]  ;;  %v750_v49 = vld [vmem:[#allocation7 + $0x30] sm:$0xff] }
 0x10e   :  { %v2723_v16 = vpack.c.bf16 %v749_v9, %v745_v8  ;;  %v769_v44 = vld [vmem:[#allocation7 + $0xc8] sm:$0xff]  ;;  %v754_v60 = vld [vmem:[#allocation7 + $0x50] sm:$0xff] }
 0x10f   :  { %2634 = vmatpush1.bf16.msra.mxu0 %v2633_v2  ;;  %v284_v2 = vld [vmem:[#allocation4 + $0x330] sm:$0xff]  ;;  %v758_v61 = vld [vmem:[#allocation7 + $0x70] sm:$0xff] }
 0x110   :  { %2636 = vmatprep.subr.bf16.mxu0 %v2635_v3  ;;  %2622 = vmatpush1.bf16.msra.mxu1 %v2621_v30  ;;  %v291_v3 = vld [vmem:[#allocation4 + $0x368] sm:$0xff]  ;;  %v2707_v30 = vpack.c.bf16 %v363_v23, %v356_v22  ;;  %v382_v22 = vld [vmem:[#allocation4 + $0x640] sm:$0xff]  ;;  %v389_v23 = vld [vmem:[#allocation4 + $0x678] sm:$0xff] }
 0x111   :  { %2624 = vmatprep.subr.bf16.mxu1 %v2623_v33  ;;  %v2657_v10 = vpack.c.bf16 %v291_v3, %v284_v2  ;;  %v376_v2 = vld [vmem:[#allocation4 + $0x610] sm:$0xff]  ;;  %v762_v8 = vld [vmem:[#allocation7 + $0x90] sm:$0xff] }
 0x112   :  { %v773_v46 = vld [vmem:[#allocation7 + $0xe8] sm:$0xff]  ;;  %v766_v9 = vld [vmem:[#allocation7 + $0xb0] sm:$0xff] }
 0x113   :  { %2638 = vmatpush1.bf16.msra.mxu0 %v2637_v14  ;;  %v298_v14 = vld [vmem:[#allocation4 + $0x3a0] sm:$0xff] }
 0x114   :  { %2640 = vmatprep.subr.bf16.mxu0 %v2639_v15  ;;  %2626 = vmatpush1.bf16.msra.mxu1 %v2625_v42  ;;  %v305_v15 = vld [vmem:[#allocation4 + $0x3d8] sm:$0xff]  ;;  %v2711_v42 = vpack.c.bf16 %v377_v35, %v370_v34  ;;  %v396_v34 = vld [vmem:[#allocation4 + $0x6b0] sm:$0xff]  ;;  %v403_v35 = vld [vmem:[#allocation4 + $0x6e8] sm:$0xff] }
 0x115   :  { %2692 = vmatprep.subr.bf16.mxu1 %v2691_v47  ;;  %v2661_v21 = vpack.c.bf16 %v305_v15, %v298_v14  ;;  %v2669_v47 = vpack.c.bf16 %v333_v38, %v326_v37  ;;  %v390_v14 = vld [vmem:[#allocation4 + $0x680] sm:$0xff] }
 0x116   :  { %v751_v37 = vld [vmem:[#allocation7 + $0x38] sm:$0xff] }
 0x117   :  { %2642 = vmatpush1.bf16.msra.mxu0 %v2641_v26  ;;  %590 = vmatmul.mubr.f32.vlgmr.msra.gmra.mrb[0].mxu1 %v3811_v43  ;;  %v319_v26 = vld [vmem:[#allocation4 + $0x448] sm:$0xff] }
 0x118   :  { %2644 = vmatprep.subr.bf16.mxu0 %v2643_v27  ;;  %2694 = vmatpush3.bf16.msra.mxu1 %v2693_v58  ;;  %v327_v27 = vld [vmem:[#allocation4 + $0x488] sm:$0xff]  ;;  %v2665_v33 = vpack.c.bf16 %v319_v26, %v312_v25  ;;  %v404_v25 = vld [vmem:[#allocation4 + $0x6f0] sm:$0xff] }
 0x119   :  { %731 = vmatprep.mubr.f32.mxu1 %v3815_v45  ;;  %2696 = vmatprep.subr.bf16.mxu1 %v2695_v59  ;;  %v237_v45 = vld [vmem:[#allocation4 + $0x1b8] sm:$0xff]  ;;  %v279_v58 = vld [vmem:[#allocation4 + $0x308] sm:$0xff]  ;;  %v2673_v59 = vpack.c.bf16 %v347_v52, %v340_v51  ;;  %v759_v51 = vld [vmem:[#allocation7 + $0x78] sm:$0xff] }
 0x11a   :  { %v2705_v29 = vpack.c.bf16 %v237_v45, %v230_v20  ;;  %v2717_v3 = vpack.c.bf16 %v279_v58, %v272_v57  ;;  %v753_v20 = vld [vmem:[#allocation7 + $0x48] sm:$0xff] }
 0x11b   :  { %2646 = vmatpush1.bf16.msra.mxu0 %v2645_v36  ;;  %v2667_v36 = vpack.c.bf16 %v334_v28, %v327_v27  ;;  %v757_v45 = vld [vmem:[#allocation7 + $0x68] sm:$0xff]  ;;  %v752_v28 = vld [vmem:[#allocation7 + $0x40] sm:$0xff] }
 0x11c   :  { %2648 = vmatprep.subr.bf16.mxu0 %v2647_v39  ;;  %2698 = vmatpush3.bf16.msra.mxu1 %v2697_v6  ;;  %v341_v39 = vld [vmem:[#allocation4 + $0x4f8] sm:$0xff]  ;;  %v2727_v27 = vpack.c.bf16 %v757_v45, %v753_v20  ;;  %v777_v57 = vld [vmem:[#allocation7 + $0x108] sm:$0xff]  ;;  %v779_v45 = vld [vmem:[#allocation7 + $0x118] sm:$0xff] }
 0x11d   :  { %2700 = vmatprep.subr.bf16.mxu1 %v2699_v7  ;;  %v293_v6 = vld [vmem:[#allocation4 + $0x378] sm:$0xff]  ;;  %v2677_v7 = vpack.c.bf16 %v361_v0, %v354_v63  ;;  %v781_v58 = vld [vmem:[#allocation7 + $0x128] sm:$0xff]  ;;  %v767_v63 = vld [vmem:[#allocation7 + $0xb8] sm:$0xff] }
 0x11e   :  { %v2721_v15 = vpack.c.bf16 %v293_v6, %v286_v5  ;;  %v785_v5 = vld [vmem:[#allocation7 + $0x148] sm:$0xff]  ;;  %v774_v20 = vld [vmem:[#allocation7 + $0xf0] sm:$0xff] }
 0x11f   :  { %2650 = vmatpush1.bf16.msra.mxu0 %v2649_v50  ;;  %v2671_v50 = vpack.c.bf16 %v348_v40, %v341_v39  ;;  %v2731_v39 = vpack.c.bf16 %v765_v32, %v761_v31  ;;  %v760_v40 = vld [vmem:[#allocation7 + $0x80] sm:$0xff]  ;;  %v789_v6 = vld [vmem:[#allocation7 + $0x168] sm:$0xff]  ;;  %v782_v31 = vld [vmem:[#allocation7 + $0x130] sm:$0xff] }
 0x120   :  { %2652 = vmatprep.subr.bf16.mxu0 %v2651_v53  ;;  %2702 = vmatpush3.bf16.msra.mxu1 %v2701_v18  ;;  %v355_v53 = vld [vmem:[#allocation4 + $0x568] sm:$0xff]  ;;  %v787_v32 = vld [vmem:[#allocation7 + $0x158] sm:$0xff] }
 0x121   :  { %2704 = vmatprep.subr.bf16.mxu1 %v2703_v19  ;;  %v748_v18 = vld [vmem:[#allocation7 + $0x20] sm:$0xff]  ;;  %v2681_v19 = vpack.c.bf16 %v375_v12, %v368_v11  ;;  %v775_v11 = vld [vmem:[#allocation7 + $0xf8] sm:$0xff] }
 0x122   :  { %v2725_v26 = vpack.c.bf16 %v748_v18, %v744_v17  ;;  %v797_v17 = vld [vmem:[#allocation7 + $0x1a8] sm:$0xff] }
 0x123   :  { %2654 = vmatpush1.bf16.msra.mxu0 %v2653_v62  ;;  %v2675_v62 = vpack.c.bf16 %v362_v54, %v355_v53  ;;  %v2735_v53 = vpack.c.bf16 %v773_v46, %v769_v44  ;;  %v768_v54 = vld [vmem:[#allocation7 + $0xc0] sm:$0xff]  ;;  %v790_v44 = vld [vmem:[#allocation7 + $0x170] sm:$0xff]  ;;  %v795_v46 = vld [vmem:[#allocation7 + $0x198] sm:$0xff] }
 0x124   :  { %2656 = vmatprep.subr.bf16.mxu0 %v2655_v1  ;;  %2706 = vmatpush3.bf16.msra.mxu1 %v2705_v29  ;;  %v369_v1 = vld [vmem:[#allocation4 + $0x5d8] sm:$0xff]  ;;  %v756_v29 = vld [vmem:[#allocation7 + $0x60] sm:$0xff] }
 0x125   :  { %2708 = vmatprep.subr.bf16.mxu1 %v2707_v30  ;;  %v2685_v30 = vpack.c.bf16 %v389_v23, %v382_v22  ;;  %v2729_v38 = vpack.c.bf16 %v756_v29, %v752_v28  ;;  %v805_v28 = vld [vmem:[#allocation7 + $0x1e8] sm:$0xff] }
 0x127   :  { %2658 = vmatpush1.bf16.msra.mxu0 %v2657_v10  ;;  %v2679_v10 = vpack.c.bf16 %v376_v2, %v369_v1  ;;  %v2739_v1 = vpack.c.bf16 %v781_v58, %v777_v57  ;;  %v776_v2 = vld [vmem:[#allocation7 + $0x100] sm:$0xff]  ;;  %v798_v57 = vld [vmem:[#allocation7 + $0x1b0] sm:$0xff]  ;;  %v803_v58 = vld [vmem:[#allocation7 + $0x1d8] sm:$0xff] }
 0x128   :  { %2660 = vmatprep.subr.bf16.mxu0 %v2659_v13  ;;  %2710 = vmatpush3.bf16.msra.mxu1 %v2709_v41  ;;  %v383_v13 = vld [vmem:[#allocation4 + $0x648] sm:$0xff] }
 0x129   :  { %2712 = vmatprep.subr.bf16.mxu1 %v2711_v42  ;;  %v764_v41 = vld [vmem:[#allocation7 + $0xa0] sm:$0xff]  ;;  %v2689_v42 = vpack.c.bf16 %v403_v35, %v396_v34 }
 0x12a   :  { %v2733_v52 = vpack.c.bf16 %v764_v41, %v760_v40  ;;  %v813_v40 = vld [vmem:[#allocation7 + $0x228] sm:$0xff] }
 0x12b   :  { %2662 = vmatpush1.bf16.msra.mxu0 %v2661_v21  ;;  %v2683_v21 = vpack.c.bf16 %v390_v14, %v383_v13  ;;  %v2743_v13 = vpack.c.bf16 %v789_v6, %v785_v5  ;;  %v784_v14 = vld [vmem:[#allocation7 + $0x140] sm:$0xff]  ;;  %v806_v5 = vld [vmem:[#allocation7 + $0x1f0] sm:$0xff]  ;;  %v811_v6 = vld [vmem:[#allocation7 + $0x218] sm:$0xff] }
 0x12c   :  { %2664 = vmatprep.subr.bf16.mxu0 %v2663_v24  ;;  %2714 = vmatpush3.bf16.msra.mxu1 %v2713_v55  ;;  %v397_v24 = vld [vmem:[#allocation4 + $0x6b8] sm:$0xff]  ;;  %v772_v55 = vld [vmem:[#allocation7 + $0xe0] sm:$0xff] }
 0x12d   :  { %2716 = vmatprep.subr.bf16.mxu1 %v2715_v56  ;;  %v2949_v56 = vpack.c.bf16 %v750_v49, %v746_v48  ;;  %v2737_v0 = vpack.c.bf16 %v772_v55, %v768_v54  ;;  %v821_v54 = vld [vmem:[#allocation7 + $0x268] sm:$0xff] }
 0x12f   :  { %2666 = vmatpush1.bf16.msra.mxu0 %v2665_v33  ;;  %v2687_v33 = vpack.c.bf16 %v404_v25, %v397_v24  ;;  %v792_v24 = vld [vmem:[#allocation7 + $0x180] sm:$0xff] }
 0x130   :  { %2668 = vmatprep.subr.bf16.mxu0 %v2667_v36  ;;  %2718 = vmatpush3.bf16.msra.mxu1 %v2717_v3  ;;  %v747_v36 = vld [vmem:[#allocation7 + $0x18] sm:$0xff]  ;;  %v780_v3 = vld [vmem:[#allocation7 + $0x120] sm:$0xff] }
 0x131   :  { %2720 = vmatprep.subr.bf16.mxu1 %v2719_v4  ;;  %v2953_v4 = vpack.c.bf16 %v758_v61, %v754_v60  ;;  %v2741_v12 = vpack.c.bf16 %v780_v3, %v776_v2  ;;  %v796_v25 = vld [vmem:[#allocation7 + $0x1a0] sm:$0xff]  ;;  %v829_v2 = vld [vmem:[#allocation7 + $0x2a8] sm:$0xff] }
 0x132   :  { %v2749_v34 = vpack.c.bf16 %v796_v25, %v792_v24  ;;  %v845_v24 = vld [vmem:[#allocation7 + $0x328] sm:$0xff] }
 0x133   :  { %2670 = vmatpush1.bf16.msra.mxu0 %v2669_v47  ;;  %v2947_v47 = vpack.c.bf16 %v751_v37, %v747_v36  ;;  %v800_v36 = vld [vmem:[#allocation7 + $0x1c0] sm:$0xff] }
 0x134   :  { %2672 = vmatprep.subr.bf16.mxu0 %v2671_v50  ;;  %2722 = vmatpush3.bf16.msra.mxu1 %v2721_v15  ;;  %v755_v50 = vld [vmem:[#allocation7 + $0x58] sm:$0xff]  ;;  %v2957_v15 = vpack.c.bf16 %v766_v9, %v762_v8  ;;  %v804_v37 = vld [vmem:[#allocation7 + $0x1e0] sm:$0xff] }
 0x135   :  { %2724 = vmatprep.subr.bf16.mxu1 %v2723_v16  ;;  %v793_v16 = vld [vmem:[#allocation7 + $0x188] sm:$0xff]  ;;  %v2753_v48 = vpack.c.bf16 %v804_v37, %v800_v36 }
 0x136   :  { %v2747_v23 = vpack.c.bf16 %v797_v17, %v793_v16  ;;  %v814_v16 = vld [vmem:[#allocation7 + $0x230] sm:$0xff]  ;;  %v819_v17 = vld [vmem:[#allocation7 + $0x258] sm:$0xff]  ;;  %v853_v36 = vld [vmem:[#allocation7 + $0x368] sm:$0xff] }
 0x137   :  { %2674 = vmatpush1.bf16.msra.mxu0 %v2673_v59  ;;  %732 = vmatmul.mubr.f32.vlgmr.msra.gmra.mrb[2].mxu1 %v3811_v43  ;;  %v2951_v59 = vpack.c.bf16 %v759_v51, %v755_v50  ;;  %v808_v50 = vld [vmem:[#allocation7 + $0x200] sm:$0xff] }
 0x138   :  { %2676 = vmatprep.subr.bf16.mxu0 %v2675_v62  ;;  %2726 = vmatpush1.bf16.msra.mxu1 %v2725_v26  ;;  %v763_v62 = vld [vmem:[#allocation7 + $0x98] sm:$0xff]  ;;  %v812_v51 = vld [vmem:[#allocation7 + $0x220] sm:$0xff] }
 0x139   :  { %2728 = vmatprep.subr.bf16.mxu1 %v2727_v27  ;;  %v801_v27 = vld [vmem:[#allocation7 + $0x1c8] sm:$0xff]  ;;  %v2757_v60 = vpack.c.bf16 %v812_v51, %v808_v50 }
 0x13a   :  { %v2751_v35 = vpack.c.bf16 %v805_v28, %v801_v27  ;;  %v822_v27 = vld [vmem:[#allocation7 + $0x270] sm:$0xff]  ;;  %v827_v28 = vld [vmem:[#allocation7 + $0x298] sm:$0xff]  ;;  %v861_v50 = vld [vmem:[#allocation7 + $0x3a8] sm:$0xff] }
 0x13b   :  { %2678 = vmatpush1.bf16.msra.mxu0 %v2677_v7  ;;  %v2955_v7 = vpack.c.bf16 %v767_v63, %v763_v62  ;;  %v816_v62 = vld [vmem:[#allocation7 + $0x240] sm:$0xff] }
 0x13c   :  { %2680 = vmatprep.subr.bf16.mxu0 %v2679_v10  ;;  %2730 = vmatpush1.bf16.msra.mxu1 %v2729_v38  ;;  %v771_v10 = vld [vmem:[#allocation7 + $0xd8] sm:$0xff]  ;;  %v820_v63 = vld [vmem:[#allocation7 + $0x260] sm:$0xff] }
 0x13d   :  { %2732 = vmatprep.subr.bf16.mxu1 %v2731_v39  ;;  %v2959_v18 = vpack.c.bf16 %v775_v11, %v771_v10  ;;  %v809_v39 = vld [vmem:[#allocation7 + $0x208] sm:$0xff]  ;;  %v2761_v8 = vpack.c.bf16 %v820_v63, %v816_v62  ;;  %v824_v10 = vld [vmem:[#allocation7 + $0x280] sm:$0xff] }
 0x13e   :  { %v2755_v49 = vpack.c.bf16 %v813_v40, %v809_v39  ;;  %v828_v11 = vld [vmem:[#allocation7 + $0x2a0] sm:$0xff]  ;;  %v830_v39 = vld [vmem:[#allocation7 + $0x2b0] sm:$0xff]  ;;  %v835_v40 = vld [vmem:[#allocation7 + $0x2d8] sm:$0xff] }
 0x13f   :  { %2682 = vmatpush1.bf16.msra.mxu0 %v2681_v19  ;;  %v770_v19 = vld [vmem:[#allocation7 + $0xd0] sm:$0xff]  ;;  %v869_v62 = vld [vmem:[#allocation7 + $0x3e8] sm:$0xff] }
 0x140   :  { %2684 = vmatprep.subr.bf16.mxu0 %v2683_v21  ;;  %2734 = vmatpush1.bf16.msra.mxu1 %v2733_v52  ;;  %v783_v21 = vld [vmem:[#allocation7 + $0x138] sm:$0xff]  ;;  %v2961_v26 = vpack.c.bf16 %v774_v20, %v770_v19  ;;  %v2765_v19 = vpack.c.bf16 %v828_v11, %v824_v10  ;;  %v877_v10 = vld [vmem:[#allocation7 + $0x428] sm:$0xff] }
 0x141   :  { %2736 = vmatprep.subr.bf16.mxu1 %v2735_v53  ;;  %v2963_v29 = vpack.c.bf16 %v783_v21, %v779_v45  ;;  %v817_v53 = vld [vmem:[#allocation7 + $0x248] sm:$0xff]  ;;  %v832_v45 = vld [vmem:[#allocation7 + $0x2c0] sm:$0xff] }
 0x142   :  { %v2759_v61 = vpack.c.bf16 %v821_v54, %v817_v53  ;;  %v836_v21 = vld [vmem:[#allocation7 + $0x2e0] sm:$0xff]  ;;  %v838_v53 = vld [vmem:[#allocation7 + $0x2f0] sm:$0xff]  ;;  %v843_v54 = vld [vmem:[#allocation7 + $0x318] sm:$0xff] }
 0x143   :  { %2686 = vmatpush1.bf16.msra.mxu0 %v2685_v30  ;;  %v778_v30 = vld [vmem:[#allocation7 + $0x110] sm:$0xff] }
 0x144   :  { %2688 = vmatprep.subr.bf16.mxu0 %v2687_v33  ;;  %2738 = vmatpush1.bf16.msra.mxu1 %v2737_v0  ;;  %v791_v33 = vld [vmem:[#allocation7 + $0x178] sm:$0xff]  ;;  %v2965_v38 = vpack.c.bf16 %v782_v31, %v778_v30  ;;  %v2769_v30 = vpack.c.bf16 %v836_v21, %v832_v45 }
 0x145   :  { %2740 = vmatprep.subr.bf16.mxu1 %v2739_v1  ;;  %v2967_v41 = vpack.c.bf16 %v791_v33, %v787_v32  ;;  %v825_v1 = vld [vmem:[#allocation7 + $0x288] sm:$0xff]  ;;  %v840_v32 = vld [vmem:[#allocation7 + $0x300] sm:$0xff]  ;;  %v867_v45 = vld [vmem:[#allocation7 + $0x3d8] sm:$0xff] }
 0x146   :  { %v2763_v9 = vpack.c.bf16 %v829_v2, %v825_v1  ;;  %v844_v33 = vld [vmem:[#allocation7 + $0x320] sm:$0xff]  ;;  %v846_v1 = vld [vmem:[#allocation7 + $0x330] sm:$0xff]  ;;  %v851_v2 = vld [vmem:[#allocation7 + $0x358] sm:$0xff] }
 0x147   :  { %2690 = vmatpush1.bf16.msra.mxu0 %v2689_v42  ;;  %v786_v42 = vld [vmem:[#allocation7 + $0x150] sm:$0xff]  ;;  %v871_v21 = vld [vmem:[#allocation7 + $0x3f8] sm:$0xff] }
 0x148   :  { %2948 = vmatprep.subr.bf16.mxu0 %v2947_v47  ;;  %2742 = vmatpush1.bf16.msra.mxu1 %v2741_v12  ;;  %v799_v47 = vld [vmem:[#allocation7 + $0x1b8] sm:$0xff]  ;;  %v2969_v52 = vpack.c.bf16 %v790_v44, %v786_v42  ;;  %v2773_v42 = vpack.c.bf16 %v844_v33, %v840_v32 }
 0x149   :  { %2744 = vmatprep.subr.bf16.mxu1 %v2743_v13  ;;  %v2971_v55 = vpack.c.bf16 %v799_v47, %v795_v46  ;;  %v833_v13 = vld [vmem:[#allocation7 + $0x2c8] sm:$0xff]  ;;  %v848_v46 = vld [vmem:[#allocation7 + $0x340] sm:$0xff]  ;;  %v3828_v33 = vld [vmem:[#allocation6] sm:$0xff] }
 0x14a   :  { %661 = vmatmul.mubr.f32.vlgmr.msra.gmra.mrb[2].mxu0 %v3811_v43  ;;  %v788_v43 = vld [vmem:[#allocation7 + $0x160] sm:$0xff] }
 0x14b   :  { %2950 = vmatpush1.bf16.msra.mxu0 %v2949_v56  ;;  %v2745_v22 = vpack.c.bf16 %v788_v43, %v784_v14  ;;  %v794_v56 = vld [vmem:[#allocation7 + $0x190] sm:$0xff]  ;;  %v837_v14 = vld [vmem:[#allocation7 + $0x2e8] sm:$0xff]  ;;  %v852_v47 = vld [vmem:[#allocation7 + $0x360] sm:$0xff] }
 0x14c   :  { %2952 = vmatprep.subr.bf16.mxu0 %v2951_v59  ;;  %v807_v59 = vld [vmem:[#allocation7 + $0x1f8] sm:$0xff]  ;;  %v2973_v0 = vpack.c.bf16 %v798_v57, %v794_v56  ;;  %v2767_v20 = vpack.c.bf16 %v837_v14, %v833_v13  ;;  %v2777_v56 = vpack.c.bf16 %v852_v47, %v848_v46  ;;  %v854_v13 = vld [vmem:[#allocation7 + $0x370] sm:$0xff]  ;;  %v881_v46 = vld [vmem:[#allocation7 + $0x448] sm:$0xff] }
 0x14d   :  { %2746 = vmatpush1.bf16.msra.mxu1 %v2745_v22  ;;  %v2975_v3 = vpack.c.bf16 %v807_v59, %v803_v58  ;;  %v856_v58 = vld [vmem:[#allocation7 + $0x380] sm:$0xff]  ;;  %v859_v14 = vld [vmem:[#allocation7 + $0x398] sm:$0xff] }
 0x14e   :  { %2748 = vmatprep.subr.bf16.mxu1 %v2747_v23  ;;  %v841_v23 = vld [vmem:[#allocation7 + $0x308] sm:$0xff]  ;;  %v860_v59 = vld [vmem:[#allocation7 + $0x3a0] sm:$0xff] }
 0x14f   :  { %2954 = vmatpush1.bf16.msra.mxu0 %v2953_v4  ;;  %v802_v4 = vld [vmem:[#allocation7 + $0x1d0] sm:$0xff]  ;;  %v2771_v31 = vpack.c.bf16 %v845_v24, %v841_v23  ;;  %v3007_v23 = vpack.c.bf16 %v871_v21, %v867_v45  ;;  %v909_v45 = vld [vmem:[#allocation7 + $0x528] sm:$0xff]  ;;  %v907_v21 = vld [vmem:[#allocation7 + $0x518] sm:$0xff] }
 0x150   :  { %2956 = vmatprep.subr.bf16.mxu0 %v2955_v7  ;;  %v815_v7 = vld [vmem:[#allocation7 + $0x238] sm:$0xff]  ;;  %v2977_v12 = vpack.c.bf16 %v806_v5, %v802_v4  ;;  %v2781_v4 = vpack.c.bf16 %v860_v59, %v856_v58  ;;  %v866_v24 = vld [vmem:[#allocation7 + $0x3d0] sm:$0xff] }
 0x151   :  { %2750 = vmatpush1.bf16.msra.mxu1 %v2749_v34  ;;  %v2979_v43 = vpack.c.bf16 %v815_v7, %v811_v6  ;;  %v864_v6 = vld [vmem:[#allocation7 + $0x3c0] sm:$0xff]  ;;  %v882_v59 = vld [vmem:[#allocation7 + $0x450] sm:$0xff] }
 0x152   :  { %2752 = vmatprep.subr.bf16.mxu1 %v2751_v35  ;;  %v849_v35 = vld [vmem:[#allocation7 + $0x348] sm:$0xff]  ;;  %v868_v7 = vld [vmem:[#allocation7 + $0x3e0] sm:$0xff] }
 0x153   :  { %2958 = vmatpush1.bf16.msra.mxu0 %v2957_v15  ;;  %v810_v15 = vld [vmem:[#allocation7 + $0x210] sm:$0xff]  ;;  %v2775_v44 = vpack.c.bf16 %v853_v36, %v849_v35 }
 0x154   :  { %2960 = vmatprep.subr.bf16.mxu0 %v2959_v18  ;;  %v823_v18 = vld [vmem:[#allocation7 + $0x278] sm:$0xff]  ;;  %v2981_v22 = vpack.c.bf16 %v814_v16, %v810_v15  ;;  %v2785_v15 = vpack.c.bf16 %v868_v7, %v864_v6  ;;  %v890_v7 = vld [vmem:[#allocation7 + $0x490] sm:$0xff] }
 0x155   :  { %2754 = vmatpush1.bf16.msra.mxu1 %v2753_v48  ;;  %v2983_v25 = vpack.c.bf16 %v823_v18, %v819_v17 }
 0x156   :  { %2756 = vmatprep.subr.bf16.mxu1 %v2755_v49  ;;  %v857_v49 = vld [vmem:[#allocation7 + $0x388] sm:$0xff] }
 0x157   :  { %2962 = vmatpush1.bf16.msra.mxu0 %v2961_v26  ;;  %v818_v26 = vld [vmem:[#allocation7 + $0x250] sm:$0xff]  ;;  %v2779_v57 = vpack.c.bf16 %v861_v50, %v857_v49  ;;  %v883_v49 = vld [vmem:[#allocation7 + $0x458] sm:$0xff] }
 0x158   :  { %2964 = vmatprep.subr.bf16.mxu0 %v2963_v29  ;;  %v831_v29 = vld [vmem:[#allocation7 + $0x2b8] sm:$0xff]  ;;  %v2985_v34 = vpack.c.bf16 %v822_v27, %v818_v26 }
 0x159   :  { %2758 = vmatpush1.bf16.msra.mxu1 %v2757_v60  ;;  %v2987_v37 = vpack.c.bf16 %v831_v29, %v827_v28  ;;  %v875_v26 = vld [vmem:[#allocation7 + $0x418] sm:$0xff] }
 0x15a   :  { %2760 = vmatprep.subr.bf16.mxu1 %v2759_v61  ;;  %v865_v61 = vld [vmem:[#allocation7 + $0x3c8] sm:$0xff]  ;;  %v879_v27 = vld [vmem:[#allocation7 + $0x438] sm:$0xff] }
 0x15b   :  { %2966 = vmatpush1.bf16.msra.mxu0 %v2965_v38  ;;  %v826_v38 = vld [vmem:[#allocation7 + $0x290] sm:$0xff]  ;;  %v2783_v5 = vpack.c.bf16 %v869_v62, %v865_v61  ;;  %v3011_v29 = vpack.c.bf16 %v879_v27, %v875_v26  ;;  %v887_v50 = vld [vmem:[#allocation7 + $0x478] sm:$0xff]  ;;  %v889_v61 = vld [vmem:[#allocation7 + $0x488] sm:$0xff] }
 0x15c   :  { %2968 = vmatprep.subr.bf16.mxu0 %v2967_v41  ;;  %v839_v41 = vld [vmem:[#allocation7 + $0x2f8] sm:$0xff]  ;;  %v2989_v48 = vpack.c.bf16 %v830_v39, %v826_v38  ;;  %v872_v38 = vld [vmem:[#allocation7 + $0x400] sm:$0xff]  ;;  %v3015_v58 = vpack.c.bf16 %v887_v50, %v883_v49  ;;  %v893_v62 = vld [vmem:[#allocation7 + $0x4a8] sm:$0xff] }
 0x15d   :  { %2762 = vmatpush1.bf16.msra.mxu1 %v2761_v8  ;;  %v2991_v51 = vpack.c.bf16 %v839_v41, %v835_v40  ;;  %v876_v39 = vld [vmem:[#allocation7 + $0x420] sm:$0xff]  ;;  %v914_v49 = vld [vmem:[#allocation7 + $0x550] sm:$0xff] }
 0x15e   :  { %2764 = vmatprep.subr.bf16.mxu1 %v2763_v9  ;;  %v873_v9 = vld [vmem:[#allocation7 + $0x408] sm:$0xff]  ;;  %v908_v26 = vld [vmem:[#allocation7 + $0x520] sm:$0xff]  ;;  %v918_v50 = vld [vmem:[#allocation7 + $0x570] sm:$0xff] }
 0x15f   :  { %2970 = vmatpush1.bf16.msra.mxu0 %v2969_v52  ;;  %v834_v52 = vld [vmem:[#allocation7 + $0x2d0] sm:$0xff]  ;;  %v2787_v16 = vpack.c.bf16 %v877_v10, %v873_v9  ;;  %v897_v9 = vld [vmem:[#allocation7 + $0x4c8] sm:$0xff] }
 0x160   :  { %2972 = vmatprep.subr.bf16.mxu0 %v2971_v55  ;;  %v847_v55 = vld [vmem:[#allocation7 + $0x338] sm:$0xff]  ;;  %v2993_v60 = vpack.c.bf16 %v838_v53, %v834_v52  ;;  %v2789_v52 = vpack.c.bf16 %v876_v39, %v872_v38  ;;  %v901_v10 = vld [vmem:[#allocation7 + $0x4e8] sm:$0xff] }
 0x161   :  { %2766 = vmatpush1.bf16.msra.mxu1 %v2765_v19  ;;  %v2995_v63 = vpack.c.bf16 %v847_v55, %v843_v54  ;;  %v858_v19 = vld [vmem:[#allocation7 + $0x390] sm:$0xff]  ;;  %v880_v54 = vld [vmem:[#allocation7 + $0x440] sm:$0xff]  ;;  %v915_v38 = vld [vmem:[#allocation7 + $0x558] sm:$0xff] }
 0x162   :  { %2768 = vmatprep.subr.bf16.mxu1 %v2767_v20  ;;  %v862_v20 = vld [vmem:[#allocation7 + $0x3b0] sm:$0xff]  ;;  %v884_v55 = vld [vmem:[#allocation7 + $0x460] sm:$0xff]  ;;  %v919_v39 = vld [vmem:[#allocation7 + $0x578] sm:$0xff] }
 0x163   :  { %2974 = vmatpush1.bf16.msra.mxu0 %v2973_v0  ;;  %v842_v0 = vld [vmem:[#allocation7 + $0x310] sm:$0xff] }
 0x164   :  { %2976 = vmatprep.subr.bf16.mxu0 %v2975_v3  ;;  %v855_v3 = vld [vmem:[#allocation7 + $0x378] sm:$0xff]  ;;  %v2997_v8 = vpack.c.bf16 %v846_v1, %v842_v0  ;;  %v2793_v1 = vpack.c.bf16 %v884_v55, %v880_v54 }
 0x165   :  { %2770 = vmatpush1.bf16.msra.mxu1 %v2769_v30  ;;  %v2999_v11 = vpack.c.bf16 %v855_v3, %v851_v2  ;;  %v408_v30 = vlaneseq  ;;  %v895_v0 = vld [vmem:[#allocation7 + $0x4b8] sm:$0xff]  ;;  %v888_v3 = vld [vmem:[#allocation7 + $0x480] sm:$0xff] }
 0x166   :  { %2772 = vmatprep.subr.bf16.mxu1 %v2771_v31  ;;  %v927_v54 = vld [vmem:[#allocation7 + $0x5b8] sm:$0xff] }
 0x167   :  { %2978 = vmatpush1.bf16.msra.mxu0 %v2977_v12  ;;  %v850_v12 = vld [vmem:[#allocation7 + $0x350] sm:$0xff]  ;;  %v3825_v31 = vshrl.u32 %v408_v30, 7 }
 0x168   :  { %2980 = vmatprep.subr.bf16.mxu0 %v2979_v43  ;;  %v863_v43 = vld [vmem:[#allocation7 + $0x3b8] sm:$0xff]  ;;  %v3001_v17 = vpack.c.bf16 %v854_v13, %v850_v12  ;;  %v906_v30 = vld [vmem:[#allocation7 + $0x510] sm:$0xff] }
 0x169   :  { %2774 = vmatpush1.bf16.msra.mxu1 %v2773_v42  ;;  %v3003_v18 = vpack.c.bf16 %v863_v43, %v859_v14  ;;  %v410_v32 = vsub.s32 0, %v3825_v31  ;;  %v874_v42 = vld [vmem:[#allocation7 + $0x410] sm:$0xff]  ;;  %v903_v12 = vld [vmem:[#allocation7 + $0x4f8] sm:$0xff]  ;;  %v896_v43 = vld [vmem:[#allocation7 + $0x4c0] sm:$0xff]  ;;  %v422_v27 = vsub.s32 3, %v3825_v31 }
 0x16a   :  { %2776 = vmatprep.subr.bf16.mxu1 %v2775_v44  ;;  %v878_v44 = vld [vmem:[#allocation7 + $0x430] sm:$0xff] }
 0x16b   :  { %2982 = vmatpush1.bf16.msra.mxu0 %v2981_v22  ;;  %v3005_v22 = vpack.c.bf16 %v862_v20, %v858_v19  ;;  %v411_v35 = vrot.slane %v3828_v33, %v410_v32  ;;  %v3013_v53 = vpack.c.bf16 %v878_v44, %v874_v42  ;;  %v902_v19 = vld [vmem:[#allocation7 + $0x4f0] sm:$0xff]  ;;  %v905_v20 = vld [vmem:[#allocation7 + $0x508] sm:$0xff]  ;;  %v912_v42 = vld [vmem:[#allocation7 + $0x540] sm:$0xff] }
 0x16c   :  { %2984 = vmatprep.subr.bf16.mxu0 %v2983_v25  ;;  %v870_v25 = vld [vmem:[#allocation7 + $0x3f0] sm:$0xff]  ;;  %v916_v44 = vld [vmem:[#allocation7 + $0x560] sm:$0xff] }
 0x16d   :  { %2778 = vmatpush1.bf16.msra.mxu1 %v2777_v56  ;;  %v3009_v28 = vpack.c.bf16 %v870_v25, %v866_v24  ;;  %v904_v25 = vld [vmem:[#allocation7 + $0x500] sm:$0xff] }
 0x16e   :  { %2780 = vmatprep.subr.bf16.mxu1 %v2779_v57 }
 0x16f   :  { %2986 = vmatpush1.bf16.msra.mxu0 %v2985_v34  ;;  %v414_v34 = vsub.s32 1, %v3825_v31 }
 0x170   :  { %2988 = vmatprep.subr.bf16.mxu0 %v2987_v37 }
 0x171   :  { %2782 = vmatpush1.bf16.msra.mxu1 %v2781_v4  ;;  %v415_v36 = vrot.slane %v3828_v33, %v414_v34  ;;  %v892_v4 = vld [vmem:[#allocation7 + $0x4a0] sm:$0xff] }
 0x172   :  { %2784 = vmatprep.subr.bf16.mxu1 %v2783_v5  ;;  %v2795_v5 = vpack.c.bf16 %v893_v62, %v889_v61  ;;  %v2797_v13 = vpack.c.bf16 %v892_v4, %v888_v3  ;;  %v933_v3 = vld [vmem:[#allocation7 + $0x5e8] sm:$0xff]  ;;  %v931_v4 = vld [vmem:[#allocation7 + $0x5d8] sm:$0xff] }
 0x173   :  { %2990 = vmatpush1.bf16.msra.mxu0 %v2989_v48  ;;  %v885_v48 = vld [vmem:[#allocation7 + $0x468] sm:$0xff] }
 0x174   :  { %2992 = vmatprep.subr.bf16.mxu0 %v2991_v51  ;;  %v2791_v57 = vpack.c.bf16 %v885_v48, %v881_v46  ;;  %v423_v46 = vrot.slane %v3828_v33, %v422_v27  ;;  %v3031_v48 = vpack.c.bf16 %v919_v39, %v915_v38 }
 0x175   :  { %2786 = vmatpush1.bf16.msra.mxu1 %v2785_v15  ;;  %v900_v15 = vld [vmem:[#allocation7 + $0x4e0] sm:$0xff] }
 0x176   :  { %2788 = vmatprep.subr.bf16.mxu1 %v2787_v16  ;;  %v2799_v16 = vpack.c.bf16 %v901_v10, %v897_v9  ;;  %v928_v9 = vld [vmem:[#allocation7 + $0x5c0] sm:$0xff] }
 0x177   :  { %2994 = vmatpush1.bf16.msra.mxu0 %v2993_v60  ;;  %v886_v60 = vld [vmem:[#allocation7 + $0x470] sm:$0xff]  ;;  %v932_v10 = vld [vmem:[#allocation7 + $0x5e0] sm:$0xff] }
 0x178   :  { %2996 = vmatprep.subr.bf16.mxu0 %v2995_v63  ;;  %v891_v63 = vld [vmem:[#allocation7 + $0x498] sm:$0xff]  ;;  %v3017_v2 = vpack.c.bf16 %v886_v60, %v882_v59  ;;  %v920_v59 = vld [vmem:[#allocation7 + $0x580] sm:$0xff] }
 0x179   :  { %v3019_v6 = vpack.c.bf16 %v895_v0, %v891_v63  ;;  %v924_v60 = vld [vmem:[#allocation7 + $0x5a0] sm:$0xff]  ;;  %v922_v0 = vld [vmem:[#allocation7 + $0x590] sm:$0xff] }
 0x17b   :  { %2998 = vmatpush1.bf16.msra.mxu0 %v2997_v8  ;;  %v894_v8 = vld [vmem:[#allocation7 + $0x4b0] sm:$0xff] }
 0x17c   :  { %3000 = vmatprep.subr.bf16.mxu0 %v2999_v11  ;;  %v899_v11 = vld [vmem:[#allocation7 + $0x4d8] sm:$0xff]  ;;  %v3021_v14 = vpack.c.bf16 %v894_v8, %v890_v7  ;;  %v2813_v7 = vpack.c.bf16 %v924_v60, %v920_v59 }
 0x17d   :  { %v963_v59 = vld [vmem:[#allocation7 + $0x6d8] sm:$0xff] }
 0x17e   :  { %v967_v60 = vld [vmem:[#allocation7 + $0x6f8] sm:$0xff] }
 0x17f   :  { %3002 = vmatpush1.bf16.msra.mxu0 %v3001_v17  ;;  %v3023_v17 = vpack.c.bf16 %v903_v12, %v899_v11 }
 0x180   :  { %3004 = vmatprep.subr.bf16.mxu0 %v3003_v18  ;;  %v898_v18 = vld [vmem:[#allocation7 + $0x4d0] sm:$0xff] }
 0x181   :  { %v3025_v24 = vpack.c.bf16 %v902_v19, %v898_v18  ;;  %v2817_v18 = vpack.c.bf16 %v932_v10, %v928_v9 }
 0x183   :  { %3006 = vmatpush1.bf16.msra.mxu0 %v3005_v22  ;;  %v911_v22 = vld [vmem:[#allocation7 + $0x538] sm:$0xff] }
 0x184   :  { %3008 = vmatprep.subr.bf16.mxu0 %v3007_v23  ;;  %v2801_v23 = vpack.c.bf16 %v900_v15, %v896_v43  ;;  %v937_v43 = vld [vmem:[#allocation7 + $0x608] sm:$0xff] }
 0x185   :  { %v941_v15 = vld [vmem:[#allocation7 + $0x628] sm:$0xff] }
 0x187   :  { %3010 = vmatpush1.bf16.msra.mxu0 %v3009_v28  ;;  %v2803_v28 = vpack.c.bf16 %v909_v45, %v905_v20  ;;  %v936_v20 = vld [vmem:[#allocation7 + $0x600] sm:$0xff] }
 0x188   :  { %3012 = vmatprep.subr.bf16.mxu0 %v3011_v29  ;;  %v3027_v29 = vpack.c.bf16 %v911_v22, %v907_v21  ;;  %v940_v45 = vld [vmem:[#allocation7 + $0x620] sm:$0xff]  ;;  %v2819_v21 = vpack.c.bf16 %v941_v15, %v937_v43  ;;  %v970_v43 = vld [vmem:[#allocation7 + $0x710] sm:$0xff] }
 0x189   :  { %v974_v15 = vld [vmem:[#allocation7 + $0x730] sm:$0xff] }
 0x1dd   :  { %v520_v37 = vpop.f32.mrb[0].mxu0 }
 0x1de   :  { %v521_v40 = vadd.f32 %v520_v37, %v411_v35  ;;  %v522_v41 = vpop.f32.mrb[1].mxu0  ;;  %v910_v35 = vld [vmem:[#allocation7 + $0x530] sm:$0xff]  ;;  %v917_v37 = vld [vmem:[#allocation7 + $0x568] sm:$0xff] }
 0x1df   :  { %v523_v47 = vadd.f32 %v522_v41, %v415_v36  ;;  %v913_v36 = vld [vmem:[#allocation7 + $0x548] sm:$0xff]  ;;  %v3029_v41 = vpack.c.bf16 %v910_v35, %v906_v30  ;;  %v2821_v30 = vpack.c.bf16 %v940_v45, %v936_v20  ;;  %v3061_v45 = vpack.c.bf16 %v974_v15, %v970_v43  ;;  %v1006_v43 = vld [vmem:[#allocation7 + $0x830] sm:$0xff] }
 0x1e0   :  { %v737_v56 = vmax.f32 %v521_v40, 0.0  ;;  %v2805_v40 = vpack.c.bf16 %v908_v26, %v904_v25  ;;  %v945_v25 = vld [vmem:[#allocation7 + $0x648] sm:$0xff] }
 0x1e1   :  { %v738_v51 = vmax.f32 %v523_v47, 0.0  ;;  %v2807_v47 = vpack.c.bf16 %v917_v37, %v913_v36  ;;  %v949_v26 = vld [vmem:[#allocation7 + $0x668] sm:$0xff]  ;;  %v944_v36 = vld [vmem:[#allocation7 + $0x640] sm:$0xff] }
 0x1e2   :  { %v948_v37 = vld [vmem:[#allocation7 + $0x660] sm:$0xff]  ;;  %v2823_v38 = vpack.c.bf16 %v949_v26, %v945_v25  ;;  %v978_v25 = vld [vmem:[#allocation7 + $0x750] sm:$0xff]  ;;  %v1009_v15 = vld [vmem:[#allocation7 + $0x848] sm:$0xff] }
 0x1e3   :  { %1278 = vmatprep.mubr.f32.mxu1 %v738_v51  ;;  %1562 = vmatprep.mubr.f32.mxu0 %v738_v51  ;;  %v921_v51 = vld [vmem:[#allocation7 + $0x588] sm:$0xff]  ;;  %v982_v26 = vld [vmem:[#allocation7 + $0x770] sm:$0xff] }
 0x1e4   :  { %1279 = vmatmul.mubr.f32.vlgmr.msra.gmra.mrb[4].mxu1 %v737_v56  ;;  %1563 = vmatmul.mubr.f32.vlgmr.msra.gmra.mrb[4].mxu0 %v737_v56 }
 0x1e5   :  { %2790 = vmatpush1.bf16.msra.mxu1 %v2789_v52  ;;  %3014 = vmatpush1.bf16.msra.mxu0 %v3013_v53  ;;  %v925_v52 = vld [vmem:[#allocation7 + $0x5a8] sm:$0xff]  ;;  %v923_v53 = vld [vmem:[#allocation7 + $0x598] sm:$0xff] }
 0x1e6   :  { %2792 = vmatprep.subr.bf16.mxu1 %v2791_v57  ;;  %3016 = vmatprep.subr.bf16.mxu0 %v3015_v58  ;;  %v2809_v57 = vpack.c.bf16 %v916_v44, %v912_v42  ;;  %v3033_v58 = vpack.c.bf16 %v918_v50, %v914_v49  ;;  %v2811_v62 = vpack.c.bf16 %v925_v52, %v921_v51  ;;  %v953_v42 = vld [vmem:[#allocation7 + $0x688] sm:$0xff]  ;;  %v952_v50 = vld [vmem:[#allocation7 + $0x680] sm:$0xff] }
 0x1e7   :  { %v3035_v63 = vpack.c.bf16 %v927_v54, %v923_v53  ;;  %v957_v44 = vld [vmem:[#allocation7 + $0x6a8] sm:$0xff]  ;;  %v956_v51 = vld [vmem:[#allocation7 + $0x6a0] sm:$0xff]  ;;  %v954_v54 = vld [vmem:[#allocation7 + $0x690] sm:$0xff] }
 0x1e8   :  { %v2827_v52 = vpack.c.bf16 %v957_v44, %v953_v42  ;;  %v988_v42 = vld [vmem:[#allocation7 + $0x7a0] sm:$0xff] }
 0x1e9   :  { %2794 = vmatpush1.bf16.msra.mxu1 %v2793_v1  ;;  %3018 = vmatpush1.bf16.msra.mxu0 %v3017_v2  ;;  %v926_v1 = vld [vmem:[#allocation7 + $0x5b0] sm:$0xff]  ;;  %v929_v2 = vld [vmem:[#allocation7 + $0x5c8] sm:$0xff] }
 0x1ea   :  { %2796 = vmatprep.subr.bf16.mxu1 %v2795_v5  ;;  %3020 = vmatprep.subr.bf16.mxu0 %v3019_v6  ;;  %v3841_v55 = vpop.f32.mrb[0].mxu1  ;;  %v935_v5 = vld [vmem:[#allocation7 + $0x5f8] sm:$0xff]  ;;  %v3037_v8 = vpack.c.bf16 %v926_v1, %v922_v0  ;;  %v2815_v11 = vpack.c.bf16 %v933_v3, %v929_v2  ;;  %v964_v0 = vld [vmem:[#allocation7 + $0x6e0] sm:$0xff]  ;;  %v3055_v2 = vpack.c.bf16 %v967_v60, %v963_v59  ;;  %v962_v3 = vld [vmem:[#allocation7 + $0x6d0] sm:$0xff] }
 0x1eb   :  { %v593_v56 = vpop.f32.mrb[1].mxu1  ;;  %v3039_v12 = vpack.c.bf16 %v935_v5, %v931_v4  ;;  %v966_v4 = vld [vmem:[#allocation7 + $0x6f0] sm:$0xff]  ;;  %v969_v5 = vld [vmem:[#allocation7 + $0x708] sm:$0xff]  ;;  %v992_v59 = vld [vmem:[#allocation7 + $0x7c0] sm:$0xff] }
 0x1ec   :  { %v594_v61 = vadd.f32 %v593_v56, %v423_v46  ;;  %v955_v46 = vld [vmem:[#allocation7 + $0x698] sm:$0xff]  ;;  %v958_v56 = vld [vmem:[#allocation7 + $0x6b0] sm:$0xff]  ;;  %v3057_v10 = vpack.c.bf16 %v966_v4, %v962_v3  ;;  %v996_v60 = vld [vmem:[#allocation7 + $0x7e0] sm:$0xff] }
 0x1ed   :  { %2798 = vmatpush1.bf16.msra.mxu1 %v2797_v13  ;;  %3022 = vmatpush1.bf16.msra.mxu0 %v3021_v14  ;;  %v930_v13 = vld [vmem:[#allocation7 + $0x5d0] sm:$0xff]  ;;  %v1003_v3 = vld [vmem:[#allocation7 + $0x818] sm:$0xff] }
 0x1ee   :  { %2800 = vmatprep.subr.bf16.mxu1 %v2799_v16  ;;  %3024 = vmatprep.subr.bf16.mxu0 %v3023_v17  ;;  %v740_v6 = vmax.f32 %v594_v61, 0.0  ;;  %v934_v14 = vld [vmem:[#allocation7 + $0x5f0] sm:$0xff]  ;;  %v939_v16 = vld [vmem:[#allocation7 + $0x618] sm:$0xff]  ;;  %v2829_v61 = vpack.c.bf16 %v956_v51, %v952_v50  ;;  %v993_v50 = vld [vmem:[#allocation7 + $0x7c8] sm:$0xff] }
 0x1ef   :  { %v943_v17 = vld [vmem:[#allocation7 + $0x638] sm:$0xff]  ;;  %v3041_v19 = vpack.c.bf16 %v934_v14, %v930_v13  ;;  %v997_v51 = vld [vmem:[#allocation7 + $0x7e8] sm:$0xff] }
 0x1f0   :  { %1349 = vmatprep.mubr.f32.mxu1 %v740_v6  ;;  %1633 = vmatprep.mubr.f32.mxu0 %v740_v6  ;;  %v3043_v22 = vpack.c.bf16 %v943_v17, %v939_v16  ;;  %v973_v6 = vld [vmem:[#allocation7 + $0x728] sm:$0xff]  ;;  %v1007_v4 = vld [vmem:[#allocation7 + $0x838] sm:$0xff] }
 0x1f1   :  { %2802 = vmatpush1.bf16.msra.mxu1 %v2801_v23  ;;  %3026 = vmatpush1.bf16.msra.mxu0 %v3025_v24  ;;  %v938_v23 = vld [vmem:[#allocation7 + $0x610] sm:$0xff]  ;;  %v2835_v13 = vpack.c.bf16 %v973_v6, %v969_v5  ;;  %v977_v16 = vld [vmem:[#allocation7 + $0x748] sm:$0xff] }
 0x1f2   :  { %2804 = vmatprep.subr.bf16.mxu1 %v2803_v28  ;;  %3028 = vmatprep.subr.bf16.mxu0 %v3027_v29  ;;  %v942_v24 = vld [vmem:[#allocation7 + $0x630] sm:$0xff]  ;;  %v947_v28 = vld [vmem:[#allocation7 + $0x658] sm:$0xff]  ;;  %v981_v17 = vld [vmem:[#allocation7 + $0x768] sm:$0xff] }
 0x1f3   :  { %v951_v29 = vld [vmem:[#allocation7 + $0x678] sm:$0xff]  ;;  %v3045_v35 = vpack.c.bf16 %v942_v24, %v938_v23  ;;  %v2839_v23 = vpack.c.bf16 %v981_v17, %v977_v16  ;;  %v1013_v17 = vld [vmem:[#allocation7 + $0x868] sm:$0xff] }
 0x1f4   :  { %v3047_v39 = vpack.c.bf16 %v951_v29, %v947_v28  ;;  %v985_v28 = vld [vmem:[#allocation7 + $0x788] sm:$0xff] }
 0x1f5   :  { %2806 = vmatpush1.bf16.msra.mxu1 %v2805_v40  ;;  %3030 = vmatpush1.bf16.msra.mxu0 %v3029_v41  ;;  %v946_v40 = vld [vmem:[#allocation7 + $0x650] sm:$0xff]  ;;  %v989_v29 = vld [vmem:[#allocation7 + $0x7a8] sm:$0xff] }
 0x1f6   :  { %2808 = vmatprep.subr.bf16.mxu1 %v2807_v47  ;;  %3032 = vmatprep.subr.bf16.mxu0 %v3031_v48  ;;  %v950_v41 = vld [vmem:[#allocation7 + $0x670] sm:$0xff]  ;;  %v959_v47 = vld [vmem:[#allocation7 + $0x6b8] sm:$0xff]  ;;  %v2825_v48 = vpack.c.bf16 %v948_v37, %v944_v36  ;;  %v418_v37 = vsub.s32 2, %v3825_v31 }
 0x1f7   :  { %v3049_v49 = vpack.c.bf16 %v950_v41, %v946_v40  ;;  %v3051_v53 = vpack.c.bf16 %v959_v47, %v955_v46  ;;  %v3065_v40 = vpack.c.bf16 %v982_v26, %v978_v25  ;;  %v984_v41 = vld [vmem:[#allocation7 + $0x780] sm:$0xff]  ;;  %v2843_v46 = vpack.c.bf16 %v989_v29, %v985_v28  ;;  %v1010_v25 = vld [vmem:[#allocation7 + $0x850] sm:$0xff]  ;;  %v1017_v28 = vld [vmem:[#allocation7 + $0x888] sm:$0xff] }
 0x1f8   :  { %v1014_v26 = vld [vmem:[#allocation7 + $0x870] sm:$0xff]  ;;  %v1021_v29 = vld [vmem:[#allocation7 + $0x8a8] sm:$0xff] }
 0x1f9   :  { %2810 = vmatpush1.bf16.msra.mxu1 %v2809_v57  ;;  %3034 = vmatpush1.bf16.msra.mxu0 %v3033_v58  ;;  %v961_v57 = vld [vmem:[#allocation7 + $0x6c8] sm:$0xff] }
 0x1fa   :  { %2812 = vmatprep.subr.bf16.mxu1 %v2811_v62  ;;  %3036 = vmatprep.subr.bf16.mxu0 %v3035_v63  ;;  %v965_v58 = vld [vmem:[#allocation7 + $0x6e8] sm:$0xff]  ;;  %v3053_v62 = vpack.c.bf16 %v958_v56, %v954_v54  ;;  %v960_v63 = vld [vmem:[#allocation7 + $0x6c0] sm:$0xff]  ;;  %v430_v54 = vsub.s32 5, %v3825_v31  ;;  %v419_v56 = vrot.slane %v3828_v33, %v418_v37 }
 0x1fb   :  { %v2831_v1 = vpack.c.bf16 %v965_v58, %v961_v57  ;;  %v2833_v9 = vpack.c.bf16 %v964_v0, %v960_v63  ;;  %v2845_v57 = vpack.c.bf16 %v988_v42, %v984_v41  ;;  %v994_v63 = vld [vmem:[#allocation7 + $0x7d0] sm:$0xff]  ;;  %v1020_v41 = vld [vmem:[#allocation7 + $0x8a0] sm:$0xff]  ;;  %v2859_v42 = vpack.c.bf16 %v1021_v29, %v1017_v28 }
 0x1fc   :  { %v998_v0 = vld [vmem:[#allocation7 + $0x7f0] sm:$0xff]  ;;  %v431_v5 = vrot.slane %v3828_v33, %v430_v54  ;;  %v592_v6 = vadd.f32 %v3841_v55, %v419_v56  ;;  %v1011_v33 = vld [vmem:[#allocation7 + $0x858] sm:$0xff]  ;;  %v1024_v56 = vld [vmem:[#allocation7 + $0x8c0] sm:$0xff] }
 0x1fd   :  { %2814 = vmatpush1.bf16.msra.mxu1 %v2813_v7  ;;  %3038 = vmatpush1.bf16.msra.mxu0 %v3037_v8  ;;  %v971_v7 = vld [vmem:[#allocation7 + $0x718] sm:$0xff] }
 0x1fe   :  { %2816 = vmatprep.subr.bf16.mxu1 %v2815_v11  ;;  %3040 = vmatprep.subr.bf16.mxu0 %v3039_v12  ;;  %v975_v8 = vld [vmem:[#allocation7 + $0x738] sm:$0xff]  ;;  %v968_v11 = vld [vmem:[#allocation7 + $0x700] sm:$0xff] }
 0x1ff   :  { %v972_v12 = vld [vmem:[#allocation7 + $0x720] sm:$0xff]  ;;  %v3059_v14 = vpack.c.bf16 %v975_v8, %v971_v7  ;;  %v2849_v7 = vpack.c.bf16 %v996_v60, %v992_v59  ;;  %v3073_v8 = vpack.c.bf16 %v998_v0, %v994_v63  ;;  %v1026_v60 = vld [vmem:[#allocation7 + $0x8d0] sm:$0xff]  ;;  %v1037_v63 = vld [vmem:[#allocation7 + $0x928] sm:$0xff] }
 0x200   :  { %v2837_v20 = vpack.c.bf16 %v972_v12, %v968_v11  ;;  %v1035_v0 = vld [vmem:[#allocation7 + $0x918] sm:$0xff] }
 0x201   :  { %2818 = vmatpush1.bf16.msra.mxu1 %v2817_v18  ;;  %3042 = vmatpush1.bf16.msra.mxu0 %v3041_v19  ;;  %v979_v18 = vld [vmem:[#allocation7 + $0x758] sm:$0xff] }
 0x202   :  { %2820 = vmatprep.subr.bf16.mxu1 %v2819_v21  ;;  %3044 = vmatprep.subr.bf16.mxu0 %v3043_v22  ;;  %v983_v19 = vld [vmem:[#allocation7 + $0x778] sm:$0xff]  ;;  %v976_v21 = vld [vmem:[#allocation7 + $0x740] sm:$0xff] }
 0x203   :  { %v980_v22 = vld [vmem:[#allocation7 + $0x760] sm:$0xff]  ;;  %v3063_v24 = vpack.c.bf16 %v983_v19, %v979_v18  ;;  %v1015_v18 = vld [vmem:[#allocation7 + $0x878] sm:$0xff]  ;;  %v739_v19 = vmax.f32 %v592_v6, 0.0 }
 0x205   :  { %2822 = vmatpush1.bf16.msra.mxu1 %v2821_v30  ;;  %3046 = vmatpush1.bf16.msra.mxu0 %v3045_v35  ;;  %v987_v30 = vld [vmem:[#allocation7 + $0x798] sm:$0xff] }
 0x206   :  { %2824 = vmatprep.subr.bf16.mxu1 %v2823_v38  ;;  %3048 = vmatprep.subr.bf16.mxu0 %v3047_v39  ;;  %v991_v35 = vld [vmem:[#allocation7 + $0x7b8] sm:$0xff]  ;;  %v2841_v39 = vpack.c.bf16 %v980_v22, %v976_v21  ;;  %v1008_v21 = vld [vmem:[#allocation7 + $0x840] sm:$0xff] }
 0x207   :  { %v3067_v47 = vpack.c.bf16 %v991_v35, %v987_v30  ;;  %v1012_v22 = vld [vmem:[#allocation7 + $0x860] sm:$0xff]  ;;  %v1019_v30 = vld [vmem:[#allocation7 + $0x898] sm:$0xff] }
 0x208   :  { %v1023_v35 = vld [vmem:[#allocation7 + $0x8b8] sm:$0xff] }
 0x209   :  { %2826 = vmatpush1.bf16.msra.mxu1 %v2825_v48  ;;  %3050 = vmatpush1.bf16.msra.mxu0 %v3049_v49  ;;  %v986_v48 = vld [vmem:[#allocation7 + $0x790] sm:$0xff] }
 0x20a   :  { %2828 = vmatprep.subr.bf16.mxu1 %v2827_v52  ;;  %3052 = vmatprep.subr.bf16.mxu0 %v3051_v53  ;;  %v2312_v36 = vpop.f32.mrb[2].mxu1  ;;  %v990_v49 = vld [vmem:[#allocation7 + $0x7b0] sm:$0xff]  ;;  %v995_v52 = vld [vmem:[#allocation7 + $0x7d8] sm:$0xff] }
 0x20b   :  { %v2313_v38 = vpop.f32.mrb[3].mxu1  ;;  %v999_v53 = vld [vmem:[#allocation7 + $0x7f8] sm:$0xff]  ;;  %v3069_v58 = vpack.c.bf16 %v990_v49, %v986_v48  ;;  %v1022_v48 = vld [vmem:[#allocation7 + $0x8b0] sm:$0xff]  ;;  %v1025_v49 = vld [vmem:[#allocation7 + $0x8c8] sm:$0xff] }
 0x20c   :  { %v3844_v44 = vadd.f32 %v2313_v38, %v2312_v36  ;;  %v2857_v38 = vpack.c.bf16 %v1012_v22, %v1008_v21  ;;  %v1051_v21 = vld [vmem:[#allocation7 + $0x998] sm:$0xff] }
 0x20d   :  { %2830 = vmatpush1.bf16.msra.mxu1 %v2829_v61  ;;  %3054 = vmatpush1.bf16.msra.mxu0 %v3053_v62  ;;  %v2847_v61 = vpack.c.bf16 %v997_v51, %v993_v50  ;;  %v3071_v62 = vpack.c.bf16 %v999_v53, %v995_v52  ;;  %v1029_v50 = vld [vmem:[#allocation7 + $0x8e8] sm:$0xff]  ;;  %v1027_v51 = vld [vmem:[#allocation7 + $0x8d8] sm:$0xff] }
 0x20e   :  { %2832 = vmatprep.subr.bf16.mxu1 %v2831_v1  ;;  %3056 = vmatprep.subr.bf16.mxu0 %v3055_v2  ;;  %v1001_v1 = vld [vmem:[#allocation7 + $0x808] sm:$0xff]  ;;  %v1031_v52 = vld [vmem:[#allocation7 + $0x8f8] sm:$0xff] }
 0x20f   :  { %v1005_v2 = vld [vmem:[#allocation7 + $0x828] sm:$0xff]  ;;  %v3087_v59 = vpack.c.bf16 %v1031_v52, %v1027_v51  ;;  %v1055_v22 = vld [vmem:[#allocation7 + $0x9b8] sm:$0xff]  ;;  %v1062_v51 = vld [vmem:[#allocation7 + $0x9f0] sm:$0xff] }
 0x210   :  { %v2851_v12 = vpack.c.bf16 %v1005_v2, %v1001_v1  ;;  %v1039_v1 = vld [vmem:[#allocation7 + $0x938] sm:$0xff]  ;;  %v3099_v29 = vpack.c.bf16 %v1055_v22, %v1051_v21  ;;  %v1065_v52 = vld [vmem:[#allocation7 + $0xa08] sm:$0xff]  ;;  %v1086_v21 = vld [vmem:[#allocation7 + $0xab0] sm:$0xff] }
 0x211   :  { %2834 = vmatpush1.bf16.msra.mxu1 %v2833_v9  ;;  %3058 = vmatpush1.bf16.msra.mxu0 %v3057_v10  ;;  %v1000_v9 = vld [vmem:[#allocation7 + $0x800] sm:$0xff]  ;;  %v1089_v22 = vld [vmem:[#allocation7 + $0xac8] sm:$0xff] }
 0x212   :  { %2836 = vmatprep.subr.bf16.mxu1 %v2835_v13  ;;  %3060 = vmatprep.subr.bf16.mxu0 %v3059_v14  ;;  %v1004_v10 = vld [vmem:[#allocation7 + $0x820] sm:$0xff]  ;;  %v3075_v13 = vpack.c.bf16 %v1007_v4, %v1003_v3  ;;  %v1002_v14 = vld [vmem:[#allocation7 + $0x810] sm:$0xff] }
 0x213   :  { %v1032_v4 = vld [vmem:[#allocation7 + $0x900] sm:$0xff] }
 0x215   :  { %2838 = vmatpush1.bf16.msra.mxu1 %v2837_v20  ;;  %3062 = vmatpush1.bf16.msra.mxu0 %v3061_v45  ;;  %v2853_v20 = vpack.c.bf16 %v1004_v10, %v1000_v9  ;;  %v3077_v45 = vpack.c.bf16 %v1006_v43, %v1002_v14  ;;  %v1038_v9 = vld [vmem:[#allocation7 + $0x930] sm:$0xff]  ;;  %v1041_v10 = vld [vmem:[#allocation7 + $0x948] sm:$0xff]  ;;  %v1047_v14 = vld [vmem:[#allocation7 + $0x978] sm:$0xff] }
 0x216   :  { %2840 = vmatprep.subr.bf16.mxu1 %v2839_v23  ;;  %3064 = vmatprep.subr.bf16.mxu0 %v3063_v24  ;;  %v2855_v23 = vpack.c.bf16 %v1013_v17, %v1009_v15  ;;  %v3079_v24 = vpack.c.bf16 %v1015_v18, %v1011_v33  ;;  %v1044_v17 = vld [vmem:[#allocation7 + $0x960] sm:$0xff] }
 0x219   :  { %2842 = vmatpush1.bf16.msra.mxu1 %v2841_v39  ;;  %3066 = vmatpush1.bf16.msra.mxu0 %v3065_v40  ;;  %v3081_v39 = vpack.c.bf16 %v1014_v26, %v1010_v25  ;;  %v1016_v40 = vld [vmem:[#allocation7 + $0x880] sm:$0xff] }
 0x21a   :  { %2844 = vmatprep.subr.bf16.mxu1 %v2843_v46  ;;  %3068 = vmatprep.subr.bf16.mxu0 %v3067_v47  ;;  %v3083_v46 = vpack.c.bf16 %v1023_v35, %v1019_v30  ;;  %v1018_v47 = vld [vmem:[#allocation7 + $0x890] sm:$0xff]  ;;  %v2861_v53 = vpack.c.bf16 %v1020_v41, %v1016_v40  ;;  %v1048_v25 = vld [vmem:[#allocation7 + $0x980] sm:$0xff]  ;;  %v1063_v40 = vld [vmem:[#allocation7 + $0x9f8] sm:$0xff] }
 0x21b   :  { %v3085_v54 = vpack.c.bf16 %v1022_v48, %v1018_v47  ;;  %v1052_v26 = vld [vmem:[#allocation7 + $0x9a0] sm:$0xff]  ;;  %v1050_v30 = vld [vmem:[#allocation7 + $0x990] sm:$0xff] }
 0x21c   :  { %v1054_v35 = vld [vmem:[#allocation7 + $0x9b0] sm:$0xff]  ;;  %v2877_v41 = vpack.c.bf16 %v1052_v26, %v1048_v25  ;;  %v1060_v47 = vld [vmem:[#allocation7 + $0x9e0] sm:$0xff]  ;;  %v1095_v25 = vld [vmem:[#allocation7 + $0xaf8] sm:$0xff] }
 0x21d   :  { %2846 = vmatpush1.bf16.msra.mxu1 %v2845_v57  ;;  %3070 = vmatpush1.bf16.msra.mxu0 %v3069_v58  ;;  %v3852_v11 = vpop.f32.mrb[2].mxu0  ;;  %v1028_v57 = vld [vmem:[#allocation7 + $0x8e0] sm:$0xff]  ;;  %v2863_v58 = vpack.c.bf16 %v1029_v50, %v1025_v49  ;;  %v1058_v50 = vld [vmem:[#allocation7 + $0x9d0] sm:$0xff] }
 0x21e   :  { %2848 = vmatprep.subr.bf16.mxu1 %v2847_v61  ;;  %3072 = vmatprep.subr.bf16.mxu0 %v3071_v62  ;;  %v664_v16 = vpop.f32.mrb[3].mxu0  ;;  %v1030_v61 = vld [vmem:[#allocation7 + $0x8f0] sm:$0xff]  ;;  %v1033_v62 = vld [vmem:[#allocation7 + $0x908] sm:$0xff]  ;;  %v2865_v2 = vpack.c.bf16 %v1028_v57, %v1024_v56  ;;  %v1071_v56 = vld [vmem:[#allocation7 + $0xa38] sm:$0xff] }
 0x21f   :  { %v665_v55 = vadd.f32 %v664_v16, %v431_v5  ;;  %v3089_v3 = vpack.c.bf16 %v1030_v61, %v1026_v60  ;;  %v1036_v5 = vld [vmem:[#allocation7 + $0x920] sm:$0xff]  ;;  %v2867_v6 = vpack.c.bf16 %v1037_v63, %v1033_v62  ;;  %v1066_v63 = vld [vmem:[#allocation7 + $0xa10] sm:$0xff] }
 0x220   :  { %v2869_v43 = vpack.c.bf16 %v1036_v5, %v1032_v4  ;;  %v1040_v16 = vld [vmem:[#allocation7 + $0x940] sm:$0xff]  ;;  %v1079_v4 = vld [vmem:[#allocation7 + $0xa78] sm:$0xff] }
 0x221   :  { %2850 = vmatpush1.bf16.msra.mxu1 %v2849_v7  ;;  %3074 = vmatpush1.bf16.msra.mxu0 %v3073_v8  ;;  %v742_v36 = vmax.f32 %v665_v55, 0.0  ;;  %v3091_v7 = vpack.c.bf16 %v1039_v1, %v1035_v0  ;;  %v1034_v8 = vld [vmem:[#allocation7 + $0x910] sm:$0xff]  ;;  %v1068_v60 = vld [vmem:[#allocation7 + $0xa20] sm:$0xff]  ;;  %v1073_v1 = vld [vmem:[#allocation7 + $0xa48] sm:$0xff] }
 0x222   :  { %2852 = vmatprep.subr.bf16.mxu1 %v2851_v12  ;;  %3076 = vmatprep.subr.bf16.mxu0 %v3075_v13  ;;  %v1045_v12 = vld [vmem:[#allocation7 + $0x968] sm:$0xff]  ;;  %v1043_v13 = vld [vmem:[#allocation7 + $0x958] sm:$0xff]  ;;  %v3093_v15 = vpack.c.bf16 %v1038_v9, %v1034_v8  ;;  %v1042_v55 = vld [vmem:[#allocation7 + $0x950] sm:$0xff] }
 0x223   :  { %v2871_v33 = vpack.c.bf16 %v1045_v12, %v1041_v10  ;;  %v3095_v18 = vpack.c.bf16 %v1047_v14, %v1043_v13  ;;  %v1070_v0 = vld [vmem:[#allocation7 + $0xa30] sm:$0xff]  ;;  %v1076_v8 = vld [vmem:[#allocation7 + $0xa60] sm:$0xff]  ;;  %v1081_v14 = vld [vmem:[#allocation7 + $0xa88] sm:$0xff] }
 0x224   :  { %1350 = vmatmul.mubr.f32.vlgmr.msra.gmra.mrb[4].mxu1 %v739_v19  ;;  %1634 = vmatmul.mubr.f32.vlgmr.msra.gmra.mrb[4].mxu0 %v739_v19  ;;  %v1046_v19 = vld [vmem:[#allocation7 + $0x970] sm:$0xff] }
 0x225   :  { %2854 = vmatpush1.bf16.msra.mxu1 %v2853_v20  ;;  %3078 = vmatpush1.bf16.msra.mxu0 %v3077_v45  ;;  %v1049_v20 = vld [vmem:[#allocation7 + $0x988] sm:$0xff]  ;;  %v1074_v12 = vld [vmem:[#allocation7 + $0xa50] sm:$0xff] }
 0x226   :  { %2856 = vmatprep.subr.bf16.mxu1 %v2855_v23  ;;  %3080 = vmatprep.subr.bf16.mxu0 %v3079_v24  ;;  %v1053_v45 = vld [vmem:[#allocation7 + $0x9a8] sm:$0xff]  ;;  %v2873_v23 = vpack.c.bf16 %v1044_v17, %v1040_v16  ;;  %v3097_v24 = vpack.c.bf16 %v1046_v19, %v1042_v55  ;;  %v1078_v13 = vld [vmem:[#allocation7 + $0xa70] sm:$0xff]  ;;  %v1087_v16 = vld [vmem:[#allocation7 + $0xab8] sm:$0xff] }
 0x227   :  { %1420 = vmatprep.mubr.f32.mxu1 %v742_v36  ;;  %1704 = vmatprep.mubr.f32.mxu0 %v742_v36  ;;  %v2875_v28 = vpack.c.bf16 %v1053_v45, %v1049_v20  ;;  %v1057_v36 = vld [vmem:[#allocation7 + $0x9c8] sm:$0xff]  ;;  %v1084_v55 = vld [vmem:[#allocation7 + $0xaa0] sm:$0xff]  ;;  %v1082_v45 = vld [vmem:[#allocation7 + $0xa90] sm:$0xff] }
 0x229   :  { %2858 = vmatpush1.bf16.msra.mxu1 %v2857_v38  ;;  %3082 = vmatpush1.bf16.msra.mxu0 %v3081_v39  ;;  %v1061_v38 = vld [vmem:[#allocation7 + $0x9e8] sm:$0xff]  ;;  %v1059_v39 = vld [vmem:[#allocation7 + $0x9d8] sm:$0xff] }
 0x22a   :  { %2860 = vmatprep.subr.bf16.mxu1 %v2859_v42  ;;  %3084 = vmatprep.subr.bf16.mxu0 %v3083_v46  ;;  %v3101_v42 = vpack.c.bf16 %v1054_v35, %v1050_v30  ;;  %v1056_v46 = vld [vmem:[#allocation7 + $0x9c0] sm:$0xff]  ;;  %v2879_v48 = vpack.c.bf16 %v1061_v38, %v1057_v36  ;;  %v3103_v49 = vpack.c.bf16 %v1063_v40, %v1059_v39  ;;  %v1090_v38 = vld [vmem:[#allocation7 + $0xad0] sm:$0xff]  ;;  %v1097_v40 = vld [vmem:[#allocation7 + $0xb08] sm:$0xff] }
 0x22b   :  { %v2881_v57 = vpack.c.bf16 %v1060_v47, %v1056_v46  ;;  %v1092_v30 = vld [vmem:[#allocation7 + $0xae0] sm:$0xff]  ;;  %v1094_v39 = vld [vmem:[#allocation7 + $0xaf0] sm:$0xff]  ;;  %v1103_v46 = vld [vmem:[#allocation7 + $0xb38] sm:$0xff] }
 0x22d   :  { %2862 = vmatpush1.bf16.msra.mxu1 %v2861_v53  ;;  %3086 = vmatpush1.bf16.msra.mxu0 %v3085_v54  ;;  %v1069_v53 = vld [vmem:[#allocation7 + $0xa28] sm:$0xff]  ;;  %v1067_v54 = vld [vmem:[#allocation7 + $0xa18] sm:$0xff] }
 0x22e   :  { %2864 = vmatprep.subr.bf16.mxu1 %v2863_v58  ;;  %3088 = vmatprep.subr.bf16.mxu0 %v3087_v59  ;;  %v3105_v58 = vpack.c.bf16 %v1062_v51, %v1058_v50  ;;  %v1064_v59 = vld [vmem:[#allocation7 + $0xa00] sm:$0xff]  ;;  %v2883_v61 = vpack.c.bf16 %v1069_v53, %v1065_v52  ;;  %v3107_v62 = vpack.c.bf16 %v1071_v56, %v1067_v54  ;;  %v1098_v53 = vld [vmem:[#allocation7 + $0xb10] sm:$0xff]  ;;  %v1105_v56 = vld [vmem:[#allocation7 + $0xb48] sm:$0xff] }
 0x22f   :  { %v2885_v5 = vpack.c.bf16 %v1068_v60, %v1064_v59  ;;  %v1100_v50 = vld [vmem:[#allocation7 + $0xb20] sm:$0xff]  ;;  %v1102_v54 = vld [vmem:[#allocation7 + $0xb30] sm:$0xff]  ;;  %v1111_v59 = vld [vmem:[#allocation7 + $0xb78] sm:$0xff] }
 0x231   :  { %2866 = vmatpush1.bf16.msra.mxu1 %v2865_v2  ;;  %3090 = vmatpush1.bf16.msra.mxu0 %v3089_v3  ;;  %v1077_v2 = vld [vmem:[#allocation7 + $0xa68] sm:$0xff]  ;;  %v1075_v3 = vld [vmem:[#allocation7 + $0xa58] sm:$0xff] }
 0x232   :  { %2868 = vmatprep.subr.bf16.mxu1 %v2867_v6  ;;  %3092 = vmatprep.subr.bf16.mxu0 %v3091_v7  ;;  %v3109_v6 = vpack.c.bf16 %v1070_v0, %v1066_v63  ;;  %v1072_v7 = vld [vmem:[#allocation7 + $0xa40] sm:$0xff]  ;;  %v2887_v9 = vpack.c.bf16 %v1077_v2, %v1073_v1  ;;  %v3111_v10 = vpack.c.bf16 %v1079_v4, %v1075_v3  ;;  %v1106_v2 = vld [vmem:[#allocation7 + $0xb50] sm:$0xff]  ;;  %v1113_v4 = vld [vmem:[#allocation7 + $0xb88] sm:$0xff] }
 0x233   :  { %v2889_v17 = vpack.c.bf16 %v1076_v8, %v1072_v7  ;;  %v1108_v63 = vld [vmem:[#allocation7 + $0xb60] sm:$0xff]  ;;  %v1110_v3 = vld [vmem:[#allocation7 + $0xb70] sm:$0xff]  ;;  %v1119_v7 = vld [vmem:[#allocation7 + $0xbb8] sm:$0xff]  ;;  %v426_v8 = vsub.s32 4, %v3825_v31 }
 0x235   :  { %2870 = vmatpush1.bf16.msra.mxu1 %v2869_v43  ;;  %3094 = vmatpush1.bf16.msra.mxu0 %v3093_v15  ;;  %v1085_v43 = vld [vmem:[#allocation7 + $0xaa8] sm:$0xff]  ;;  %v1083_v15 = vld [vmem:[#allocation7 + $0xa98] sm:$0xff] }
 0x236   :  { %2872 = vmatprep.subr.bf16.mxu1 %v2871_v33  ;;  %3096 = vmatprep.subr.bf16.mxu0 %v3095_v18  ;;  %v3113_v33 = vpack.c.bf16 %v1078_v13, %v1074_v12  ;;  %v1080_v18 = vld [vmem:[#allocation7 + $0xa80] sm:$0xff]  ;;  %v2891_v19 = vpack.c.bf16 %v1085_v43, %v1081_v14  ;;  %v3115_v20 = vpack.c.bf16 %v1087_v16, %v1083_v15  ;;  %v1114_v15 = vld [vmem:[#allocation7 + $0xb90] sm:$0xff] }
 0x237   :  { %v2893_v26 = vpack.c.bf16 %v1084_v55, %v1080_v18  ;;  %v1112_v12 = vld [vmem:[#allocation7 + $0xb80] sm:$0xff]  ;;  %v1118_v16 = vld [vmem:[#allocation7 + $0xbb0] sm:$0xff]  ;;  %v1123_v18 = vld [vmem:[#allocation7 + $0xbd8] sm:$0xff] }
 0x238   :  { %v1116_v13 = vld [vmem:[#allocation7 + $0xba0] sm:$0xff]  ;;  %v1127_v55 = vld [vmem:[#allocation7 + $0xbf8] sm:$0xff] }
 0x239   :  { %2874 = vmatpush1.bf16.msra.mxu1 %v2873_v23  ;;  %3098 = vmatpush1.bf16.msra.mxu0 %v3097_v24  ;;  %v1093_v23 = vld [vmem:[#allocation7 + $0xae8] sm:$0xff]  ;;  %v1091_v24 = vld [vmem:[#allocation7 + $0xad8] sm:$0xff] }
 0x23a   :  { %2876 = vmatprep.subr.bf16.mxu1 %v2875_v28  ;;  %3100 = vmatprep.subr.bf16.mxu0 %v3099_v29  ;;  %v3117_v28 = vpack.c.bf16 %v1086_v21, %v1082_v45  ;;  %v1088_v29 = vld [vmem:[#allocation7 + $0xac0] sm:$0xff]  ;;  %v2895_v35 = vpack.c.bf16 %v1093_v23, %v1089_v22  ;;  %v3119_v36 = vpack.c.bf16 %v1095_v25, %v1091_v24 }
 0x23b   :  { %v2897_v47 = vpack.c.bf16 %v1092_v30, %v1088_v29  ;;  %v2909_v45 = vpack.c.bf16 %v1116_v13, %v1112_v12  ;;  %v3133_v21 = vpack.c.bf16 %v1118_v16, %v1114_v15  ;;  %v1120_v22 = vld [vmem:[#allocation7 + $0xbc0] sm:$0xff]  ;;  %v3135_v25 = vpack.c.bf16 %v1127_v55, %v1123_v18  ;;  %v1129_v29 = vld [vmem:[#allocation7 + $0xc08] sm:$0xff] }
 0x23c   :  { %v1124_v23 = vld [vmem:[#allocation7 + $0xbe0] sm:$0xff]  ;;  %v1133_v30 = vld [vmem:[#allocation7 + $0xc28] sm:$0xff]  ;;  %v3594_v15 = vmov 0.0  }
 0x23d   :  { %2878 = vmatpush1.bf16.msra.mxu1 %v2877_v41  ;;  %3102 = vmatpush1.bf16.msra.mxu0 %v3101_v42  ;;  %v1101_v41 = vld [vmem:[#allocation7 + $0xb28] sm:$0xff]  ;;  %v1099_v42 = vld [vmem:[#allocation7 + $0xb18] sm:$0xff]  ;;  %v1156_v18 = vld [vmem:[#allocation7 + $0xce0] sm:$0xff] }
 0x23e   :  { %2880 = vmatprep.subr.bf16.mxu1 %v2879_v48  ;;  %3104 = vmatprep.subr.bf16.mxu0 %v3103_v49  ;;  %v3121_v48 = vpack.c.bf16 %v1094_v39, %v1090_v38  ;;  %v1096_v49 = vld [vmem:[#allocation7 + $0xb00] sm:$0xff]  ;;  %v2899_v51 = vpack.c.bf16 %v1101_v41, %v1097_v40  ;;  %v3123_v52 = vpack.c.bf16 %v1103_v46, %v1099_v42  ;;  %v1153_v12 = vld [vmem:[#allocation7 + $0xcc8] sm:$0xff] }
 0x23f   :  { %v2901_v60 = vpack.c.bf16 %v1100_v50, %v1096_v49  ;;  %v2913_v39 = vpack.c.bf16 %v1124_v23, %v1120_v22  ;;  %v1128_v41 = vld [vmem:[#allocation7 + $0xc00] sm:$0xff]  ;;  %v2915_v46 = vpack.c.bf16 %v1133_v30, %v1129_v29  ;;  %v1134_v49 = vld [vmem:[#allocation7 + $0xc30] sm:$0xff]  ;;  %v1137_v50 = vld [vmem:[#allocation7 + $0xc48] sm:$0xff] }
 0x240   :  { %v1132_v42 = vld [vmem:[#allocation7 + $0xc20] sm:$0xff]  ;;  %v1157_v13 = vld [vmem:[#allocation7 + $0xce8] sm:$0xff] }
 0x241   :  { %2882 = vmatpush1.bf16.msra.mxu1 %v2881_v57  ;;  %3106 = vmatpush1.bf16.msra.mxu0 %v3105_v58  ;;  %v1109_v57 = vld [vmem:[#allocation7 + $0xb68] sm:$0xff]  ;;  %v1107_v58 = vld [vmem:[#allocation7 + $0xb58] sm:$0xff]  ;;  %v2927_v55 = vpack.c.bf16 %v1157_v13, %v1153_v12  ;;  %v1160_v29 = vld [vmem:[#allocation7 + $0xd00] sm:$0xff] }
 0x242   :  { %2884 = vmatprep.subr.bf16.mxu1 %v2883_v61  ;;  %3108 = vmatprep.subr.bf16.mxu0 %v3107_v62  ;;  %v3125_v61 = vpack.c.bf16 %v1102_v54, %v1098_v53  ;;  %v1104_v62 = vld [vmem:[#allocation7 + $0xb40] sm:$0xff]  ;;  %v2903_v0 = vpack.c.bf16 %v1109_v57, %v1105_v56  ;;  %v3127_v1 = vpack.c.bf16 %v1111_v59, %v1107_v58  ;;  %v1143_v53 = vld [vmem:[#allocation7 + $0xc78] sm:$0xff]  ;;  %v1161_v22 = vld [vmem:[#allocation7 + $0xd08] sm:$0xff] }
 0x243   :  { %v1136_v57 = vld [vmem:[#allocation7 + $0xc40] sm:$0xff]  ;;  %v1165_v23 = vld [vmem:[#allocation7 + $0xd28] sm:$0xff] }
 0x244   :  { %v1140_v58 = vld [vmem:[#allocation7 + $0xc60] sm:$0xff] }
 0x245   :  { %2886 = vmatpush1.bf16.msra.mxu1 %v2885_v5  ;;  %3110 = vmatpush1.bf16.msra.mxu0 %v3109_v6  ;;  %v1117_v5 = vld [vmem:[#allocation7 + $0xba8] sm:$0xff]  ;;  %v1115_v6 = vld [vmem:[#allocation7 + $0xb98] sm:$0xff]  ;;  %v1164_v30 = vld [vmem:[#allocation7 + $0xd20] sm:$0xff] }
 0x246   :  { %2888 = vmatprep.subr.bf16.mxu1 %v2887_v9  ;;  %3112 = vmatprep.subr.bf16.mxu0 %v3111_v10  ;;  %v2905_v9 = vpack.c.bf16 %v1108_v63, %v1104_v62  ;;  %v3129_v10 = vpack.c.bf16 %v1110_v3, %v1106_v2  ;;  %v2907_v14 = vpack.c.bf16 %v1117_v5, %v1113_v4  ;;  %v1142_v62 = vld [vmem:[#allocation7 + $0xc70] sm:$0xff]  ;;  %v1145_v63 = vld [vmem:[#allocation7 + $0xc88] sm:$0xff]  ;;  %v1151_v2 = vld [vmem:[#allocation7 + $0xcb8] sm:$0xff] }
 0x247   :  { %v3131_v43 = vpack.c.bf16 %v1119_v7, %v1115_v6  ;;  %v2921_v3 = vpack.c.bf16 %v1140_v58, %v1136_v57  ;;  %v1144_v5 = vld [vmem:[#allocation7 + $0xc80] sm:$0xff]  ;;  %v1179_v57 = vld [vmem:[#allocation7 + $0xd98] sm:$0xff] }
 0x248   :  { %v1148_v6 = vld [vmem:[#allocation7 + $0xca0] sm:$0xff]  ;;  %v1183_v58 = vld [vmem:[#allocation7 + $0xdb8] sm:$0xff] }
 0x249   :  { %2890 = vmatpush1.bf16.msra.mxu1 %v2889_v17  ;;  %3114 = vmatpush1.bf16.msra.mxu0 %v3113_v33  ;;  %v1121_v17 = vld [vmem:[#allocation7 + $0xbc8] sm:$0xff]  ;;  %v2925_v16 = vpack.c.bf16 %v1148_v6, %v1144_v5  ;;  %v1187_v6 = vld [vmem:[#allocation7 + $0xdd8] sm:$0xff]  ;;  %v1188_v12 = vld [vmem:[#allocation7 + $0xde0] sm:$0xff] }
 0x24a   :  { %2892 = vmatprep.subr.bf16.mxu1 %v2891_v19  ;;  %3116 = vmatprep.subr.bf16.mxu0 %v3115_v20  ;;  %v1125_v33 = vld [vmem:[#allocation7 + $0xbe8] sm:$0xff]  ;;  %v3855_v19 = vld [vmem:[#allocation6] sm:$0xff] }
 0x24b   :  { %v427_v20 = vrot.slane %v3855_v19, %v426_v8  ;;  %v2911_v24 = vpack.c.bf16 %v1125_v33, %v1121_v17  ;;  %v1152_v33 = vld [vmem:[#allocation7 + $0xcc0] sm:$0xff]  ;;  %v1189_v5 = vld [vmem:[#allocation7 + $0xde8] sm:$0xff] }
 0x24d   :  { %2894 = vmatpush1.bf16.msra.mxu1 %v2893_v26  ;;  %3118 = vmatpush1.bf16.msra.mxu0 %v3117_v28  ;;  %v1122_v26 = vld [vmem:[#allocation7 + $0xbd0] sm:$0xff]  ;;  %v663_v38 = vadd.f32 %v3852_v11, %v427_v20  ;;  %v2917_v11 = vpack.c.bf16 %v1132_v42, %v1128_v41  ;;  %v1173_v41 = vld [vmem:[#allocation7 + $0xd68] sm:$0xff]  ;;  %v1171_v42 = vld [vmem:[#allocation7 + $0xd58] sm:$0xff] }
 0x24e   :  { %2896 = vmatprep.subr.bf16.mxu1 %v2895_v35  ;;  %3120 = vmatprep.subr.bf16.mxu0 %v3119_v36  ;;  %v1126_v28 = vld [vmem:[#allocation7 + $0xbf0] sm:$0xff]  ;;  %v1131_v35 = vld [vmem:[#allocation7 + $0xc18] sm:$0xff] }
 0x24f   :  { %v1135_v36 = vld [vmem:[#allocation7 + $0xc38] sm:$0xff]  ;;  %v3137_v40 = vpack.c.bf16 %v1126_v28, %v1122_v26  ;;  %v741_v54 = vmax.f32 %v663_v38, 0.0  ;;  %v2929_v26 = vpack.c.bf16 %v1156_v18, %v1152_v33  ;;  %v1162_v38 = vld [vmem:[#allocation7 + $0xd10] sm:$0xff]  ;;  %v1802_v33 = vld [vmem:[#allocation10 + $0x80] sm:$0xff] }
 0x250   :  { %v1803_v18 = vld [vmem:[#allocation10 + $0x88] sm:$0xff] }
 0x251   :  { %2898 = vmatpush1.bf16.msra.mxu1 %v2897_v47  ;;  %3122 = vmatpush1.bf16.msra.mxu0 %v3121_v48  ;;  %v3139_v47 = vpack.c.bf16 %v1135_v36, %v1131_v35  ;;  %v1130_v48 = vld [vmem:[#allocation7 + $0xc10] sm:$0xff]  ;;  %v2931_v35 = vpack.c.bf16 %v1165_v23, %v1161_v22  ;;  %v1786_v22 = vld [vmem:[#allocation10] sm:$0xff] }
 0x252   :  { %2900 = vmatprep.subr.bf16.mxu1 %v2899_v51  ;;  %3124 = vmatprep.subr.bf16.mxu0 %v3123_v52  ;;  %v1141_v51 = vld [vmem:[#allocation7 + $0xc68] sm:$0xff]  ;;  %v1139_v52 = vld [vmem:[#allocation7 + $0xc58] sm:$0xff]  ;;  %v3141_v56 = vpack.c.bf16 %v1134_v49, %v1130_v48  ;;  %v1168_v49 = vld [vmem:[#allocation7 + $0xd40] sm:$0xff] }
 0x253   :  { %v2919_v59 = vpack.c.bf16 %v1141_v51, %v1137_v50  ;;  %v1172_v50 = vld [vmem:[#allocation7 + $0xd60] sm:$0xff]  ;;  %v1787_v23 = vld [vmem:[#allocation10 + $0x8] sm:$0xff] }
 0x255   :  { %2902 = vmatpush1.bf16.msra.mxu1 %v2901_v60  ;;  %3126 = vmatpush1.bf16.msra.mxu0 %v3125_v61  ;;  %v3143_v60 = vpack.c.bf16 %v1143_v53, %v1139_v52  ;;  %v1138_v61 = vld [vmem:[#allocation7 + $0xc50] sm:$0xff] }
 0x256   :  { %2904 = vmatprep.subr.bf16.mxu1 %v2903_v0  ;;  %3128 = vmatprep.subr.bf16.mxu0 %v3127_v1  ;;  %v1149_v0 = vld [vmem:[#allocation7 + $0xca8] sm:$0xff]  ;;  %v1147_v1 = vld [vmem:[#allocation7 + $0xc98] sm:$0xff]  ;;  %v3145_v4 = vpack.c.bf16 %v1142_v62, %v1138_v61  ;;  %v1170_v53 = vld [vmem:[#allocation7 + $0xd50] sm:$0xff] }
 0x257   :  { %v2923_v7 = vpack.c.bf16 %v1149_v0, %v1145_v63  ;;  %v3147_v8 = vpack.c.bf16 %v1151_v2, %v1147_v1  ;;  %v1176_v61 = vld [vmem:[#allocation7 + $0xd80] sm:$0xff]  ;;  %v434_v63 = vsub.s32 6, %v3825_v31  ;;  %v3163_v1 = vpack.c.bf16 %v1183_v58, %v1179_v57  ;;  %v1178_v2 = vld [vmem:[#allocation7 + $0xd90] sm:$0xff] }
 0x258   :  { %v1180_v62 = vld [vmem:[#allocation7 + $0xda0] sm:$0xff]  ;;  %v2014_v31 = vld [vmem:[#allocation2] sm:$0x3] }
 0x259   :  { %2906 = vmatpush1.bf16.msra.mxu1 %v2905_v9  ;;  %3130 = vmatpush1.bf16.msra.mxu0 %v3129_v10  ;;  %v1146_v9 = vld [vmem:[#allocation7 + $0xc90] sm:$0xff]  ;;  %v435_v13 = vrot.slane %v3855_v19, %v434_v63  ;;  %v3171_v19 = vpack.c.bf16 %v1803_v18, %v1802_v33 }
 0x25a   :  { %2908 = vmatprep.subr.bf16.mxu1 %v2907_v14  ;;  %3132 = vmatprep.subr.bf16.mxu0 %v3131_v43  ;;  %v1150_v10 = vld [vmem:[#allocation7 + $0xcb0] sm:$0xff]  ;;  %v1155_v14 = vld [vmem:[#allocation7 + $0xcd8] sm:$0xff] }
 0x25b   :  { %v1159_v43 = vld [vmem:[#allocation7 + $0xcf8] sm:$0xff]  ;;  %v3149_v17 = vpack.c.bf16 %v1150_v10, %v1146_v9  ;;  %v1184_v10 = vld [vmem:[#allocation7 + $0xdc0] sm:$0xff] }
 0x25c   :  { %v3151_v20 = vpack.c.bf16 %v1159_v43, %v1155_v14  ;;  %v1840_v63 = vld [vmem:[#allocation10 + $0x1b0] sm:$0xff] }
 0x25d   :  { %2910 = vmatpush1.bf16.msra.mxu1 %v2909_v45  ;;  %3134 = vmatpush1.bf16.msra.mxu0 %v3133_v21  ;;  %v1154_v45 = vld [vmem:[#allocation7 + $0xcd0] sm:$0xff] }
 0x25e   :  { %2912 = vmatprep.subr.bf16.mxu1 %v2911_v24  ;;  %3136 = vmatprep.subr.bf16.mxu0 %v3135_v25  ;;  %v1158_v21 = vld [vmem:[#allocation7 + $0xcf0] sm:$0xff]  ;;  %v1163_v24 = vld [vmem:[#allocation7 + $0xd18] sm:$0xff] }
 0x25f   :  { %v1167_v25 = vld [vmem:[#allocation7 + $0xd38] sm:$0xff]  ;;  %v3153_v28 = vpack.c.bf16 %v1158_v21, %v1154_v45  ;;  %v2945_v45 = vpack.c.bf16 %v1188_v12, %v1184_v10  ;;  %v1811_v10 = vld [vmem:[#allocation10 + $0xc8] sm:$0xff]  ;;  %v1842_v12 = vld [vmem:[#allocation10 + $0x1c0] sm:$0xff] }
 0x260   :  { %v3155_v36 = vpack.c.bf16 %v1167_v25, %v1163_v24  ;;  %v734_v24 = vadd.f32 %v3844_v44, %v435_v13  ;;  %v1843_v13 = vld [vmem:[#allocation10 + $0x1c8] sm:$0xff] }
 0x261   :  { %2914 = vmatpush1.bf16.msra.mxu1 %v2913_v39  ;;  %3138 = vmatpush1.bf16.msra.mxu0 %v3137_v40  ;;  %v1166_v39 = vld [vmem:[#allocation7 + $0xd30] sm:$0xff]  ;;  %v1169_v40 = vld [vmem:[#allocation7 + $0xd48] sm:$0xff]  ;;  %v3219_v18 = vpack.c.bf16 %v1843_v13, %v1842_v12 }
 0x262   :  { %2916 = vmatprep.subr.bf16.mxu1 %v2915_v46  ;;  %3140 = vmatprep.subr.bf16.mxu0 %v3139_v47  ;;  %v1175_v46 = vld [vmem:[#allocation7 + $0xd78] sm:$0xff]  ;;  %v2933_v47 = vpack.c.bf16 %v1164_v30, %v1160_v29  ;;  %v3157_v48 = vpack.c.bf16 %v1166_v39, %v1162_v38  ;;  %v2935_v51 = vpack.c.bf16 %v1173_v41, %v1169_v40 }
 0x263   :  { %v3159_v52 = vpack.c.bf16 %v1175_v46, %v1171_v42  ;;  %v1804_v29 = vld [vmem:[#allocation10 + $0x90] sm:$0xff]  ;;  %v1805_v30 = vld [vmem:[#allocation10 + $0x98] sm:$0xff]  ;;  %v3173_v38 = vpack.c.bf16 %v1787_v23, %v1786_v22  ;;  %v743_v42 = vmax.f32 %v734_v24, 0.0 }
 0x264   :  { %1421 = vmatmul.mubr.f32.vlgmr.msra.gmra.mrb[4].mxu1 %v741_v54  ;;  %1705 = vmatmul.mubr.f32.vlgmr.msra.gmra.mrb[4].mxu0 %v741_v54  ;;  %v1174_v54 = vld [vmem:[#allocation7 + $0xd70] sm:$0xff]  ;;  %v1789_v41 = vld [vmem:[#allocation10 + $0x18] sm:$0xff]  ;;  %v3175_v44 = vpack.c.bf16 %v1805_v30, %v1804_v29 }
 0x265   :  { %2918 = vmatpush1.bf16.msra.mxu1 %v2917_v11  ;;  %3142 = vmatpush1.bf16.msra.mxu0 %v3141_v56  ;;  %v1177_v11 = vld [vmem:[#allocation7 + $0xd88] sm:$0xff]  ;;  %v1788_v40 = vld [vmem:[#allocation10 + $0x10] sm:$0xff]  ;;  %v1845_v23 = vld [vmem:[#allocation10 + $0x1d8] sm:$0xff] }
 0x266   :  { %2920 = vmatprep.subr.bf16.mxu1 %v2919_v59  ;;  %3144 = vmatprep.subr.bf16.mxu0 %v3143_v60  ;;  %v1181_v56 = vld [vmem:[#allocation7 + $0xda8] sm:$0xff]  ;;  %v2937_v59 = vpack.c.bf16 %v1172_v50, %v1168_v49  ;;  %v3161_v60 = vpack.c.bf16 %v1174_v54, %v1170_v53  ;;  %v3177_v53 = vpack.c.bf16 %v1789_v41, %v1788_v40  ;;  %v1844_v22 = vld [vmem:[#allocation10 + $0x1d0] sm:$0xff] }
 0x267   :  { %1491 = vmatprep.mubr.f32.mxu1 %v3594_v15  ;;  %1775 = vmatprep.mubr.f32.mxu0 %v3594_v15  ;;  %v2939_v0 = vpack.c.bf16 %v1181_v56, %v1177_v11  ;;  %v1806_v49 = vld [vmem:[#allocation10 + $0xa0] sm:$0xff]  ;;  %v1807_v50 = vld [vmem:[#allocation10 + $0xa8] sm:$0xff]  ;;  %v3223_v29 = vpack.c.bf16 %v1845_v23, %v1844_v22  ;;  %v1828_v30 = vld [vmem:[#allocation10 + $0x150] sm:$0xff] }
 0x268   :  { %v1790_v11 = vld [vmem:[#allocation10 + $0x20] sm:$0xff]  ;;  %v1791_v56 = vld [vmem:[#allocation10 + $0x28] sm:$0xff]  ;;  %v3179_v57 = vpack.c.bf16 %v1807_v50, %v1806_v49 }
 0x269   :  { %2922 = vmatpush1.bf16.msra.mxu1 %v2921_v3  ;;  %3146 = vmatpush1.bf16.msra.mxu0 %v3145_v4  ;;  %v1182_v3 = vld [vmem:[#allocation7 + $0xdb0] sm:$0xff]  ;;  %v1185_v4 = vld [vmem:[#allocation7 + $0xdc8] sm:$0xff] }
 0x26a   :  { %2924 = vmatprep.subr.bf16.mxu1 %v2923_v7  ;;  %3148 = vmatprep.subr.bf16.mxu0 %v3147_v8  ;;  %v1191_v7 = vld [vmem:[#allocation7 + $0xdf8] sm:$0xff]  ;;  %v2941_v8 = vpack.c.bf16 %v1180_v62, %v1176_v61  ;;  %v3165_v9 = vpack.c.bf16 %v1182_v3, %v1178_v2  ;;  %v2943_v14 = vpack.c.bf16 %v1189_v5, %v1185_v4  ;;  %v1847_v40 = vld [vmem:[#allocation10 + $0x1e8] sm:$0xff]  ;;  %v1830_v49 = vld [vmem:[#allocation10 + $0x160] sm:$0xff] }
 0x26b   :  { %v3167_v43 = vpack.c.bf16 %v1191_v7, %v1187_v6  ;;  %v1808_v61 = vld [vmem:[#allocation10 + $0xb0] sm:$0xff]  ;;  %v1809_v62 = vld [vmem:[#allocation10 + $0xb8] sm:$0xff]  ;;  %v2002_v23 = vld [vmem:[#allocation13 + $0x20] sm:$0xff] }
 0x26c   :  { %v1792_v3 = vld [vmem:[#allocation10 + $0x30] sm:$0xff]  ;;  %v1793_v4 = vld [vmem:[#allocation10 + $0x38] sm:$0xff]  ;;  %v3183_v5 = vpack.c.bf16 %v1809_v62, %v1808_v61 }
 0x26d   :  { %2926 = vmatpush1.bf16.msra.mxu1 %v2925_v16  ;;  %3150 = vmatpush1.bf16.msra.mxu0 %v3149_v17  ;;  %v1186_v16 = vld [vmem:[#allocation7 + $0xdd0] sm:$0xff] }
 0x26e   :  { %2928 = vmatprep.subr.bf16.mxu1 %v2927_v55  ;;  %3152 = vmatprep.subr.bf16.mxu0 %v3151_v20  ;;  %v1190_v17 = vld [vmem:[#allocation7 + $0xdf0] sm:$0xff]  ;;  %v1834_v55 = vld [vmem:[#allocation10 + $0x180] sm:$0xff] }
 0x26f   :  { %v1835_v20 = vld [vmem:[#allocation10 + $0x188] sm:$0xff]  ;;  %v3169_v21 = vpack.c.bf16 %v1190_v17, %v1186_v16  ;;  %v1824_v7 = vld [vmem:[#allocation10 + $0x130] sm:$0xff]  ;;  %v1794_v16 = vld [vmem:[#allocation10 + $0x40] sm:$0xff] }
 0x270   :  { %v3203_v25 = vpack.c.bf16 %v1835_v20, %v1834_v55  ;;  %v1795_v17 = vld [vmem:[#allocation10 + $0x48] sm:$0xff]  ;;  %v1826_v55 = vld [vmem:[#allocation10 + $0x140] sm:$0xff]  ;;  %v1832_v62 = vld [vmem:[#allocation10 + $0x170] sm:$0xff] }
 0x271   :  { %2930 = vmatpush1.bf16.msra.mxu1 %v2929_v26  ;;  %3154 = vmatpush1.bf16.msra.mxu0 %v3153_v28  ;;  %v1818_v26 = vld [vmem:[#allocation10 + $0x100] sm:$0xff]  ;;  %v1819_v28 = vld [vmem:[#allocation10 + $0x108] sm:$0xff]  ;;  %v3189_v24 = vpack.c.bf16 %v1795_v17, %v1794_v16 }
 0x272   :  { %2932 = vmatprep.subr.bf16.mxu1 %v2931_v35  ;;  %3156 = vmatprep.subr.bf16.mxu0 %v3155_v36  ;;  %v1836_v35 = vld [vmem:[#allocation10 + $0x190] sm:$0xff]  ;;  %v1837_v36 = vld [vmem:[#allocation10 + $0x198] sm:$0xff]  ;;  %v3205_v39 = vpack.c.bf16 %v1819_v28, %v1818_v26  ;;  %v1827_v20 = vld [vmem:[#allocation10 + $0x148] sm:$0xff] }
 0x273   :  { %v3207_v46 = vpack.c.bf16 %v1837_v36, %v1836_v35  ;;  %v1797_v26 = vld [vmem:[#allocation10 + $0x58] sm:$0xff]  ;;  %v1814_v36 = vld [vmem:[#allocation10 + $0xe0] sm:$0xff] }
 0x274   :  { %v1829_v35 = vld [vmem:[#allocation10 + $0x158] sm:$0xff] }
 0x275   :  { %2934 = vmatpush1.bf16.msra.mxu1 %v2933_v47  ;;  %3158 = vmatpush1.bf16.msra.mxu0 %v3157_v48  ;;  %v1820_v47 = vld [vmem:[#allocation10 + $0x110] sm:$0xff]  ;;  %v1821_v48 = vld [vmem:[#allocation10 + $0x118] sm:$0xff] }
 0x276   :  { %2936 = vmatprep.subr.bf16.mxu1 %v2935_v51  ;;  %3160 = vmatprep.subr.bf16.mxu0 %v3159_v52  ;;  %v1838_v51 = vld [vmem:[#allocation10 + $0x1a0] sm:$0xff]  ;;  %v1839_v52 = vld [vmem:[#allocation10 + $0x1a8] sm:$0xff]  ;;  %v3209_v54 = vpack.c.bf16 %v1821_v48, %v1820_v47 }
 0x277   :  { %v3211_v58 = vpack.c.bf16 %v1839_v52, %v1838_v51  ;;  %v1798_v47 = vld [vmem:[#allocation10 + $0x60] sm:$0xff]  ;;  %v1799_v48 = vld [vmem:[#allocation10 + $0x68] sm:$0xff] }
 0x278   :  { %v3197_v50 = vpack.c.bf16 %v1799_v48, %v1798_v47  ;;  %v1831_v51 = vld [vmem:[#allocation10 + $0x168] sm:$0xff]  ;;  %v2170_v47 = vld [vmem:[%s3954_s11] sm:$0xff]  ;;  %v2171_v48 = vld [vmem:[%s3954_s11 + $0x8] sm:$0xff] }
 0x279   :  { %2938 = vmatpush1.bf16.msra.mxu1 %v2937_v59  ;;  %3162 = vmatpush1.bf16.msra.mxu0 %v3161_v60  ;;  %v1822_v59 = vld [vmem:[#allocation10 + $0x120] sm:$0xff]  ;;  %v1823_v60 = vld [vmem:[#allocation10 + $0x128] sm:$0xff]  ;;  %v3229_v52 = vpack.c.bf16 %v1831_v51, %v1830_v49 }
 0x27a   :  { %2940 = vmatprep.subr.bf16.mxu1 %v2939_v0  ;;  %3164 = vmatprep.subr.bf16.mxu0 %v3163_v1  ;;  %v1841_v0 = vld [vmem:[#allocation10 + $0x1b8] sm:$0xff]  ;;  %v3181_v1 = vpack.c.bf16 %v1791_v56, %v1790_v11  ;;  %v3213_v2 = vpack.c.bf16 %v1823_v60, %v1822_v59  ;;  %v1848_v11 = vld [vmem:[#allocation10 + $0x1f0] sm:$0xff]  ;;  %v2172_v49 = vld [vmem:[%s3954_s11 + $0x10] sm:$0xff] }
 0x27b   :  { %v3215_v6 = vpack.c.bf16 %v1841_v0, %v1840_v63  ;;  %v1801_v59 = vld [vmem:[#allocation10 + $0x78] sm:$0xff]  ;;  %v2173_v51 = vld [vmem:[%s3954_s11 + $0x18] sm:$0xff] }
 0x27c   :  { %v1833_v63 = vld [vmem:[#allocation10 + $0x178] sm:$0xff] }
 0x27d   :  { %2942 = vmatpush1.bf16.msra.mxu1 %v2941_v8  ;;  %3166 = vmatpush1.bf16.msra.mxu0 %v3165_v9  ;;  %v1825_v8 = vld [vmem:[#allocation10 + $0x138] sm:$0xff]  ;;  %v1810_v9 = vld [vmem:[#allocation10 + $0xc0] sm:$0xff]  ;;  %v3233_v0 = vpack.c.bf16 %v1833_v63, %v1832_v62  ;;  %v2181_v63 = vld [vmem:[%s3954_s11 + $0x58] sm:$0xff] }
 0x27e   :  { %2944 = vmatprep.subr.bf16.mxu1 %v2943_v14  ;;  %3168 = vmatprep.subr.bf16.mxu0 %v3167_v43  ;;  %v3185_v14 = vpack.c.bf16 %v1793_v4, %v1792_v3  ;;  %v3217_v43 = vpack.c.bf16 %v1825_v8, %v1824_v7  ;;  %v3187_v33 = vpack.c.bf16 %v1811_v10, %v1810_v9  ;;  %v2180_v62 = vld [vmem:[%s3954_s11 + $0x50] sm:$0xff] }
 0x281   :  { %2946 = vmatpush1.bf16.msra.mxu1 %v2945_v45  ;;  %3170 = vmatpush1.bf16.msra.mxu0 %v3169_v21  ;;  %v1812_v45 = vld [vmem:[#allocation10 + $0xd0] sm:$0xff]  ;;  %v1813_v21 = vld [vmem:[#allocation10 + $0xd8] sm:$0xff] }
 0x282   :  { %3172 = vmatprep.subr.bf16.mxu1 %v3171_v19  ;;  %3204 = vmatprep.subr.bf16.mxu0 %v3203_v25  ;;  %v3221_v19 = vpack.c.bf16 %v1827_v20, %v1826_v55  ;;  %v1796_v25 = vld [vmem:[#allocation10 + $0x50] sm:$0xff]  ;;  %v3191_v28 = vpack.c.bf16 %v1813_v21, %v1812_v45  ;;  %v1998_v20 = vld [vmem:[#allocation13] sm:$0xff]  ;;  %v2001_v21 = vld [vmem:[#allocation13 + $0x18] sm:$0xff] }
 0x283   :  { %v3193_v41 = vpack.c.bf16 %v1797_v26, %v1796_v25  ;;  %v2000_v45 = vld [vmem:[#allocation13 + $0x10] sm:$0xff]  ;;  %v2005_v26 = vld [vmem:[#allocation13 + $0x38] sm:$0xff] }
 0x284   :  { %1492 = vmatmul.mubr.f32.vlgmr.msra.gmra.mrb[4].mxu1 %v743_v42  ;;  %1776 = vmatmul.mubr.f32.vlgmr.msra.gmra.mrb[4].mxu0 %v743_v42  ;;  %v3225_v42 = vpack.c.bf16 %v1829_v35, %v1828_v30  ;;  %v3242_v22 = vpack.c.bf16 %v2001_v21, %v2000_v45  ;;  %v2004_v25 = vld [vmem:[#allocation13 + $0x30] sm:$0xff]  ;;  %v2007_v30 = vld [vmem:[#allocation13 + $0x48] sm:$0xff] }
 0x285   :  { %3174 = vmatpush3.bf16.msra.mxu1 %v3173_v38  ;;  %3206 = vmatpush3.bf16.msra.mxu0 %v3205_v39  ;;  %v1815_v38 = vld [vmem:[#allocation10 + $0xe8] sm:$0xff]  ;;  %v1846_v39 = vld [vmem:[#allocation10 + $0x1e0] sm:$0xff]  ;;  %v2279_v45 = vld [vmem:[#allocation18] ss:$0 sm:$0xff] }
 0x286   :  { %3176 = vmatprep.subr.bf16.mxu1 %v3175_v44  ;;  %3208 = vmatprep.subr.bf16.mxu0 %v3207_v46  ;;  %v3195_v44 = vpack.c.bf16 %v1815_v38, %v1814_v36  ;;  %v3227_v46 = vpack.c.bf16 %v1847_v40, %v1846_v39  ;;  %v2009_v36 = vld [vmem:[#allocation13 + $0x58] sm:$0xff]  ;;  %v2010_v39 = vld [vmem:[#allocation13 + $0x60] sm:$0xff]  ;;  %v2011_v40 = vld [vmem:[#allocation13 + $0x68] sm:$0xff] }
 0x289   :  { %3178 = vmatpush3.bf16.msra.mxu1 %v3177_v53  ;;  %3210 = vmatpush3.bf16.msra.mxu0 %v3209_v54  ;;  %v1816_v53 = vld [vmem:[#allocation10 + $0xf0] sm:$0xff]  ;;  %v1817_v54 = vld [vmem:[#allocation10 + $0xf8] sm:$0xff] }
 0x28a   :  { %3180 = vmatprep.subr.bf16.mxu1 %v3179_v57  ;;  %3212 = vmatprep.subr.bf16.mxu0 %v3211_v58  ;;  %v3199_v56 = vpack.c.bf16 %v1817_v54, %v1816_v53  ;;  %v1849_v57 = vld [vmem:[#allocation10 + $0x1f8] sm:$0xff]  ;;  %v1800_v58 = vld [vmem:[#allocation10 + $0x70] sm:$0xff] }
 0x28b   :  { %v3231_v60 = vpack.c.bf16 %v1849_v57, %v1848_v11  ;;  %v3201_v61 = vpack.c.bf16 %v1801_v59, %v1800_v58  ;;  %v2174_v53 = vld [vmem:[%s3954_s11 + $0x20] sm:$0xff]  ;;  %v2175_v54 = vld [vmem:[%s3954_s11 + $0x28] sm:$0xff]  ;;  %v2177_v57 = vld [vmem:[%s3954_s11 + $0x38] sm:$0xff] }
 0x28c   :  { %v3269_v11 = vpack.c.bf16 %v2175_v54, %v2174_v53  ;;  %v2178_v59 = vld [vmem:[%s3954_s11 + $0x40] sm:$0xff] }
 0x28d   :  { %3182 = vmatpush3.bf16.msra.mxu1 %v3181_v1  ;;  %3214 = vmatpush3.bf16.msra.mxu0 %v3213_v2  ;;  %v3595_v1 = vmov 0.0|0.0   ;;  %v1192_v2 = vld [vmem:[#allocation9] sm:$0xf] }
 0x28e   :  { %3184 = vmatprep.subr.bf16.mxu1 %v3183_v5  ;;  %3216 = vmatprep.subr.bf16.mxu0 %v3215_v6  ;;  %v1197_v3 = vrot.slane %v1192_v2, %v410_v32  ;;  %v1205_v4 = vrot.slane %v1192_v2, %v418_v37  ;;  %v1201_v5 = vrot.slane %v1192_v2, %v414_v34  ;;  %v1999_v34 = vld [vmem:[#allocation13 + $0x8] sm:$0xff] }
 0x28f   :  { %v1209_v6 = vrot.slane %v1192_v2, %v422_v27  ;;  %v3239_v27 = vpack.c.bf16 %v1999_v34, %v1998_v20 }
 0x291   :  { %3186 = vmatpush3.bf16.msra.mxu1 %v3185_v14  ;;  %3218 = vmatpush3.bf16.msra.mxu0 %v3217_v43  ;;  %v2015_v14 = vld [vmem:[#allocation15] sm:$0xff]  ;;  %v2016_v43 = vld [vmem:[#allocation15 + $0x8] sm:$0xff] }
 0x292   :  { %3188 = vmatprep.subr.bf16.mxu1 %v3187_v33  ;;  %3220 = vmatprep.subr.bf16.mxu0 %v3219_v18  ;;  %v3236_v18 = vpack.c.bf16 %v2016_v43, %v2015_v14  ;;  %v2182_v43 = vld [vmem:[%s3954_s11 + $0x60] sm:$0xff] }
 0x295   :  { %3190 = vmatpush3.bf16.msra.mxu1 %v3189_v24  ;;  %3222 = vmatpush3.bf16.msra.mxu0 %v3221_v19  ;;  %v2003_v24 = vld [vmem:[#allocation13 + $0x28] sm:$0xff] }
 0x296   :  { %3192 = vmatprep.subr.bf16.mxu1 %v3191_v28  ;;  %3224 = vmatprep.subr.bf16.mxu0 %v3223_v29  ;;  %v3245_v19 = vpack.c.bf16 %v2003_v24, %v2002_v23  ;;  %v3248_v28 = vpack.c.bf16 %v2005_v26, %v2004_v25  ;;  %v2006_v29 = vld [vmem:[#allocation13 + $0x40] sm:$0xff] }
 0x297   :  { %v3251_v35 = vpack.c.bf16 %v2007_v30, %v2006_v29 }
 0x299   :  { %3194 = vmatpush3.bf16.msra.mxu1 %v3193_v41  ;;  %3226 = vmatpush3.bf16.msra.mxu0 %v3225_v42  ;;  %v3257_v41 = vpack.c.bf16 %v2011_v40, %v2010_v39  ;;  %v2012_v42 = vld [vmem:[#allocation13 + $0x70] sm:$0xff] }
 0x29a   :  { %3196 = vmatprep.subr.bf16.mxu1 %v3195_v44  ;;  %3228 = vmatprep.subr.bf16.mxu0 %v3227_v46  ;;  %v2013_v44 = vld [vmem:[#allocation13 + $0x78] sm:$0xff] }
 0x29b   :  { %v3260_v46 = vpack.c.bf16 %v2013_v44, %v2012_v42 }
 0x29d   :  { %3198 = vmatpush3.bf16.msra.mxu1 %v3197_v50  ;;  %3230 = vmatpush3.bf16.msra.mxu0 %v3229_v52  ;;  %v3263_v50 = vpack.c.bf16 %v2171_v48, %v2170_v47  ;;  %v3266_v52 = vpack.c.bf16 %v2173_v51, %v2172_v49 }
 0x29e   :  { %3200 = vmatprep.subr.bf16.mxu1 %v3199_v56  ;;  %3232 = vmatprep.subr.bf16.mxu0 %v3231_v60  ;;  %v2176_v56 = vld [vmem:[%s3954_s11 + $0x30] sm:$0xff]  ;;  %v2179_v60 = vld [vmem:[%s3954_s11 + $0x48] sm:$0xff] }
 0x29f   :  { %v3272_v58 = vpack.c.bf16 %v2177_v57, %v2176_v56 }
 0x2a1   :  { %3202 = vmatpush3.bf16.msra.mxu1 %v3201_v61  ;;  %3234 = vmatpush3.bf16.msra.mxu0 %v3233_v0  ;;  %v3275_v61 = vpack.c.bf16 %v2179_v60, %v2178_v59  ;;  %v3278_v0 = vpack.c.bf16 %v2181_v63, %v2180_v62 }
 0x2a2   :  { %3235 = vmatprep.subr.bf16.mxu1 %v3595_v1  ;;  %3262 = vmatprep.subr.bf16.mxu0 %v3595_v1 }
 0x357   :  { %v1493_v7 = vpop.f32.mrb[4].mxu1  ;;  %v1777_v8 = vpop.f32.mrb[4].mxu0 }
 0x358   :  { %v3286_v9 = vadd.f32 %v1493_v7, %v1197_v3  ;;  %v3288_v10 = vadd.f32 %v1777_v8, %v1205_v4  ;;  %v1495_v12 = vpop.f32.mrb[5].mxu1  ;;  %v1779_v13 = vpop.f32.mrb[5].mxu0  ;;  %v2276_v4 = vld [vmem:[#allocation12] ss:$0 sm:$0xff] }
 0x359   :  { %v3287_v16 = vadd.f32 %v1495_v12, %v1201_v5  ;;  %v3289_v17 = vadd.f32 %v1779_v13, %v1209_v6 }
 0x35a   :  { %v1782_v37 = vmax.f32 %v3286_v9, 0.0  ;;  %v1784_v55 = vmax.f32 %v3288_v10, 0.0 }
 0x35b   :  { %v1783_v32 = vmax.f32 %v3287_v16, 0.0  ;;  %v1785_v33 = vmax.f32 %v3289_v17, 0.0  ;;  %v2183_v16 = vld [vmem:[%s3954_s11 + $0x68] sm:$0xff] }
 0x35c   :  { %v3281_v17 = vpack.c.bf16 %v2183_v16, %v2182_v43 }
 0x35d   :  { %1921 = vmatprep.mubr.f32.mxu1 %v1783_v32  ;;  %1991 = vmatprep.mubr.f32.mxu0 %v1785_v33  ;;  %v2184_v32 = vld [vmem:[%s3954_s11 + $0x70] sm:$0xff]  ;;  %v2185_v33 = vld [vmem:[%s3954_s11 + $0x78] sm:$0xff] }
 0x35e   :  { %1922 = vmatmul.mubr.f32.vlgmr.msra.gmra.mrb[6].mxu1 %v1782_v37  ;;  %1992 = vmatmul.mubr.f32.vlgmr.msra.gmra.mrb[6].mxu0 %v1784_v55  ;;  %v2278_v55 = vld [vmem:[#allocation16] ss:$0 sm:$0xff] }
 0x35f   :  { %3237 = vmatpush3.bf16.msra.mxu1 %v3236_v18  ;;  %2426 = vmatprep.mubr.msk.f32.mxu1 %vm3596_vm0, %v3594_v15  ;;  %v3284_v18 = vpack.c.bf16 %v2185_v33, %v2184_v32 }
 0x360   :  { %3238 = vmatprep.subr.bf16.mxu1 %v3595_v1  ;;  %2496 = vmatprep.mubr.msk.f32.mxu0 %vm3596_vm0, %v3594_v15 }
 0x361   :  { %3264 = vmatpush3.bf16.msra.mxu0 %v3263_v50 }
 0x362   :  { %2427 = vmatmul.mubr.msk.f32.vlgmr.msra.gmra.mrb[8].mxu1 %vm2017_vm1, %v2014_v31  ;;  %3265 = vmatprep.subr.bf16.mxu0 %v3595_v1 }
 0x363   :  { %3240 = vmatpush3.bf16.msra.mxu1 %v3239_v27  ;;  %2461 = vmatprep.mubr.msk.f32.mxu1 %vm3596_vm0, %v3594_v15  ;;  %v2008_v15 = vld [vmem:[#allocation13 + $0x50] sm:$0xff] }
 0x364   :  { %3241 = vmatprep.subr.bf16.mxu1 %v3595_v1  ;;  %v3254_v38 = vpack.c.bf16 %v2009_v36, %v2008_v15 }
 0x365   :  { %3267 = vmatpush3.bf16.msra.mxu0 %v3266_v52 }
 0x366   :  { %3268 = vmatprep.subr.bf16.mxu0 %v3595_v1 }
 0x367   :  { %3243 = vmatpush3.bf16.msra.mxu1 %v3242_v22 }
 0x368   :  { %3244 = vmatprep.subr.bf16.mxu1 %v3595_v1 }
 0x369   :  { %3270 = vmatpush3.bf16.msra.mxu0 %v3269_v11 }
 0x36a   :  { %3271 = vmatprep.subr.bf16.mxu0 %v3595_v1 }
 0x36b   :  { %3246 = vmatpush3.bf16.msra.mxu1 %v3245_v19 }
 0x36c   :  { %3247 = vmatprep.subr.bf16.mxu1 %v3595_v1 }
 0x36d   :  { %3273 = vmatpush3.bf16.msra.mxu0 %v3272_v58 }
 0x36e   :  { %3274 = vmatprep.subr.bf16.mxu0 %v3595_v1 }
 0x36f   :  { %3249 = vmatpush3.bf16.msra.mxu1 %v3248_v28 }
 0x370   :  { %3250 = vmatprep.subr.bf16.mxu1 %v3595_v1 }
 0x371   :  { %3276 = vmatpush3.bf16.msra.mxu0 %v3275_v61 }
 0x372   :  { %3277 = vmatprep.subr.bf16.mxu0 %v3595_v1 }
 0x373   :  { %3252 = vmatpush3.bf16.msra.mxu1 %v3251_v35 }
 0x374   :  { %3253 = vmatprep.subr.bf16.mxu1 %v3595_v1 }
 0x375   :  { %3279 = vmatpush3.bf16.msra.mxu0 %v3278_v0 }
 0x376   :  { %3280 = vmatprep.subr.bf16.mxu0 %v3595_v1 }
 0x377   :  { %3255 = vmatpush3.bf16.msra.mxu1 %v3254_v38 }
 0x378   :  { %3256 = vmatprep.subr.bf16.mxu1 %v3595_v1 }
 0x379   :  { %3282 = vmatpush3.bf16.msra.mxu0 %v3281_v17 }
 0x37a   :  { %3283 = vmatprep.subr.bf16.mxu0 %v3595_v1 }
 0x37b   :  { %3258 = vmatpush3.bf16.msra.mxu1 %v3257_v41 }
 0x37c   :  { %3259 = vmatprep.subr.bf16.mxu1 %v3595_v1 }
 0x37d   :  { %3285 = vmatpush3.bf16.msra.mxu0 %v3284_v18 }
 0x37f   :  { %3261 = vmatpush3.bf16.msra.mxu1 %v3260_v46 }
 0x431   :  { %v2347_v2 = vpop.f32.mrb[6].mxu1  ;;  %v2382_v3 = vpop.f32.mrb[6].mxu0 }
 0x432   :  { %v2348_v5 = vpop.f32.mrb[7].mxu1  ;;  %v2383_v6 = vpop.f32.mrb[7].mxu0 }
 0x433   :  { %v2349_v7 = vadd.f32 %v2348_v5, %v2347_v2  ;;  %v2384_v8 = vadd.f32 %v2383_v6, %v2382_v3 }
 0x435   :  { %v1924_v9 = vadd.f32 %v2349_v7, %v2276_v4  ;;  %v2087_v10 = vpop.f32.mrb[8].mxu1 }
 0x436   :  { %v2428_v12 = vpop.f32.mrb[9].mxu1 }
 0x437   :  { %v1994_v13 = vadd.f32 %v2384_v8, %v1924_v9 }
 0x439   :  { %v1997_v14 = vmax.f32 %v1994_v13, 0.0 }
 0x43b   :  { %2462 = vmatmul.mubr.f32.vlgmr.msra.gmra.mrb[10].mxu1 %v1997_v14 }
 0x50e   :  { %v2157_v37 = vpop.f32.mrb[10].mxu1 }
 0x50f   :  { %v2158_v20 = vadd.f32 %v2157_v37, %v2087_v10  ;;  %v2463_v34 = vpop.f32.mrb[11].mxu1 }
 0x511   :  { %v2168_v31 = vadd.f32 %v2278_v55, %v2158_v20 }
 0x513   :  { %v2169_v27 = vmax.f32 %v2168_v31, 0.0 }
 0x515   :  { %2497 = vmatmul.mubr.f32.vlgmr.msra.gmra.mrb[8].mxu0 %v2169_v27 }
 0x5e8   :  { %v2259_v21 = vpop.f32.mrb[8].mxu0 }
 0x5e9   :  { %v2260_v1 = vadd.f32 %v2279_v45, %v2259_v21  ;;  %v2498_v22 = vpop.f32.mrb[9].mxu0 }
 0x5eb   :  { %2264 = vst.msk [vmem:[%s3956_s13] sm:$0x3] %vm2263_vm2, %v2260_v1 }
 0x5ec   :  { %2269 = vsyncpa [#allocation3], 1 }
 0x5ed   :  { %2270 = vsyncpa [#allocation5], 1 }
 0x5ee   :  { %2271 = vsyncpa [#allocation8], 1 }
 0x5ef   :  { %2272 = vsyncpa [#allocation11], 1 }
 0x5f0   :  { %2273 = vsyncpa [#allocation14], 1 }
 0x5f1   :  { %2274 = vsyncpa [#allocation17], 1 }

</bundles_post_ra>
